<compile_context>
chip_gen: v6e
topology: v6e:2x2x1
jax: 0.10.0
libtpu: 0.0.40
codegen_flags: <defaults>
</compile_context>

<pallas_src>
import jax
import jax.numpy as jnp
from jax.experimental import pallas as pl
from jax.experimental.pallas import tpu as pltpu

HIDDEN = 256
VOCAB = 64          # vocab_size = len(tokenizer.word_index) + 1  (synthetic choice)
VOCAB_PAD = 128     # lane-dense padded output width
BATCH = 8
SEQ = 8


def char_model_kernel(x_ref,        # (T, B)     f32  VMEM  (time-major input)
                      vecs_ref,     # (3, H)     f32  VMEM  rows: [W_ih_l0^T, b1, b2]
                      whh1_ref,     # (H, H)     f32  VMEM  (= W_hh_l0^T)
                      blin_ref,     # (1, Vpad)  f32  VMEM  (zero-padded linear bias)
                      wih2_hbm,     # (H, H)     f32  HBM   (= W_ih_l1^T)
                      whh2_hbm,     # (H, H)     f32  HBM   (= W_hh_l1^T)
                      wlin_hbm,     # (H, Vpad)  f32  HBM   (= W_lin^T, zero-padded)
                      out_ref,      # (B, Vpad)  f32  VMEM
                      wih2_vmem,    # (H, H)     f32  VMEM scratch
                      whh2_vmem,    # (H, H)     f32  VMEM scratch
                      wlin_vmem,    # (H, Vpad)  f32  VMEM scratch
                      sem):         # DMA sems (3,)
    T, B = x_ref.shape
    H = whh1_ref.shape[0]

    # ---- start manual DMAs for weights not needed immediately; their HBM->VMEM
    #      transfer hides behind the start of the recurrence ----
    cp_wih2 = pltpu.make_async_copy(wih2_hbm, wih2_vmem, sem.at[0])
    cp_whh2 = pltpu.make_async_copy(whh2_hbm, whh2_vmem, sem.at[1])
    cp_wlin = pltpu.make_async_copy(wlin_hbm, wlin_vmem, sem.at[2])
    cp_wih2.start()
    cp_whh2.start()
    cp_wlin.start()

    # ---- hoisted loop-invariant loads ----
    xt = x_ref[...]                   # (T, B)
    vecs = vecs_ref[...]              # (3, H)
    wih1 = vecs[0:1, :]               # (1, H)  = W_ih_l0^T  (input_size = 1)
    b1 = vecs[1:2, :]                 # (1, H)  = b_ih_l0 + b_hh_l0
    b2 = vecs[2:3, :]                 # (1, H)  = b_ih_l1 + b_hh_l1
    whh1 = whh1_ref[...]              # (H, H)

    # Input-to-hidden contribution for ALL timesteps, time-major so inp1[t]
    # selects whole vreg tiles.  input_size == 1 -> broadcasted outer product.
    inp1 = xt[:, :, None] * wih1[None, :, :] + b1[None, :, :]   # (T, B, H)

    # ---- recurrence carried in vregs; step 0 peeled (h1 = h2 = 0) ----
    h1 = jnp.tanh(inp1[0])                                      # (B, H)

    cp_wih2.wait()
    wih2 = wih2_vmem[...]                                       # (H, H)
    h2 = jnp.tanh(jnp.dot(h1, wih2, preferred_element_type=jnp.float32) + b2)

    cp_whh2.wait()
    whh2 = whh2_vmem[...]                                       # (H, H)

    # Remaining steps.  Layer-2 is un-fused: the hh2 dot only depends on the
    # previous step's h2, so it can overlap layer-1's matmul + tanh.
    # TODO(synk): if bundle dumps show whh1/wih2/whh2 being re-pushed into the
    # MXU each unrolled step, drive the MXU explicitly with matmul_push_rhs.
    for t in range(1, T):
        hh2 = jnp.dot(h2, whh2, preferred_element_type=jnp.float32)
        h1 = jnp.tanh(inp1[t]
                      + jnp.dot(h1, whh1, preferred_element_type=jnp.float32))
        h2 = jnp.tanh(jnp.dot(h1, wih2, preferred_element_type=jnp.float32)
                      + hh2 + b2)

    # last step -> ReLU -> (Dropout = identity in eval) -> Linear (lane-dense 128)
    h_last = jnp.maximum(h2, 0.0)
    cp_wlin.wait()
    out_ref[...] = (jnp.dot(h_last, wlin_vmem[...],
                            preferred_element_type=jnp.float32)
                    + blin_ref[...])


def prepare_params(params):
    """One-time layout transform of the PyTorch-shaped params for the kernel."""
    (w_ih1, w_hh1, b_ih1, b_hh1,
     w_ih2, w_hh2, b_ih2, b_hh2,
     w_lin, b_lin) = params
    vecs = jnp.stack([w_ih1.reshape(HIDDEN),        # W_ih_l0^T row (input_size = 1)
                      b_ih1 + b_hh1,                # fused layer-1 bias
                      b_ih2 + b_hh2], axis=0)       # fused layer-2 bias -> (3, H)
    whh1_t = w_hh1.T                                # (H, H)
    wih2_t = w_ih2.T                                # (H, H)
    whh2_t = w_hh2.T                                # (H, H)
    wlin_pad = jnp.zeros((HIDDEN, VOCAB_PAD), jnp.float32).at[:, :VOCAB].set(w_lin.T)
    blin_pad = jnp.zeros((1, VOCAB_PAD), jnp.float32).at[:, :VOCAB].set(
        b_lin.reshape(1, VOCAB))
    return (vecs, whh1_t, blin_pad, wih2_t, whh2_t, wlin_pad)


def char_model_forward(x, prepped):
    """x: (B, T, 1) float32. Returns logits (B, VOCAB)."""
    B, T, _ = x.shape
    x_tb = jnp.transpose(x.reshape(B, T).astype(jnp.float32))   # (T, B), ~256 B
    vecs, whh1_t, blin_pad, wih2_t, whh2_t, wlin_pad = prepped
    H = HIDDEN

    out_pad = pl.pallas_call(
        char_model_kernel,
        out_shape=jax.ShapeDtypeStruct((B, VOCAB_PAD), jnp.float32),
        in_specs=[pl.BlockSpec(memory_space=pltpu.MemorySpace.VMEM),   # x (T, B)
                  pl.BlockSpec(memory_space=pltpu.MemorySpace.VMEM),   # vecs
                  pl.BlockSpec(memory_space=pltpu.MemorySpace.VMEM),   # whh1
                  pl.BlockSpec(memory_space=pltpu.MemorySpace.VMEM),   # blin
                  pl.BlockSpec(memory_space=pl.ANY),                   # wih2 (HBM)
                  pl.BlockSpec(memory_space=pl.ANY),                   # whh2 (HBM)
                  pl.BlockSpec(memory_space=pl.ANY)],                  # wlin (HBM)
        out_specs=pl.BlockSpec(memory_space=pltpu.MemorySpace.VMEM),
        scratch_shapes=[pltpu.VMEM((H, H), jnp.float32),
                        pltpu.VMEM((H, H), jnp.float32),
                        pltpu.VMEM((H, VOCAB_PAD), jnp.float32),
                        pltpu.SemaphoreType.DMA((3,))],
    )(x_tb, vecs, whh1_t, blin_pad, wih2_t, whh2_t, wlin_pad)

    return out_pad[:, :VOCAB]


def make_params(key):
    """Deterministic init mirroring PyTorch shapes (uniform +-1/sqrt(H))."""
    ks = jax.random.split(key, 10)
    bound = 1.0 / jnp.sqrt(jnp.float32(HIDDEN))

    def u(k, shape):
        return jax.random.uniform(k, shape, jnp.float32, -bound, bound)

    w_ih1 = u(ks[0], (HIDDEN, 1))         # weight_ih_l0
    w_hh1 = u(ks[1], (HIDDEN, HIDDEN))    # weight_hh_l0
    b_ih1 = u(ks[2], (HIDDEN,))
    b_hh1 = u(ks[3], (HIDDEN,))
    w_ih2 = u(ks[4], (HIDDEN, HIDDEN))    # weight_ih_l1
    w_hh2 = u(ks[5], (HIDDEN, HIDDEN))    # weight_hh_l1
    b_ih2 = u(ks[6], (HIDDEN,))
    b_hh2 = u(ks[7], (HIDDEN,))
    w_lin = u(ks[8], (VOCAB, HIDDEN))     # nn.Linear(256, vocab_size).weight
    b_lin = u(ks[9], (VOCAB,))
    return (w_ih1, w_hh1, b_ih1, b_hh1,
            w_ih2, w_hh2, b_ih2, b_hh2,
            w_lin, b_lin)


def reference_forward(x, params):
    """Pure-JAX reference matching PyTorch nn.RNN(tanh) eval-mode semantics."""
    (w_ih1, w_hh1, b_ih1, b_hh1,
     w_ih2, w_hh2, b_ih2, b_hh2,
     w_lin, b_lin) = params
    B, T, _ = x.shape
    h1 = jnp.zeros((B, HIDDEN), jnp.float32)
    h2 = jnp.zeros((B, HIDDEN), jnp.float32)
    for t in range(T):
        x_t = x[:, t, :]                                       # (B, 1)
        h1 = jnp.tanh(x_t @ w_ih1.T + b_ih1 + h1 @ w_hh1.T + b_hh1)
        h2 = jnp.tanh(h1 @ w_ih2.T + b_ih2 + h2 @ w_hh2.T + b_hh2)
    h = jnp.maximum(h2, 0.0)
    return h @ w_lin.T + b_lin


if __name__ == "__main__":
    key = jax.random.PRNGKey(0)
    k_x, k_p = jax.random.split(key)

    x = jax.random.normal(k_x, (BATCH, SEQ, 1), jnp.float32)
    params = make_params(k_p)
    prepped = prepare_params(params)          # one-time layout prep (not per call)

    out = char_model_forward(x, prepped)
    out = jax.block_until_ready(out)

    ref = reference_forward(x, params)
    assert out.shape == (BATCH, VOCAB)
    assert jnp.allclose(out, ref, atol=1e-4, rtol=1e-4), (
        f"max abs err {jnp.max(jnp.abs(out - ref))}")

    print("KERNEL_OK")
</pallas_src>

<mosaic_0001>
module attributes {stable_mosaic.version = 11 : i64} {
  func.func @char_model_kernel(%arg0: memref<8x8xf32, #tpu.memory_space<vmem>>, %arg1: memref<3x256xf32, #tpu.memory_space<vmem>>, %arg2: memref<256x256xf32, #tpu.memory_space<vmem>>, %arg3: memref<1x128xf32, #tpu.memory_space<vmem>>, %arg4: memref<256x256xf32, #tpu.memory_space<any>>, %arg5: memref<256x256xf32, #tpu.memory_space<any>>, %arg6: memref<256x128xf32, #tpu.memory_space<any>>, %arg7: memref<8x128xf32, #tpu.memory_space<vmem>>, %arg8: memref<256x256xf32, #tpu.memory_space<vmem>>, %arg9: memref<256x256xf32, #tpu.memory_space<vmem>>, %arg10: memref<256x128xf32, #tpu.memory_space<vmem>>, %arg11: memref<3x!tpu.dma_semaphore, #tpu.memory_space<semaphore_mem>>) attributes {dimension_semantics = [], scalar_prefetch = 0 : i64, scratch_operands = 4 : i64, tpu.core_type = #tpu.core_type<tc>} {
    %c0_i32 = arith.constant 0 : i32
    %0 = tpu.memref_slice %arg11[%c0_i32] : memref<3x!tpu.dma_semaphore, #tpu.memory_space<semaphore_mem>> -> memref<1x!tpu.dma_semaphore, #tpu.memory_space<semaphore_mem>>
    %1 = tpu.memref_squeeze %0 : memref<1x!tpu.dma_semaphore, #tpu.memory_space<semaphore_mem>> -> memref<!tpu.dma_semaphore, #tpu.memory_space<semaphore_mem>>
    tpu.enqueue_dma source(%arg4 : memref<256x256xf32, #tpu.memory_space<any>>) target(%arg8 : memref<256x256xf32, #tpu.memory_space<vmem>>) target_semaphore(%1 : memref<!tpu.dma_semaphore, #tpu.memory_space<semaphore_mem>>)
    %c1_i32 = arith.constant 1 : i32
    %2 = tpu.memref_slice %arg11[%c1_i32] : memref<3x!tpu.dma_semaphore, #tpu.memory_space<semaphore_mem>> -> memref<1x!tpu.dma_semaphore, #tpu.memory_space<semaphore_mem>>
    %3 = tpu.memref_squeeze %2 : memref<1x!tpu.dma_semaphore, #tpu.memory_space<semaphore_mem>> -> memref<!tpu.dma_semaphore, #tpu.memory_space<semaphore_mem>>
    tpu.enqueue_dma source(%arg5 : memref<256x256xf32, #tpu.memory_space<any>>) target(%arg9 : memref<256x256xf32, #tpu.memory_space<vmem>>) target_semaphore(%3 : memref<!tpu.dma_semaphore, #tpu.memory_space<semaphore_mem>>)
    %c2_i32 = arith.constant 2 : i32
    %4 = tpu.memref_slice %arg11[%c2_i32] : memref<3x!tpu.dma_semaphore, #tpu.memory_space<semaphore_mem>> -> memref<1x!tpu.dma_semaphore, #tpu.memory_space<semaphore_mem>>
    %5 = tpu.memref_squeeze %4 : memref<1x!tpu.dma_semaphore, #tpu.memory_space<semaphore_mem>> -> memref<!tpu.dma_semaphore, #tpu.memory_space<semaphore_mem>>
    tpu.enqueue_dma source(%arg6 : memref<256x128xf32, #tpu.memory_space<any>>) target(%arg10 : memref<256x128xf32, #tpu.memory_space<vmem>>) target_semaphore(%5 : memref<!tpu.dma_semaphore, #tpu.memory_space<semaphore_mem>>)
    %c0 = arith.constant 0 : index
    %c0_0 = arith.constant 0 : index
    %6 = vector.load %arg0[%c0, %c0_0] : memref<8x8xf32, #tpu.memory_space<vmem>>, vector<8x8xf32>
    %c0_1 = arith.constant 0 : index
    %c0_2 = arith.constant 0 : index
    %7 = vector.load %arg1[%c0_1, %c0_2] : memref<3x256xf32, #tpu.memory_space<vmem>>, vector<3x256xf32>
    %8 = vector.extract_strided_slice %7 {offsets = [0, 0], sizes = [1, 256], strides = [1, 1]} : vector<3x256xf32> to vector<1x256xf32>
    %9 = vector.extract_strided_slice %7 {offsets = [1, 0], sizes = [1, 256], strides = [1, 1]} : vector<3x256xf32> to vector<1x256xf32>
    %10 = vector.extract_strided_slice %7 {offsets = [2, 0], sizes = [1, 256], strides = [1, 1]} : vector<3x256xf32> to vector<1x256xf32>
    %c0_3 = arith.constant 0 : index
    %c0_4 = arith.constant 0 : index
    %11 = vector.load %arg2[%c0_3, %c0_4] : memref<256x256xf32, #tpu.memory_space<vmem>>, vector<256x256xf32>
    %12 = vector.shape_cast %6 : vector<8x8xf32> to vector<8x8x1xf32>
    %13 = vector.shape_cast %8 : vector<1x256xf32> to vector<1x1x256xf32>
    %14 = vector.broadcast %12 : vector<8x8x1xf32> to vector<8x8x256xf32>
    %15 = vector.broadcast %13 : vector<1x1x256xf32> to vector<8x8x256xf32>
    %16 = arith.mulf %14, %15 : vector<8x8x256xf32>
    %17 = vector.shape_cast %9 : vector<1x256xf32> to vector<1x1x256xf32>
    %18 = vector.broadcast %17 : vector<1x1x256xf32> to vector<8x8x256xf32>
    %19 = arith.addf %16, %18 : vector<8x8x256xf32>
    %20 = vector.extract_strided_slice %19 {offsets = [0, 0, 0], sizes = [1, 8, 256], strides = [1, 1, 1]} : vector<8x8x256xf32> to vector<1x8x256xf32>
    %21 = vector.shape_cast %20 : vector<1x8x256xf32> to vector<8x256xf32>
    %22 = math.tanh %21 : vector<8x256xf32>
    %c0_i32_5 = arith.constant 0 : i32
    %23 = tpu.memref_slice %arg11[%c0_i32_5] : memref<3x!tpu.dma_semaphore, #tpu.memory_space<semaphore_mem>> -> memref<1x!tpu.dma_semaphore, #tpu.memory_space<semaphore_mem>>
    %24 = tpu.memref_squeeze %23 : memref<1x!tpu.dma_semaphore, #tpu.memory_space<semaphore_mem>> -> memref<!tpu.dma_semaphore, #tpu.memory_space<semaphore_mem>>
    tpu.wait_dma2 semaphore(%24 : memref<!tpu.dma_semaphore, #tpu.memory_space<semaphore_mem>>) src(%arg4 : memref<256x256xf32, #tpu.memory_space<any>>) dst(%arg8 : memref<256x256xf32, #tpu.memory_space<vmem>>)
    %c0_6 = arith.constant 0 : index
    %c0_7 = arith.constant 0 : index
    %25 = vector.load %arg8[%c0_6, %c0_7] : memref<256x256xf32, #tpu.memory_space<vmem>>, vector<256x256xf32>
    %cst = arith.constant dense<0.000000e+00> : vector<8x256xf32>
    %26 = tpu.matmul %22, %25, %cst {dimension_numbers = #tpu.dot_dimension_numbers<[1], [0], [0], [1], [0, 0, 1, 1], [], []>} : vector<8x256xf32>, vector<256x256xf32>, vector<8x256xf32> -> vector<8x256xf32>
    %27 = vector.broadcast %10 : vector<1x256xf32> to vector<8x256xf32>
    %28 = arith.addf %26, %27 : vector<8x256xf32>
    %29 = math.tanh %28 : vector<8x256xf32>
    %c1_i32_8 = arith.constant 1 : i32
    %30 = tpu.memref_slice %arg11[%c1_i32_8] : memref<3x!tpu.dma_semaphore, #tpu.memory_space<semaphore_mem>> -> memref<1x!tpu.dma_semaphore, #tpu.memory_space<semaphore_mem>>
    %31 = tpu.memref_squeeze %30 : memref<1x!tpu.dma_semaphore, #tpu.memory_space<semaphore_mem>> -> memref<!tpu.dma_semaphore, #tpu.memory_space<semaphore_mem>>
    tpu.wait_dma2 semaphore(%31 : memref<!tpu.dma_semaphore, #tpu.memory_space<semaphore_mem>>) src(%arg5 : memref<256x256xf32, #tpu.memory_space<any>>) dst(%arg9 : memref<256x256xf32, #tpu.memory_space<vmem>>)
    %c0_9 = arith.constant 0 : index
    %c0_10 = arith.constant 0 : index
    %32 = vector.load %arg9[%c0_9, %c0_10] : memref<256x256xf32, #tpu.memory_space<vmem>>, vector<256x256xf32>
    %cst_11 = arith.constant dense<0.000000e+00> : vector<8x256xf32>
    %33 = tpu.matmul %29, %32, %cst_11 {dimension_numbers = #tpu.dot_dimension_numbers<[1], [0], [0], [1], [0, 0, 1, 1], [], []>} : vector<8x256xf32>, vector<256x256xf32>, vector<8x256xf32> -> vector<8x256xf32>
    %34 = vector.extract_strided_slice %19 {offsets = [1, 0, 0], sizes = [1, 8, 256], strides = [1, 1, 1]} : vector<8x8x256xf32> to vector<1x8x256xf32>
    %35 = vector.shape_cast %34 : vector<1x8x256xf32> to vector<8x256xf32>
    %cst_12 = arith.constant dense<0.000000e+00> : vector<8x256xf32>
    %36 = tpu.matmul %22, %11, %cst_12 {dimension_numbers = #tpu.dot_dimension_numbers<[1], [0], [0], [1], [0, 0, 1, 1], [], []>} : vector<8x256xf32>, vector<256x256xf32>, vector<8x256xf32> -> vector<8x256xf32>
    %37 = arith.addf %35, %36 : vector<8x256xf32>
    %38 = math.tanh %37 : vector<8x256xf32>
    %cst_13 = arith.constant dense<0.000000e+00> : vector<8x256xf32>
    %39 = tpu.matmul %38, %25, %cst_13 {dimension_numbers = #tpu.dot_dimension_numbers<[1], [0], [0], [1], [0, 0, 1, 1], [], []>} : vector<8x256xf32>, vector<256x256xf32>, vector<8x256xf32> -> vector<8x256xf32>
    %40 = arith.addf %39, %33 : vector<8x256xf32>
    %41 = vector.broadcast %10 : vector<1x256xf32> to vector<8x256xf32>
    %42 = arith.addf %40, %41 : vector<8x256xf32>
    %43 = math.tanh %42 : vector<8x256xf32>
    %cst_14 = arith.constant dense<0.000000e+00> : vector<8x256xf32>
    %44 = tpu.matmul %43, %32, %cst_14 {dimension_numbers = #tpu.dot_dimension_numbers<[1], [0], [0], [1], [0, 0, 1, 1], [], []>} : vector<8x256xf32>, vector<256x256xf32>, vector<8x256xf32> -> vector<8x256xf32>
    %45 = vector.extract_strided_slice %19 {offsets = [2, 0, 0], sizes = [1, 8, 256], strides = [1, 1, 1]} : vector<8x8x256xf32> to vector<1x8x256xf32>
    %46 = vector.shape_cast %45 : vector<1x8x256xf32> to vector<8x256xf32>
    %cst_15 = arith.constant dense<0.000000e+00> : vector<8x256xf32>
    %47 = tpu.matmul %38, %11, %cst_15 {dimension_numbers = #tpu.dot_dimension_numbers<[1], [0], [0], [1], [0, 0, 1, 1], [], []>} : vector<8x256xf32>, vector<256x256xf32>, vector<8x256xf32> -> vector<8x256xf32>
    %48 = arith.addf %46, %47 : vector<8x256xf32>
    %49 = math.tanh %48 : vector<8x256xf32>
    %cst_16 = arith.constant dense<0.000000e+00> : vector<8x256xf32>
    %50 = tpu.matmul %49, %25, %cst_16 {dimension_numbers = #tpu.dot_dimension_numbers<[1], [0], [0], [1], [0, 0, 1, 1], [], []>} : vector<8x256xf32>, vector<256x256xf32>, vector<8x256xf32> -> vector<8x256xf32>
    %51 = arith.addf %50, %44 : vector<8x256xf32>
    %52 = vector.broadcast %10 : vector<1x256xf32> to vector<8x256xf32>
    %53 = arith.addf %51, %52 : vector<8x256xf32>
    %54 = math.tanh %53 : vector<8x256xf32>
    %cst_17 = arith.constant dense<0.000000e+00> : vector<8x256xf32>
    %55 = tpu.matmul %54, %32, %cst_17 {dimension_numbers = #tpu.dot_dimension_numbers<[1], [0], [0], [1], [0, 0, 1, 1], [], []>} : vector<8x256xf32>, vector<256x256xf32>, vector<8x256xf32> -> vector<8x256xf32>
    %56 = vector.extract_strided_slice %19 {offsets = [3, 0, 0], sizes = [1, 8, 256], strides = [1, 1, 1]} : vector<8x8x256xf32> to vector<1x8x256xf32>
    %57 = vector.shape_cast %56 : vector<1x8x256xf32> to vector<8x256xf32>
    %cst_18 = arith.constant dense<0.000000e+00> : vector<8x256xf32>
    %58 = tpu.matmul %49, %11, %cst_18 {dimension_numbers = #tpu.dot_dimension_numbers<[1], [0], [0], [1], [0, 0, 1, 1], [], []>} : vector<8x256xf32>, vector<256x256xf32>, vector<8x256xf32> -> vector<8x256xf32>
    %59 = arith.addf %57, %58 : vector<8x256xf32>
    %60 = math.tanh %59 : vector<8x256xf32>
    %cst_19 = arith.constant dense<0.000000e+00> : vector<8x256xf32>
    %61 = tpu.matmul %60, %25, %cst_19 {dimension_numbers = #tpu.dot_dimension_numbers<[1], [0], [0], [1], [0, 0, 1, 1], [], []>} : vector<8x256xf32>, vector<256x256xf32>, vector<8x256xf32> -> vector<8x256xf32>
    %62 = arith.addf %61, %55 : vector<8x256xf32>
    %63 = vector.broadcast %10 : vector<1x256xf32> to vector<8x256xf32>
    %64 = arith.addf %62, %63 : vector<8x256xf32>
    %65 = math.tanh %64 : vector<8x256xf32>
    %cst_20 = arith.constant dense<0.000000e+00> : vector<8x256xf32>
    %66 = tpu.matmul %65, %32, %cst_20 {dimension_numbers = #tpu.dot_dimension_numbers<[1], [0], [0], [1], [0, 0, 1, 1], [], []>} : vector<8x256xf32>, vector<256x256xf32>, vector<8x256xf32> -> vector<8x256xf32>
    %67 = vector.extract_strided_slice %19 {offsets = [4, 0, 0], sizes = [1, 8, 256], strides = [1, 1, 1]} : vector<8x8x256xf32> to vector<1x8x256xf32>
    %68 = vector.shape_cast %67 : vector<1x8x256xf32> to vector<8x256xf32>
    %cst_21 = arith.constant dense<0.000000e+00> : vector<8x256xf32>
    %69 = tpu.matmul %60, %11, %cst_21 {dimension_numbers = #tpu.dot_dimension_numbers<[1], [0], [0], [1], [0, 0, 1, 1], [], []>} : vector<8x256xf32>, vector<256x256xf32>, vector<8x256xf32> -> vector<8x256xf32>
    %70 = arith.addf %68, %69 : vector<8x256xf32>
    %71 = math.tanh %70 : vector<8x256xf32>
    %cst_22 = arith.constant dense<0.000000e+00> : vector<8x256xf32>
    %72 = tpu.matmul %71, %25, %cst_22 {dimension_numbers = #tpu.dot_dimension_numbers<[1], [0], [0], [1], [0, 0, 1, 1], [], []>} : vector<8x256xf32>, vector<256x256xf32>, vector<8x256xf32> -> vector<8x256xf32>
    %73 = arith.addf %72, %66 : vector<8x256xf32>
    %74 = vector.broadcast %10 : vector<1x256xf32> to vector<8x256xf32>
    %75 = arith.addf %73, %74 : vector<8x256xf32>
    %76 = math.tanh %75 : vector<8x256xf32>
    %cst_23 = arith.constant dense<0.000000e+00> : vector<8x256xf32>
    %77 = tpu.matmul %76, %32, %cst_23 {dimension_numbers = #tpu.dot_dimension_numbers<[1], [0], [0], [1], [0, 0, 1, 1], [], []>} : vector<8x256xf32>, vector<256x256xf32>, vector<8x256xf32> -> vector<8x256xf32>
    %78 = vector.extract_strided_slice %19 {offsets = [5, 0, 0], sizes = [1, 8, 256], strides = [1, 1, 1]} : vector<8x8x256xf32> to vector<1x8x256xf32>
    %79 = vector.shape_cast %78 : vector<1x8x256xf32> to vector<8x256xf32>
    %cst_24 = arith.constant dense<0.000000e+00> : vector<8x256xf32>
    %80 = tpu.matmul %71, %11, %cst_24 {dimension_numbers = #tpu.dot_dimension_numbers<[1], [0], [0], [1], [0, 0, 1, 1], [], []>} : vector<8x256xf32>, vector<256x256xf32>, vector<8x256xf32> -> vector<8x256xf32>
    %81 = arith.addf %79, %80 : vector<8x256xf32>
    %82 = math.tanh %81 : vector<8x256xf32>
    %cst_25 = arith.constant dense<0.000000e+00> : vector<8x256xf32>
    %83 = tpu.matmul %82, %25, %cst_25 {dimension_numbers = #tpu.dot_dimension_numbers<[1], [0], [0], [1], [0, 0, 1, 1], [], []>} : vector<8x256xf32>, vector<256x256xf32>, vector<8x256xf32> -> vector<8x256xf32>
    %84 = arith.addf %83, %77 : vector<8x256xf32>
    %85 = vector.broadcast %10 : vector<1x256xf32> to vector<8x256xf32>
    %86 = arith.addf %84, %85 : vector<8x256xf32>
    %87 = math.tanh %86 : vector<8x256xf32>
    %cst_26 = arith.constant dense<0.000000e+00> : vector<8x256xf32>
    %88 = tpu.matmul %87, %32, %cst_26 {dimension_numbers = #tpu.dot_dimension_numbers<[1], [0], [0], [1], [0, 0, 1, 1], [], []>} : vector<8x256xf32>, vector<256x256xf32>, vector<8x256xf32> -> vector<8x256xf32>
    %89 = vector.extract_strided_slice %19 {offsets = [6, 0, 0], sizes = [1, 8, 256], strides = [1, 1, 1]} : vector<8x8x256xf32> to vector<1x8x256xf32>
    %90 = vector.shape_cast %89 : vector<1x8x256xf32> to vector<8x256xf32>
    %cst_27 = arith.constant dense<0.000000e+00> : vector<8x256xf32>
    %91 = tpu.matmul %82, %11, %cst_27 {dimension_numbers = #tpu.dot_dimension_numbers<[1], [0], [0], [1], [0, 0, 1, 1], [], []>} : vector<8x256xf32>, vector<256x256xf32>, vector<8x256xf32> -> vector<8x256xf32>
    %92 = arith.addf %90, %91 : vector<8x256xf32>
    %93 = math.tanh %92 : vector<8x256xf32>
    %cst_28 = arith.constant dense<0.000000e+00> : vector<8x256xf32>
    %94 = tpu.matmul %93, %25, %cst_28 {dimension_numbers = #tpu.dot_dimension_numbers<[1], [0], [0], [1], [0, 0, 1, 1], [], []>} : vector<8x256xf32>, vector<256x256xf32>, vector<8x256xf32> -> vector<8x256xf32>
    %95 = arith.addf %94, %88 : vector<8x256xf32>
    %96 = vector.broadcast %10 : vector<1x256xf32> to vector<8x256xf32>
    %97 = arith.addf %95, %96 : vector<8x256xf32>
    %98 = math.tanh %97 : vector<8x256xf32>
    %cst_29 = arith.constant dense<0.000000e+00> : vector<8x256xf32>
    %99 = tpu.matmul %98, %32, %cst_29 {dimension_numbers = #tpu.dot_dimension_numbers<[1], [0], [0], [1], [0, 0, 1, 1], [], []>} : vector<8x256xf32>, vector<256x256xf32>, vector<8x256xf32> -> vector<8x256xf32>
    %100 = vector.extract_strided_slice %19 {offsets = [7, 0, 0], sizes = [1, 8, 256], strides = [1, 1, 1]} : vector<8x8x256xf32> to vector<1x8x256xf32>
    %101 = vector.shape_cast %100 : vector<1x8x256xf32> to vector<8x256xf32>
    %cst_30 = arith.constant dense<0.000000e+00> : vector<8x256xf32>
    %102 = tpu.matmul %93, %11, %cst_30 {dimension_numbers = #tpu.dot_dimension_numbers<[1], [0], [0], [1], [0, 0, 1, 1], [], []>} : vector<8x256xf32>, vector<256x256xf32>, vector<8x256xf32> -> vector<8x256xf32>
    %103 = arith.addf %101, %102 : vector<8x256xf32>
    %104 = math.tanh %103 : vector<8x256xf32>
    %cst_31 = arith.constant dense<0.000000e+00> : vector<8x256xf32>
    %105 = tpu.matmul %104, %25, %cst_31 {dimension_numbers = #tpu.dot_dimension_numbers<[1], [0], [0], [1], [0, 0, 1, 1], [], []>} : vector<8x256xf32>, vector<256x256xf32>, vector<8x256xf32> -> vector<8x256xf32>
    %106 = arith.addf %105, %99 : vector<8x256xf32>
    %107 = vector.broadcast %10 : vector<1x256xf32> to vector<8x256xf32>
    %108 = arith.addf %106, %107 : vector<8x256xf32>
    %109 = math.tanh %108 : vector<8x256xf32>
    %cst_32 = arith.constant 0.000000e+00 : f32
    %110 = vector.broadcast %cst_32 : f32 to vector<8x256xf32>
    %111 = arith.maximumf %109, %110 : vector<8x256xf32>
    %c2_i32_33 = arith.constant 2 : i32
    %112 = tpu.memref_slice %arg11[%c2_i32_33] : memref<3x!tpu.dma_semaphore, #tpu.memory_space<semaphore_mem>> -> memref<1x!tpu.dma_semaphore, #tpu.memory_space<semaphore_mem>>
    %113 = tpu.memref_squeeze %112 : memref<1x!tpu.dma_semaphore, #tpu.memory_space<semaphore_mem>> -> memref<!tpu.dma_semaphore, #tpu.memory_space<semaphore_mem>>
    tpu.wait_dma2 semaphore(%113 : memref<!tpu.dma_semaphore, #tpu.memory_space<semaphore_mem>>) src(%arg6 : memref<256x128xf32, #tpu.memory_space<any>>) dst(%arg10 : memref<256x128xf32, #tpu.memory_space<vmem>>)
    %c0_34 = arith.constant 0 : index
    %c0_35 = arith.constant 0 : index
    %114 = vector.load %arg10[%c0_34, %c0_35] : memref<256x128xf32, #tpu.memory_space<vmem>>, vector<256x128xf32>
    %cst_36 = arith.constant dense<0.000000e+00> : vector<8x128xf32>
    %115 = tpu.matmul %111, %114, %cst_36 {dimension_numbers = #tpu.dot_dimension_numbers<[1], [0], [0], [1], [0, 0, 1, 1], [], []>} : vector<8x256xf32>, vector<256x128xf32>, vector<8x128xf32> -> vector<8x128xf32>
    %c0_37 = arith.constant 0 : index
    %c0_38 = arith.constant 0 : index
    %116 = vector.load %arg3[%c0_37, %c0_38] : memref<1x128xf32, #tpu.memory_space<vmem>>, vector<1x128xf32>
    %117 = vector.broadcast %116 : vector<1x128xf32> to vector<8x128xf32>
    %118 = arith.addf %115, %117 : vector<8x128xf32>
    %c0_39 = arith.constant 0 : index
    %c0_40 = arith.constant 0 : index
    %119 = vector.load %arg7[%c0_39, %c0_40] : memref<8x128xf32, #tpu.memory_space<vmem>>, vector<8x128xf32>
    tpu.vector_store %arg7[%c0_39, %c0_40], %118 {strides = array<i32>} : memref<8x128xf32, #tpu.memory_space<vmem>>, vector<8x128xf32>,
    return
  }
}

</mosaic_0001>

<bundles_post_ra>
// kernel: tpu_custom_call.1
= control target key start
LH: loop header
LB: loop body
LE: loop exit
PB: predicated region body
PF: predicated region fallthrough
CT: control target
= control target key end

     0   :  { %12 = vsyncpa [#allocation7], 0  ;;  %s4692_s0 = inlined_call_operand.hbm [shape: f32[8,8], index: 0, kind: input, shape index: {}]   ;;  %s4693_s1 = inlined_call_operand.hbm [shape: f32[3,256], index: 1, kind: input, shape index: {}]   ;;  %s4694_s2 = inlined_call_operand.hbm [shape: f32[256,256], index: 2, kind: input, shape index: {}]   ;;  %s4695_s3 = inlined_call_operand.vmem [shape: f32[1,128], index: 3, kind: input, shape index: {}]   ;;  %s4696_s4 = inlined_call_operand.hbm [shape: f32[256,256], index: 4, kind: input, shape index: {}]   ;;  %s4697_s5 = inlined_call_operand.hbm [shape: f32[256,256], index: 5, kind: input, shape index: {}]   ;;  %s4698_s6 = inlined_call_operand.hbm [shape: f32[256,128], index: 6, kind: input, shape index: {}]   ;;  %s4699_s7 = inlined_call_operand.hbm [shape: f32[8,128], index: 7, kind: output, shape index: {}]  }
   0x1   :  { %13 = vsyncpa [#allocation10], 0 }
   0x2   :  { %14 = vsyncpa [#allocation8], 0  ;;  %s2588_s24 = smov [#allocation9]   ;;  %s2589_s26 = smov [#allocation6]  }
   0x3   :  { %s31_s25 = sshll.u32 %s2588_s24, 4  ;;  %s21_s27 = sshll.u32 %s2589_s26, 4  ;;  %s32_s25 = int_to_ptr.vmem [resolvable:$true] %s31_s25  ;;  %s22_s27 = int_to_ptr.vmem [resolvable:$true] %s21_s27 }
   0x4   :  { %s2444_s28 = scalar_lea.vmem %s32_s25, 128  ;;  %p2449_p1 = scmp.lt.s32.totalorder %s32_s25, %s32_s25 }
   0x5   :  { %p2445_p0 = scmp.ne.s32.totalorder %s32_s25, %s2444_s28  ;;  %p2450_p2 = scmp.lt.s32.totalorder %s2444_s28, %s2444_s28 }
   0x7   :  { %p2451_p3 = por %p2450_p2, %p2449_p1 }
   0x9   :  { %p2452_p4 = pnand %p2451_p3, %p2445_p0 }
   0xb   :  { %2455 = shalt.err (!%p2452_p4)
}
   0xc   :  { %34 = dma.hbm_to_vmem [thread:$0]  %s4693_s1, 128, %s32_s25, [#allocation10]  }
   0xd   :  { %s2464_s8 = scalar_lea.vmem %s22_s27, 128  ;;  %p2469_p6 = scmp.lt.s32.totalorder %s22_s27, %s22_s27 }
   0xe   :  { %p2465_p5 = scmp.ne.s32.totalorder %s22_s27, %s2464_s8  ;;  %p2470_p7 = scmp.lt.s32.totalorder %s2464_s8, %s2464_s8 }
  0x10   :  { %p2471_p8 = por %p2470_p7, %p2469_p6 }
  0x12   :  { %p2472_p9 = pnand %p2471_p8, %p2465_p5 }
  0x14   :  { %2475 = shalt.err (!%p2472_p9)
}
  0x15   :  { %24 = dma.hbm_to_vmem [thread:$0]  %s4692_s0, 128, %s22_s27, [#allocation7]  }
  0x16   :  { %s2590_s11 = smov [#allocation11]  }
  0x17   :  { %s40_s12 = sshll.u32 %s2590_s11, 4  ;;  %s41_s12 = int_to_ptr.vmem [resolvable:$true] %s40_s12 }
  0x18   :  { %s2484_s13 = scalar_lea.vmem %s41_s12, 8192  ;;  %p2489_p11 = scmp.lt.s32.totalorder %s41_s12, %s41_s12 }
  0x19   :  { %p2485_p10 = scmp.ne.s32.totalorder %s41_s12, %s2484_s13  ;;  %p2490_p12 = scmp.lt.s32.totalorder %s2484_s13, %s2484_s13 }
  0x1b   :  { %p2491_p13 = por %p2490_p12, %p2489_p11 }
  0x1d   :  { %p2492_p0 = pnand %p2491_p13, %p2485_p10 }
  0x1f   :  { %2495 = shalt.err (!%p2492_p0)
}
  0x20   :  { %s2591_s1 = smov 256   ;;  %s2592_s14 = smov 16  }
  0x21   :  { %46 = dma.hbm_to_vmem [thread:$0]  %s4694_s2, 8192, %s41_s12, [#allocation10], %s2591_s1, %s2591_s1, %s2592_s14  }
  0x22   :  { %2576 = dma.done.wait [#allocation7], 128  }
  0x23   :  { %2577 = vsyncadd [#allocation7], 4294967168 }
  0x24   :  { %2578 = dma.done.wait [#allocation10], 8320  }
  0x25   :  { %2579 = vsyncadd [#allocation10], 4294958976  ;;  %v2646_v0 = vld [vmem:[#allocation11] sm:$0xff]  ;;  %v2648_v1 = vld [vmem:[#allocation11 + $0x8] sm:$0xff]  ;;  %v159_v33 = vlaneseq  ;;  %s2593_s0 = smov [#allocation2]   ;;  %s2594_s17 = smov [#allocation3]  }
  0x26   :  { %5131 = vst [vmem:[#allocation27_spill] sm:$0xff] %v2646_v0  ;;  %5132 = vst [vmem:[#allocation28_spill] sm:$0xff] %v2648_v1  ;;  %v2650_v2 = vld [vmem:[#allocation11 + $0x10] sm:$0xff]  ;;  %v2652_v3 = vld [vmem:[#allocation11 + $0x18] sm:$0xff]  ;;  %s65_s2 = sshll.u32 %s2593_s0, 4  ;;  %s77_s18 = sshll.u32 %s2594_s17, 4  ;;  %s66_s2 = int_to_ptr.vmem [resolvable:$true] %s65_s2  ;;  %s78_s18 = int_to_ptr.vmem [resolvable:$true] %s77_s18 }
  0x27   :  { %5133 = vst [vmem:[#allocation29_spill] sm:$0xff] %v2650_v2  ;;  %5134 = vst [vmem:[#allocation30_spill] sm:$0xff] %v2652_v3  ;;  %v2654_v4 = vld [vmem:[#allocation11 + $0x20] sm:$0xff]  ;;  %v2656_v5 = vld [vmem:[#allocation11 + $0x28] sm:$0xff]  ;;  %v2736_v46 = vshrl.u32 %v159_v33, 7  ;;  %s2504_s19 = scalar_lea.vmem %s66_s2, 8192  ;;  %p2509_p2 = scmp.lt.s32.totalorder %s66_s2, %s66_s2 }
  0x28   :  { %5135 = vst [vmem:[#allocation31_spill] sm:$0xff] %v2654_v4  ;;  %5136 = vst [vmem:[#allocation32_spill] sm:$0xff] %v2656_v5  ;;  %v2658_v6 = vld [vmem:[#allocation11 + $0x30] sm:$0xff]  ;;  %v2660_v7 = vld [vmem:[#allocation11 + $0x38] sm:$0xff]  ;;  %p2505_p1 = scmp.ne.s32.totalorder %s66_s2, %s2504_s19  ;;  %p2510_p3 = scmp.lt.s32.totalorder %s2504_s19, %s2504_s19 }
  0x29   :  { %5137 = vst [vmem:[#allocation33_spill] sm:$0xff] %v2658_v6  ;;  %5138 = vst [vmem:[#allocation34_spill] sm:$0xff] %v2660_v7  ;;  %v2662_v8 = vld [vmem:[#allocation11 + $0x40] sm:$0xff]  ;;  %v2664_v9 = vld [vmem:[#allocation11 + $0x48] sm:$0xff]  ;;  %v2763_v59 = vsub.s32 2, %v2736_v46  ;;  %v2766_v60 = vsub.s32 0, %v2736_v46 }
  0x2a   :  { %5139 = vst [vmem:[#allocation35_spill] sm:$0xff] %v2662_v8  ;;  %5140 = vst [vmem:[#allocation36_spill] sm:$0xff] %v2664_v9  ;;  %v2666_v10 = vld [vmem:[#allocation11 + $0x50] sm:$0xff]  ;;  %v2668_v11 = vld [vmem:[#allocation11 + $0x58] sm:$0xff]  ;;  %p2511_p4 = por %p2510_p3, %p2509_p2 }
  0x2b   :  { %5141 = vst [vmem:[#allocation37_spill] sm:$0xff] %v2666_v10  ;;  %5142 = vst [vmem:[#allocation38_spill] sm:$0xff] %v2668_v11  ;;  %v2670_v12 = vld [vmem:[#allocation11 + $0x60] sm:$0xff]  ;;  %v2672_v13 = vld [vmem:[#allocation11 + $0x68] sm:$0xff] }
  0x2c   :  { %5143 = vst [vmem:[#allocation39_spill] sm:$0xff] %v2670_v12  ;;  %5144 = vst [vmem:[#allocation40_spill] sm:$0xff] %v2672_v13  ;;  %v2674_v14 = vld [vmem:[#allocation11 + $0x70] sm:$0xff]  ;;  %v2676_v15 = vld [vmem:[#allocation11 + $0x78] sm:$0xff]  ;;  %p2512_p5 = pnand %p2511_p4, %p2505_p1 }
  0x2d   :  { %5145 = vst [vmem:[#allocation41_spill] sm:$0xff] %v2674_v14  ;;  %5146 = vst [vmem:[#allocation42_spill] sm:$0xff] %v2676_v15  ;;  %v2678_v16 = vld [vmem:[#allocation11 + $0x80] sm:$0xff]  ;;  %v2680_v17 = vld [vmem:[#allocation11 + $0x88] sm:$0xff] }
  0x2e   :  { %5147 = vst [vmem:[#allocation43_spill] sm:$0xff] %v2678_v16  ;;  %5148 = vst [vmem:[#allocation44_spill] sm:$0xff] %v2680_v17  ;;  %v2682_v18 = vld [vmem:[#allocation11 + $0x90] sm:$0xff]  ;;  %v2684_v19 = vld [vmem:[#allocation11 + $0x98] sm:$0xff] }
  0x2f   :  { %5149 = vst [vmem:[#allocation45_spill] sm:$0xff] %v2682_v18  ;;  %5150 = vst [vmem:[#allocation46_spill] sm:$0xff] %v2684_v19  ;;  %v2686_v20 = vld [vmem:[#allocation11 + $0xa0] sm:$0xff]  ;;  %v2688_v21 = vld [vmem:[#allocation11 + $0xa8] sm:$0xff] }
  0x30   :  { %5151 = vst [vmem:[#allocation47_spill] sm:$0xff] %v2686_v20  ;;  %5152 = vst [vmem:[#allocation48_spill] sm:$0xff] %v2688_v21  ;;  %v2690_v22 = vld [vmem:[#allocation11 + $0xb0] sm:$0xff]  ;;  %v2692_v23 = vld [vmem:[#allocation11 + $0xb8] sm:$0xff] }
  0x31   :  { %5153 = vst [vmem:[#allocation49_spill] sm:$0xff] %v2690_v22  ;;  %5154 = vst [vmem:[#allocation50_spill] sm:$0xff] %v2692_v23  ;;  %v2694_v24 = vld [vmem:[#allocation11 + $0xc0] sm:$0xff]  ;;  %v2696_v25 = vld [vmem:[#allocation11 + $0xc8] sm:$0xff] }
  0x32   :  { %5155 = vst [vmem:[#allocation51_spill] sm:$0xff] %v2694_v24  ;;  %5156 = vst [vmem:[#allocation52_spill] sm:$0xff] %v2696_v25  ;;  %v2698_v26 = vld [vmem:[#allocation11 + $0xd0] sm:$0xff]  ;;  %v2700_v27 = vld [vmem:[#allocation11 + $0xd8] sm:$0xff] }
  0x33   :  { %5157 = vst [vmem:[#allocation53_spill] sm:$0xff] %v2698_v26  ;;  %5158 = vst [vmem:[#allocation54_spill] sm:$0xff] %v2700_v27  ;;  %v2702_v28 = vld [vmem:[#allocation11 + $0xe0] sm:$0xff]  ;;  %v2704_v29 = vld [vmem:[#allocation11 + $0xe8] sm:$0xff] }
  0x34   :  { %5159 = vst [vmem:[#allocation55_spill] sm:$0xff] %v2702_v28  ;;  %5160 = vst [vmem:[#allocation56_spill] sm:$0xff] %v2704_v29  ;;  %v2706_v30 = vld [vmem:[#allocation11 + $0xf0] sm:$0xff]  ;;  %v2708_v31 = vld [vmem:[#allocation11 + $0xf8] sm:$0xff] }
  0x35   :  { %5161 = vst [vmem:[#allocation57_spill] sm:$0xff] %v2706_v30  ;;  %5162 = vst [vmem:[#allocation58_spill] sm:$0xff] %v2708_v31  ;;  %v2710_v32 = vld [vmem:[#allocation11 + $0x100] sm:$0xff]  ;;  %v2712_v34 = vld [vmem:[#allocation11 + $0x108] sm:$0xff] }
  0x36   :  { %5163 = vst [vmem:[#allocation59_spill] sm:$0xff] %v2710_v32  ;;  %5164 = vst [vmem:[#allocation60_spill] sm:$0xff] %v2712_v34  ;;  %v2714_v35 = vld [vmem:[#allocation11 + $0x110] sm:$0xff]  ;;  %v2716_v36 = vld [vmem:[#allocation11 + $0x118] sm:$0xff] }
  0x37   :  { %5165 = vst [vmem:[#allocation61_spill] sm:$0xff] %v2714_v35  ;;  %5166 = vst [vmem:[#allocation62_spill] sm:$0xff] %v2716_v36  ;;  %v2718_v37 = vld [vmem:[#allocation11 + $0x120] sm:$0xff]  ;;  %v2720_v38 = vld [vmem:[#allocation11 + $0x128] sm:$0xff]  ;;  %v182_v35 = vsub.s32 3, %v2736_v46  ;;  %v2782_v36 = vsub.s32 1, %v2736_v46 }
  0x38   :  { %5167 = vst [vmem:[#allocation63_spill] sm:$0xff] %v2718_v37  ;;  %5168 = vst [vmem:[#allocation64_spill] sm:$0xff] %v2720_v38  ;;  %v2722_v39 = vld [vmem:[#allocation11 + $0x130] sm:$0xff]  ;;  %v2724_v40 = vld [vmem:[#allocation11 + $0x138] sm:$0xff] }
  0x39   :  { %5169 = vst [vmem:[#allocation65_spill] sm:$0xff] %v2722_v39  ;;  %5170 = vst [vmem:[#allocation66_spill] sm:$0xff] %v2724_v40  ;;  %v2726_v41 = vld [vmem:[#allocation11 + $0x140] sm:$0xff]  ;;  %v2728_v42 = vld [vmem:[#allocation11 + $0x148] sm:$0xff]  ;;  %v196_v40 = vsub.s32 5, %v2736_v46 }
  0x3a   :  { %5171 = vst [vmem:[#allocation67_spill] sm:$0xff] %v2726_v41  ;;  %5172 = vst [vmem:[#allocation68_spill] sm:$0xff] %v2728_v42  ;;  %v2730_v43 = vld [vmem:[#allocation11 + $0x150] sm:$0xff]  ;;  %v2732_v44 = vld [vmem:[#allocation11 + $0x158] sm:$0xff] }
  0x3b   :  { %5173 = vst [vmem:[#allocation69_spill] sm:$0xff] %v2730_v43  ;;  %5174 = vst [vmem:[#allocation70_spill] sm:$0xff] %v2732_v44  ;;  %v2734_v45 = vld [vmem:[#allocation11 + $0x160] sm:$0xff]  ;;  %v2738_v47 = vld [vmem:[#allocation11 + $0x168] sm:$0xff]  ;;  %v189_v43 = vsub.s32 4, %v2736_v46 }
  0x3c   :  { %5175 = vst [vmem:[#allocation71_spill] sm:$0xff] %v2734_v45  ;;  %5176 = vst [vmem:[#allocation72_spill] sm:$0xff] %v2738_v47  ;;  %v2740_v48 = vld [vmem:[#allocation11 + $0x170] sm:$0xff]  ;;  %v2742_v49 = vld [vmem:[#allocation11 + $0x178] sm:$0xff] }
  0x3d   :  { %5177 = vst [vmem:[#allocation73_spill] sm:$0xff] %v2740_v48  ;;  %5178 = vst [vmem:[#allocation74_spill] sm:$0xff] %v2742_v49  ;;  %v2744_v50 = vld [vmem:[#allocation11 + $0x180] sm:$0xff]  ;;  %v2746_v51 = vld [vmem:[#allocation11 + $0x188] sm:$0xff] }
  0x3e   :  { %5179 = vst [vmem:[#allocation75_spill] sm:$0xff] %v2744_v50  ;;  %5180 = vst [vmem:[#allocation76_spill] sm:$0xff] %v2746_v51  ;;  %v2748_v52 = vld [vmem:[#allocation11 + $0x190] sm:$0xff]  ;;  %v2750_v53 = vld [vmem:[#allocation11 + $0x198] sm:$0xff] }
  0x3f   :  { %5181 = vst [vmem:[#allocation77_spill] sm:$0xff] %v2748_v52  ;;  %5182 = vst [vmem:[#allocation78_spill] sm:$0xff] %v2750_v53  ;;  %v2752_v54 = vld [vmem:[#allocation11 + $0x1a0] sm:$0xff]  ;;  %v2754_v55 = vld [vmem:[#allocation11 + $0x1a8] sm:$0xff] }
  0x40   :  { %5183 = vst [vmem:[#allocation79_spill] sm:$0xff] %v2752_v54  ;;  %5184 = vst [vmem:[#allocation80_spill] sm:$0xff] %v2754_v55  ;;  %v2756_v56 = vld [vmem:[#allocation11 + $0x1b0] sm:$0xff]  ;;  %v2758_v57 = vld [vmem:[#allocation11 + $0x1b8] sm:$0xff] }
  0x41   :  { %5185 = vst [vmem:[#allocation81_spill] sm:$0xff] %v2756_v56  ;;  %5186 = vst [vmem:[#allocation82_spill] sm:$0xff] %v2758_v57  ;;  %v2760_v58 = vld [vmem:[#allocation11 + $0x1c0] sm:$0xff]  ;;  %v2768_v61 = vld [vmem:[#allocation11 + $0x1c8] sm:$0xff] }
  0x42   :  { %5187 = vst [vmem:[#allocation83_spill] sm:$0xff] %v2760_v58  ;;  %5188 = vst [vmem:[#allocation84_spill] sm:$0xff] %v2768_v61  ;;  %v2770_v62 = vld [vmem:[#allocation11 + $0x1d0] sm:$0xff]  ;;  %v2772_v63 = vld [vmem:[#allocation11 + $0x1d8] sm:$0xff] }
  0x43   :  { %5189 = vst [vmem:[#allocation85_spill] sm:$0xff] %v2770_v62  ;;  %5190 = vst [vmem:[#allocation86_spill] sm:$0xff] %v2772_v63  ;;  %v2774_v33 = vld [vmem:[#allocation11 + $0x1e0] sm:$0xff]  ;;  %v2776_v32 = vld [vmem:[#allocation11 + $0x1e8] sm:$0xff] }
  0x44   :  { %5191 = vst [vmem:[#allocation87_spill] sm:$0xff] %v2774_v33  ;;  %5192 = vst [vmem:[#allocation88_spill] sm:$0xff] %v2776_v32  ;;  %v2778_v34 = vld [vmem:[#allocation11 + $0x1f0] sm:$0xff]  ;;  %v2784_v37 = vld [vmem:[#allocation11 + $0x1f8] sm:$0xff] }
  0x45   :  { %5193 = vst [vmem:[#allocation89_spill] sm:$0xff] %v2778_v34  ;;  %5194 = vst [vmem:[#allocation90_spill] sm:$0xff] %v2784_v37  ;;  %v93_v38 = vld [vmem:[#allocation6] sm:$0xff]  ;;  %v2786_v39 = vld [vmem:[#allocation9] sm:$0x77] }
  0x46   :  { %v176_v41 = vrot.slane %v93_v38, %v2763_v59  ;;  %v162_v42 = vrot.slane %v93_v38, %v2766_v60  ;;  %v257_v44 = vrot.slane %v2786_v39, %v196_v40  ;;  %v183_v45 = vrot.slane %v93_v38, %v182_v35 }
  0x47   :  { %v169_v47 = vrot.slane %v93_v38, %v2782_v36  ;;  %v223_v48 = vrot.slane %v2786_v39, %v189_v43 }
  0x48   :  { %178 = vbcast.lane.b32.xlu1 %v176_v41, 256  ;;  %164 = vbcast.lane.b32.xlu0 %v162_v42, 256 }
  0x49   :  { %2515 = shalt.err (!%p2512_p5)  }
  0x4a   :  { %68 = dma.hbm_to_vmem [thread:$0]  %s4696_s4, 8192, %s66_s2, [#allocation5]  ;;  %v2799_v49 = vrot.slane %v257_v44, %v2782_v36  ;;  %v2802_v35 = vrot.slane %v223_v48, %v2766_v60 }
  0x4b   :  { %s2524_s22 = scalar_lea.vmem %s78_s18, 8192  ;;  %p2529_p7 = scmp.lt.s32.totalorder %s78_s18, %s78_s18 }
  0x4c   :  { %p2525_p6 = scmp.ne.s32.totalorder %s78_s18, %s2524_s22  ;;  %p2530_p8 = scmp.lt.s32.totalorder %s2524_s22, %s2524_s22 }
  0x4e   :  { %p2531_p9 = por %p2530_p8, %p2529_p7 }
  0x50   :  { %p2532_p10 = pnand %p2531_p9, %p2525_p6 }
  0x52   :  { %2535 = shalt.err (!%p2532_p10)  }
  0x53   :  { %80 = dma.hbm_to_vmem [thread:$0]  %s4697_s5, 8192, %s78_s18, [#allocation5 + $0x1]  ;;  %185 = vbcast.lane.b32.xlu1 %v183_v45, 256  ;;  %171 = vbcast.lane.b32.xlu0 %v169_v47, 256  ;;  %v197_v41 = vrot.slane %v93_v38, %v196_v40  ;;  %v190_v42 = vrot.slane %v93_v38, %v189_v43  ;;  %v210_v44 = vsub.s32 7, %v2736_v46  ;;  %v4720_v48 = vsub.s32 6, %v2736_v46 }
  0x54   :  { %s2595_s25 = smov [#allocation4]  }
  0x55   :  { %s89_s4 = sshll.u32 %s2595_s25, 4  ;;  %s90_s4 = int_to_ptr.vmem [resolvable:$true] %s89_s4 }
  0x56   :  { %s2544_s26 = scalar_lea.vmem %s90_s4, 4096  ;;  %p2549_p12 = scmp.lt.s32.totalorder %s90_s4, %s90_s4 }
  0x57   :  { %p2545_p11 = scmp.ne.s32.totalorder %s90_s4, %s2544_s26  ;;  %p2550_p13 = scmp.lt.s32.totalorder %s2544_s26, %s2544_s26 }
  0x59   :  { %p2551_p0 = por %p2550_p13, %p2549_p12 }
  0x5b   :  { %p2552_p1 = pnand %p2551_p0, %p2545_p11 }
  0x5d   :  { %2555 = shalt.err (!%p2552_p1)  }
  0x5e   :  { %92 = dma.hbm_to_vmem [thread:$0]  %s4698_s6, 4096, %s90_s4, [#allocation5 + $0x2]  ;;  %199 = vbcast.lane.b32.xlu1 %v197_v41, 256  ;;  %192 = vbcast.lane.b32.xlu0 %v190_v42, 256  ;;  %v211_v40 = vrot.slane %v93_v38, %v210_v44  ;;  %v204_v43 = vrot.slane %v93_v38, %v4720_v48  ;;  %v219_v45 = vrot.slane %v2786_v39, %v2766_v60 }
  0x5f   :  { %v253_v47 = vrot.slane %v2786_v39, %v2782_v36 }
  0x60   :  { %v229_v50 = vrot.slane %v219_v45, %v2766_v60 }
  0x61   :  { %v263_v51 = vrot.slane %v253_v47, %v2782_v36 }
  0x62   :  { %213 = vbcast.lane.b32.xlu1 %v211_v40, 256  ;;  %206 = vbcast.lane.b32.xlu0 %v204_v43, 256 }
  0xba   :  { %v179_v52 = vpop.permute.xlu1 %178  ;;  %v165_v53 = vpop.permute.xlu0 %164 }
  0xbb   :  { %v238_v41 = vmul.f32 %v229_v50, %v179_v52  ;;  %v239_v42 = vmul.f32 %v2802_v35, %v179_v52  ;;  %v234_v44 = vmul.f32 %v229_v50, %v165_v53  ;;  %v235_v38 = vmul.f32 %v2802_v35, %v165_v53 }
  0xbd   :  { %v2822_v40 = vadd.f32 %v263_v51, %v238_v41  ;;  %v2825_v43 = vadd.f32 %v2799_v49, %v239_v42  ;;  %v268_v48 = vadd.f32 %v263_v51, %v234_v44  ;;  %v269_v54 = vadd.f32 %v2799_v49, %v235_v38 }
  0xbf   :  { %5195 = vst [vmem:[#allocation91_spill] sm:$0xff] %v2822_v40  ;;  %5196 = vst [vmem:[#allocation92_spill] sm:$0xff] %v2825_v43  ;;  %2257 = vtanh.f32 %v268_v48 }
  0xc0   :  { %2259 = vtanh.f32 %v269_v54 }
  0xc5   :  { %v186_v55 = vpop.permute.xlu1 %185  ;;  %v172_v60 = vpop.permute.xlu0 %171 }
  0xc6   :  { %v240_v36 = vmul.f32 %v229_v50, %v186_v55  ;;  %v241_v45 = vmul.f32 %v2802_v35, %v186_v55  ;;  %v236_v47 = vmul.f32 %v229_v50, %v172_v60  ;;  %v237_v52 = vmul.f32 %v2802_v35, %v172_v60 }
  0xc8   :  { %v2830_v56 = vadd.f32 %v263_v51, %v240_v36  ;;  %v2833_v53 = vadd.f32 %v2799_v49, %v241_v45  ;;  %v2835_v41 = vadd.f32 %v263_v51, %v236_v47  ;;  %v2838_v42 = vadd.f32 %v2799_v49, %v237_v52 }
  0xca   :  { %5197 = vst [vmem:[#allocation93_spill] sm:$0xff] %v2830_v56  ;;  %5198 = vst [vmem:[#allocation94_spill] sm:$0xff] %v2833_v53 }
  0xcb   :  { %5199 = vst [vmem:[#allocation95_spill] sm:$0xff] %v2835_v41  ;;  %5200 = vst [vmem:[#allocation96_spill] sm:$0xff] %v2838_v42 }
  0xd0   :  { %v200_v44 = vpop.permute.xlu1 %199  ;;  %v193_v38 = vpop.permute.xlu0 %192 }
  0xd1   :  { %v244_v48 = vmul.f32 %v229_v50, %v200_v44  ;;  %v245_v40 = vmul.f32 %v2802_v35, %v200_v44  ;;  %v242_v55 = vmul.f32 %v229_v50, %v193_v38  ;;  %v243_v54 = vmul.f32 %v2802_v35, %v193_v38 }
  0xd3   :  { %v2842_v43 = vadd.f32 %v263_v51, %v244_v48  ;;  %v2845_v60 = vadd.f32 %v2799_v49, %v245_v40  ;;  %v2847_v36 = vadd.f32 %v263_v51, %v242_v55  ;;  %v2850_v45 = vadd.f32 %v2799_v49, %v243_v54  ;;  %v2864_v55 = vpop.eup %2257 }
  0xd4   :  { %v214_v47 = vpop.permute.xlu1 %213  ;;  %v207_v52 = vpop.permute.xlu0 %206 }
  0xd5   :  { %5201 = vst [vmem:[#allocation97_spill] sm:$0xff] %v2842_v43  ;;  %5202 = vst [vmem:[#allocation98_spill] sm:$0xff] %v2845_v60  ;;  %v248_v56 = vmul.f32 %v229_v50, %v214_v47  ;;  %v249_v53 = vmul.f32 %v2802_v35, %v214_v47  ;;  %v246_v42 = vmul.f32 %v229_v50, %v207_v52  ;;  %v2866_v54 = vpop.eup %2259 }
  0xd6   :  { %5203 = vst [vmem:[#allocation99_spill] sm:$0xff] %v2847_v36  ;;  %5204 = vst [vmem:[#allocation100_spill] sm:$0xff] %v2850_v45  ;;  %v247_v44 = vmul.f32 %v2802_v35, %v207_v52 }
  0xd7   :  { %v2854_v41 = vadd.f32 %v263_v51, %v248_v56  ;;  %v2857_v38 = vadd.f32 %v2799_v49, %v249_v53  ;;  %v2859_v40 = vadd.f32 %v263_v51, %v246_v42 }
  0xd8   :  { %v2862_v48 = vadd.f32 %v2799_v49, %v247_v44 }
  0xd9   :  { %5205 = vst [vmem:[#allocation101_spill] sm:$0xff] %v2854_v41  ;;  %5206 = vst [vmem:[#allocation102_spill] sm:$0xff] %v2857_v38 }
  0xda   :  { %5207 = vst [vmem:[#allocation103_spill] sm:$0xff] %v2859_v40  ;;  %5208 = vst [vmem:[#allocation104_spill] sm:$0xff] %v2862_v48 }
  0xdb   :  { %2580 = dma.done.wait [#allocation5], 8192 }
  0xdc   :  { %2581 = vsyncadd [#allocation5], 4294959104  ;;  %436 = vmatprep.mubr.f32.mxu0 %v2866_v54  ;;  %v2869_v50 = vld [vmem:[#allocation2 + $0xf8] sm:$0xff]  ;;  %v2871_v56 = vld [vmem:[#allocation2 + $0xf0] sm:$0xff] }
  0xdd   :  { %5209 = vst [vmem:[#allocation105_spill] sm:$0xff] %v2869_v50  ;;  %5210 = vst [vmem:[#allocation106_spill] sm:$0xff] %v2871_v56  ;;  %v2873_v35 = vld [vmem:[#allocation2 + $0xe8] sm:$0xff]  ;;  %372 = vmatprep.subr.mxu0 %v2869_v50  ;;  %v2876_v51 = vld [vmem:[#allocation2 + $0xe0] sm:$0xff] }
  0xde   :  { %5211 = vst [vmem:[#allocation107_spill] sm:$0xff] %v2873_v35  ;;  %5212 = vst [vmem:[#allocation108_spill] sm:$0xff] %v2876_v51  ;;  %373 = vmatpush1.msra.mxu0 %v2871_v56  ;;  %v2879_v49 = vld [vmem:[#allocation2 + $0xd8] sm:$0xff]  ;;  %v2882_v53 = vld [vmem:[#allocation2 + $0xd0] sm:$0xff] }
  0xdf   :  { %5213 = vst [vmem:[#allocation109_spill] sm:$0xff] %v2879_v49  ;;  %374 = vmatprep.subr.mxu0 %v2873_v35  ;;  %5214 = vst [vmem:[#allocation110_spill] sm:$0xff] %v2882_v53  ;;  %v2885_v42 = vld [vmem:[#allocation2 + $0xc8] sm:$0xff]  ;;  %v2888_v47 = vld [vmem:[#allocation2 + $0xc0] sm:$0xff] }
  0xe0   :  { %375 = vmatpush1.msra.mxu0 %v2876_v51  ;;  %5215 = vst [vmem:[#allocation111_spill] sm:$0xff] %v2885_v42  ;;  %5216 = vst [vmem:[#allocation112_spill] sm:$0xff] %v2888_v47  ;;  %v2891_v52 = vld [vmem:[#allocation2 + $0xb8] sm:$0xff]  ;;  %v2894_v44 = vld [vmem:[#allocation2 + $0xb0] sm:$0xff] }
  0xe1   :  { %376 = vmatprep.subr.mxu0 %v2879_v49  ;;  %5217 = vst [vmem:[#allocation113_spill] sm:$0xff] %v2891_v52  ;;  %5218 = vst [vmem:[#allocation114_spill] sm:$0xff] %v2894_v44  ;;  %v2897_v41 = vld [vmem:[#allocation2 + $0xa8] sm:$0xff]  ;;  %v2900_v38 = vld [vmem:[#allocation2 + $0xa0] sm:$0xff] }
  0xe2   :  { %377 = vmatpush1.msra.mxu0 %v2882_v53  ;;  %5219 = vst [vmem:[#allocation115_spill] sm:$0xff] %v2897_v41  ;;  %5220 = vst [vmem:[#allocation116_spill] sm:$0xff] %v2900_v38  ;;  %v2903_v40 = vld [vmem:[#allocation2 + $0x98] sm:$0xff]  ;;  %v2906_v48 = vld [vmem:[#allocation2 + $0x90] sm:$0xff] }
  0xe3   :  { %378 = vmatprep.subr.mxu0 %v2885_v42  ;;  %5221 = vst [vmem:[#allocation117_spill] sm:$0xff] %v2903_v40  ;;  %5222 = vst [vmem:[#allocation118_spill] sm:$0xff] %v2906_v48  ;;  %v2909_v43 = vld [vmem:[#allocation2 + $0x88] sm:$0xff]  ;;  %v2912_v60 = vld [vmem:[#allocation2 + $0x80] sm:$0xff] }
  0xe4   :  { %379 = vmatpush1.msra.mxu0 %v2888_v47  ;;  %5223 = vst [vmem:[#allocation119_spill] sm:$0xff] %v2909_v43  ;;  %5224 = vst [vmem:[#allocation120_spill] sm:$0xff] %v2912_v60  ;;  %v2915_v36 = vld [vmem:[#allocation2 + $0x78] sm:$0xff]  ;;  %v2918_v45 = vld [vmem:[#allocation2 + $0x70] sm:$0xff] }
  0xe5   :  { %380 = vmatprep.subr.mxu0 %v2891_v52  ;;  %5225 = vst [vmem:[#allocation121_spill] sm:$0xff] %v2915_v36  ;;  %5226 = vst [vmem:[#allocation122_spill] sm:$0xff] %v2918_v45 }
  0xe6   :  { %381 = vmatpush1.msra.mxu0 %v2894_v44 }
  0xe7   :  { %382 = vmatprep.subr.mxu0 %v2897_v41  ;;  %v2921_v41 = vld [vmem:[#allocation2 + $0x68] sm:$0xff] }
  0xe8   :  { %383 = vmatpush1.msra.mxu0 %v2900_v38  ;;  %5227 = vst [vmem:[#allocation123_spill] sm:$0xff] %v2921_v41  ;;  %v2924_v38 = vld [vmem:[#allocation2 + $0x60] sm:$0xff] }
  0xe9   :  { %384 = vmatprep.subr.mxu0 %v2903_v40  ;;  %5228 = vst [vmem:[#allocation124_spill] sm:$0xff] %v2924_v38  ;;  %v2927_v40 = vld [vmem:[#allocation2 + $0x58] sm:$0xff] }
  0xea   :  { %385 = vmatpush1.msra.mxu0 %v2906_v48  ;;  %5229 = vst [vmem:[#allocation125_spill] sm:$0xff] %v2927_v40  ;;  %v2930_v48 = vld [vmem:[#allocation2 + $0x50] sm:$0xff] }
  0xeb   :  { %386 = vmatprep.subr.mxu0 %v2909_v43  ;;  %5230 = vst [vmem:[#allocation126_spill] sm:$0xff] %v2930_v48  ;;  %v2933_v43 = vld [vmem:[#allocation2 + $0x48] sm:$0xff] }
  0xec   :  { %387 = vmatpush1.msra.mxu0 %v2912_v60  ;;  %5231 = vst [vmem:[#allocation127_spill] sm:$0xff] %v2933_v43  ;;  %v2936_v60 = vld [vmem:[#allocation2 + $0x40] sm:$0xff] }
  0xed   :  { %388 = vmatprep.subr.mxu0 %v2915_v36  ;;  %5232 = vst [vmem:[#allocation128_spill] sm:$0xff] %v2936_v60  ;;  %v2939_v36 = vld [vmem:[#allocation2 + $0x38] sm:$0xff] }
  0xee   :  { %389 = vmatpush1.msra.mxu0 %v2918_v45  ;;  %5233 = vst [vmem:[#allocation129_spill] sm:$0xff] %v2939_v36  ;;  %v2942_v45 = vld [vmem:[#allocation2 + $0x30] sm:$0xff] }
  0xef   :  { %390 = vmatprep.subr.mxu0 %v2921_v41  ;;  %5234 = vst [vmem:[#allocation130_spill] sm:$0xff] %v2942_v45  ;;  %v2945_v41 = vld [vmem:[#allocation2 + $0x28] sm:$0xff] }
  0xf0   :  { %391 = vmatpush1.msra.mxu0 %v2924_v38  ;;  %5235 = vst [vmem:[#allocation131_spill] sm:$0xff] %v2945_v41  ;;  %v2948_v38 = vld [vmem:[#allocation2 + $0x20] sm:$0xff] }
  0xf1   :  { %392 = vmatprep.subr.mxu0 %v2927_v40  ;;  %5236 = vst [vmem:[#allocation132_spill] sm:$0xff] %v2948_v38  ;;  %v2951_v40 = vld [vmem:[#allocation2 + $0x18] sm:$0xff] }
  0xf2   :  { %393 = vmatpush1.msra.mxu0 %v2930_v48  ;;  %5237 = vst [vmem:[#allocation133_spill] sm:$0xff] %v2951_v40  ;;  %v2954_v48 = vld [vmem:[#allocation2 + $0x10] sm:$0xff] }
  0xf3   :  { %394 = vmatprep.subr.mxu0 %v2933_v43  ;;  %5238 = vst [vmem:[#allocation134_spill] sm:$0xff] %v2954_v48  ;;  %v2957_v43 = vld [vmem:[#allocation2 + $0x8] sm:$0xff] }
  0xf4   :  { %395 = vmatpush1.msra.mxu0 %v2936_v60  ;;  %5239 = vst [vmem:[#allocation135_spill] sm:$0xff] %v2957_v43  ;;  %v2960_v60 = vld [vmem:[#allocation2] sm:$0xff] }
  0xf5   :  { %396 = vmatprep.subr.mxu0 %v2939_v36  ;;  %5240 = vst [vmem:[#allocation136_spill] sm:$0xff] %v2960_v60  ;;  %v2963_v36 = vld [vmem:[#allocation2 + $0x1f8] sm:$0xff] }
  0xf6   :  { %397 = vmatpush1.msra.mxu0 %v2942_v45  ;;  %5241 = vst [vmem:[#allocation137_spill] sm:$0xff] %v2963_v36  ;;  %v2966_v45 = vld [vmem:[#allocation2 + $0x1f0] sm:$0xff] }
  0xf7   :  { %398 = vmatprep.subr.mxu0 %v2945_v41  ;;  %5242 = vst [vmem:[#allocation138_spill] sm:$0xff] %v2966_v45  ;;  %v2969_v41 = vld [vmem:[#allocation2 + $0x1e8] sm:$0xff] }
  0xf8   :  { %399 = vmatpush1.msra.mxu0 %v2948_v38  ;;  %5243 = vst [vmem:[#allocation139_spill] sm:$0xff] %v2969_v41  ;;  %v2972_v38 = vld [vmem:[#allocation2 + $0x1e0] sm:$0xff] }
  0xf9   :  { %400 = vmatprep.subr.mxu0 %v2951_v40  ;;  %5244 = vst [vmem:[#allocation140_spill] sm:$0xff] %v2972_v38  ;;  %v2975_v40 = vld [vmem:[#allocation2 + $0x1d8] sm:$0xff] }
  0xfa   :  { %401 = vmatpush1.msra.mxu0 %v2954_v48  ;;  %5245 = vst [vmem:[#allocation141_spill] sm:$0xff] %v2975_v40  ;;  %v2978_v48 = vld [vmem:[#allocation2 + $0x1d0] sm:$0xff] }
  0xfb   :  { %402 = vmatprep.subr.mxu0 %v2957_v43  ;;  %5246 = vst [vmem:[#allocation142_spill] sm:$0xff] %v2978_v48  ;;  %v2981_v43 = vld [vmem:[#allocation2 + $0x1c8] sm:$0xff] }
  0xfc   :  { %403 = vmatpush1.msra.mxu0 %v2960_v60  ;;  %5247 = vst [vmem:[#allocation143_spill] sm:$0xff] %v2981_v43  ;;  %v2984_v60 = vld [vmem:[#allocation2 + $0x1c0] sm:$0xff] }
  0xfd   :  { %404 = vmatprep.subr.mxu0 %v2963_v36  ;;  %5248 = vst [vmem:[#allocation144_spill] sm:$0xff] %v2984_v60  ;;  %v2987_v36 = vld [vmem:[#allocation2 + $0x1b8] sm:$0xff] }
  0xfe   :  { %405 = vmatpush2.msra.mxu0 %v2966_v45  ;;  %5249 = vst [vmem:[#allocation145_spill] sm:$0xff] %v2987_v36  ;;  %v2990_v45 = vld [vmem:[#allocation2 + $0x1b0] sm:$0xff] }
  0xff   :  { %406 = vmatprep.subr.mxu0 %v2969_v41  ;;  %5250 = vst [vmem:[#allocation146_spill] sm:$0xff] %v2990_v45  ;;  %v2993_v41 = vld [vmem:[#allocation2 + $0x1a8] sm:$0xff] }
 0x100   :  { %407 = vmatpush2.msra.mxu0 %v2972_v38  ;;  %5251 = vst [vmem:[#allocation147_spill] sm:$0xff] %v2993_v41  ;;  %v2996_v38 = vld [vmem:[#allocation2 + $0x1a0] sm:$0xff] }
 0x101   :  { %408 = vmatprep.subr.mxu0 %v2975_v40  ;;  %5252 = vst [vmem:[#allocation148_spill] sm:$0xff] %v2996_v38  ;;  %v2999_v40 = vld [vmem:[#allocation2 + $0x198] sm:$0xff] }
 0x102   :  { %409 = vmatpush2.msra.mxu0 %v2978_v48  ;;  %5253 = vst [vmem:[#allocation149_spill] sm:$0xff] %v2999_v40  ;;  %v3002_v48 = vld [vmem:[#allocation2 + $0x190] sm:$0xff] }
 0x103   :  { %410 = vmatprep.subr.mxu0 %v2981_v43  ;;  %5254 = vst [vmem:[#allocation150_spill] sm:$0xff] %v3002_v48  ;;  %v3005_v43 = vld [vmem:[#allocation2 + $0x188] sm:$0xff] }
 0x104   :  { %411 = vmatpush2.msra.mxu0 %v2984_v60  ;;  %5255 = vst [vmem:[#allocation151_spill] sm:$0xff] %v3005_v43  ;;  %v3008_v60 = vld [vmem:[#allocation2 + $0x180] sm:$0xff] }
 0x105   :  { %412 = vmatprep.subr.mxu0 %v2987_v36  ;;  %5256 = vst [vmem:[#allocation152_spill] sm:$0xff] %v3008_v60  ;;  %v3011_v36 = vld [vmem:[#allocation2 + $0x178] sm:$0xff] }
 0x106   :  { %413 = vmatpush2.msra.mxu0 %v2990_v45  ;;  %5257 = vst [vmem:[#allocation153_spill] sm:$0xff] %v3011_v36  ;;  %v3014_v45 = vld [vmem:[#allocation2 + $0x170] sm:$0xff] }
 0x107   :  { %414 = vmatprep.subr.mxu0 %v2993_v41  ;;  %5258 = vst [vmem:[#allocation154_spill] sm:$0xff] %v3014_v45  ;;  %v3017_v41 = vld [vmem:[#allocation2 + $0x168] sm:$0xff] }
 0x108   :  { %415 = vmatpush2.msra.mxu0 %v2996_v38  ;;  %5259 = vst [vmem:[#allocation155_spill] sm:$0xff] %v3017_v41  ;;  %v3020_v38 = vld [vmem:[#allocation2 + $0x160] sm:$0xff] }
 0x109   :  { %416 = vmatprep.subr.mxu0 %v2999_v40  ;;  %5260 = vst [vmem:[#allocation156_spill] sm:$0xff] %v3020_v38  ;;  %v3023_v40 = vld [vmem:[#allocation2 + $0x158] sm:$0xff] }
 0x10a   :  { %417 = vmatpush2.msra.mxu0 %v3002_v48  ;;  %5261 = vst [vmem:[#allocation157_spill] sm:$0xff] %v3023_v40  ;;  %v3026_v48 = vld [vmem:[#allocation2 + $0x150] sm:$0xff] }
 0x10b   :  { %418 = vmatprep.subr.mxu0 %v3005_v43  ;;  %5262 = vst [vmem:[#allocation158_spill] sm:$0xff] %v3026_v48  ;;  %v3029_v43 = vld [vmem:[#allocation2 + $0x148] sm:$0xff] }
 0x10c   :  { %419 = vmatpush2.msra.mxu0 %v3008_v60  ;;  %5263 = vst [vmem:[#allocation159_spill] sm:$0xff] %v3029_v43  ;;  %v3032_v60 = vld [vmem:[#allocation2 + $0x140] sm:$0xff] }
 0x10d   :  { %420 = vmatprep.subr.mxu0 %v3011_v36  ;;  %5264 = vst [vmem:[#allocation160_spill] sm:$0xff] %v3032_v60  ;;  %v3035_v36 = vld [vmem:[#allocation2 + $0x138] sm:$0xff] }
 0x10e   :  { %421 = vmatpush2.msra.mxu0 %v3014_v45  ;;  %5265 = vst [vmem:[#allocation161_spill] sm:$0xff] %v3035_v36  ;;  %v3038_v45 = vld [vmem:[#allocation2 + $0x130] sm:$0xff] }
 0x10f   :  { %422 = vmatprep.subr.mxu0 %v3017_v41  ;;  %5266 = vst [vmem:[#allocation162_spill] sm:$0xff] %v3038_v45  ;;  %v3041_v41 = vld [vmem:[#allocation2 + $0x128] sm:$0xff] }
 0x110   :  { %423 = vmatpush2.msra.mxu0 %v3020_v38  ;;  %5267 = vst [vmem:[#allocation163_spill] sm:$0xff] %v3041_v41  ;;  %v3044_v38 = vld [vmem:[#allocation2 + $0x120] sm:$0xff] }
 0x111   :  { %424 = vmatprep.subr.mxu0 %v3023_v40  ;;  %5268 = vst [vmem:[#allocation164_spill] sm:$0xff] %v3044_v38  ;;  %v3047_v40 = vld [vmem:[#allocation2 + $0x118] sm:$0xff] }
 0x112   :  { %425 = vmatpush2.msra.mxu0 %v3026_v48  ;;  %5269 = vst [vmem:[#allocation165_spill] sm:$0xff] %v3047_v40  ;;  %v3050_v48 = vld [vmem:[#allocation2 + $0x110] sm:$0xff] }
 0x113   :  { %426 = vmatprep.subr.mxu0 %v3029_v43  ;;  %5270 = vst [vmem:[#allocation166_spill] sm:$0xff] %v3050_v48  ;;  %v3053_v43 = vld [vmem:[#allocation2 + $0x108] sm:$0xff] }
 0x114   :  { %427 = vmatpush2.msra.mxu0 %v3032_v60  ;;  %5271 = vst [vmem:[#allocation167_spill] sm:$0xff] %v3053_v43  ;;  %v3056_v60 = vld [vmem:[#allocation2 + $0x100] sm:$0xff] }
 0x115   :  { %428 = vmatprep.subr.mxu0 %v3035_v36  ;;  %5272 = vst [vmem:[#allocation168_spill] sm:$0xff] %v3056_v60 }
 0x116   :  { %429 = vmatpush2.msra.mxu0 %v3038_v45  ;;  %v5273_v45 = vsub.s32 6, %v2736_v46 }
 0x117   :  { %430 = vmatprep.subr.mxu0 %v3041_v41  ;;  %v357_v41 = vrot.slane %v2786_v39, %v2763_v59 }
 0x118   :  { %431 = vmatpush2.msra.mxu0 %v3044_v38  ;;  %v361_v38 = vrot.slane %v2786_v39, %v5273_v45 }
 0x119   :  { %432 = vmatprep.subr.mxu0 %v3047_v40  ;;  %v3068_v36 = vrot.slane %v357_v41, %v2763_v59 }
 0x11a   :  { %433 = vmatpush2.msra.mxu0 %v3050_v48  ;;  %v3071_v40 = vrot.slane %v361_v38, %v2763_v59 }
 0x11b   :  { %434 = vmatprep.subr.mxu0 %v3053_v43  ;;  %5274 = vst [vmem:[#allocation169_spill] sm:$0xff] %v3068_v36 }
 0x11c   :  { %435 = vmatpush2.msra.mxu0 %v3056_v60  ;;  %5275 = vst [vmem:[#allocation170_spill] sm:$0xff] %v3071_v40 }
 0x11d   :  { %437 = vmatmul.mubr.f32.vlgmr.msra.gmra.mxu0 %v2864_v55  ;;  %582 = vmatprep.subr.mxu0 %v2708_v31 }
 0x11e   :  { %646 = vmatprep.mubr.f32.mxu0 %v2866_v54 }
 0x1dd   :  { %v438_v48 = vpop.f32.mrf.mxu0 }
 0x1de   :  { %v439_v43 = vadd.f32 %v438_v48, %v3068_v36 }
 0x1df   :  { %v440_v44 = vpop.f32.mrf.mxu0 }
 0x1e0   :  { %2261 = vtanh.f32 %v439_v43  ;;  %v441_v60 = vadd.f32 %v440_v44, %v3071_v40 }
 0x1e2   :  { %2263 = vtanh.f32 %v441_v60 }
 0x1ed   :  { %v3075_v52 = vpop.eup %2261 }
 0x1ef   :  { %v2264_v47 = vpop.eup %2263 }
 0x1f0   :  { %2582 = dma.done.wait [#allocation5 + $0x1], 8192 }
 0x1f1   :  { %2583 = vsyncadd [#allocation5 + $0x1], 4294959104  ;;  %583 = vmatpush1.msra.mxu0 %v2706_v30  ;;  %575 = vmatprep.mubr.f32.mxu1 %v2264_v47  ;;  %v3086_v39 = vld [vmem:[#allocation3 + $0xf8] sm:$0xff]  ;;  %v3088_v46 = vld [vmem:[#allocation3 + $0xf0] sm:$0xff] }
 0x1f2   :  { %584 = vmatprep.subr.mxu0 %v2704_v29  ;;  %v3090_v59 = vld [vmem:[#allocation3 + $0xe8] sm:$0xff]  ;;  %511 = vmatprep.subr.mxu1 %v3086_v39  ;;  %v3094_v43 = vld [vmem:[#allocation3 + $0xe0] sm:$0xff]  ;;  %v3098_v41 = vld [vmem:[#allocation3 + $0xd8] sm:$0xff] }
 0x1f3   :  { %585 = vmatpush1.msra.mxu0 %v2702_v28  ;;  %512 = vmatpush1.msra.mxu1 %v3088_v46  ;;  %v3102_v60 = vld [vmem:[#allocation3 + $0xd0] sm:$0xff]  ;;  %v3106_v45 = vld [vmem:[#allocation3 + $0xc8] sm:$0xff]  ;;  %v3110_v38 = vld [vmem:[#allocation3 + $0xc0] sm:$0xff] }
 0x1f4   :  { %586 = vmatprep.subr.mxu0 %v2700_v27  ;;  %513 = vmatprep.subr.mxu1 %v3090_v59  ;;  %v3114_v48 = vld [vmem:[#allocation3 + $0xb8] sm:$0xff]  ;;  %v3118_v54 = vld [vmem:[#allocation3 + $0xb0] sm:$0xff]  ;;  %v3122_v47 = vld [vmem:[#allocation3 + $0xa8] sm:$0xff] }
 0x1f5   :  { %587 = vmatpush1.msra.mxu0 %v2698_v26  ;;  %514 = vmatpush1.msra.mxu1 %v3094_v43  ;;  %v3126_v44 = vld [vmem:[#allocation3 + $0xa0] sm:$0xff]  ;;  %v3130_v40 = vld [vmem:[#allocation3 + $0x98] sm:$0xff]  ;;  %v3134_v36 = vld [vmem:[#allocation3 + $0x90] sm:$0xff] }
 0x1f6   :  { %588 = vmatprep.subr.mxu0 %v2696_v25  ;;  %515 = vmatprep.subr.mxu1 %v3098_v41  ;;  %v5289_v25 = vld [vmem:[#allocation72_spill] sm:$0xff]  ;;  %v5291_v26 = vld [vmem:[#allocation71_spill] sm:$0xff]  ;;  %v5293_v27 = vld [vmem:[#allocation70_spill] sm:$0xff] }
 0x1f7   :  { %589 = vmatpush1.msra.mxu0 %v2694_v24  ;;  %516 = vmatpush1.msra.mxu1 %v3102_v60  ;;  %v5287_v24 = vld [vmem:[#allocation73_spill] sm:$0xff]  ;;  %v5297_v29 = vld [vmem:[#allocation68_spill] sm:$0xff]  ;;  %v5299_v30 = vld [vmem:[#allocation67_spill] sm:$0xff] }
 0x1f8   :  { %590 = vmatprep.subr.mxu0 %v2692_v23  ;;  %517 = vmatprep.subr.mxu1 %v3106_v45  ;;  %v5285_v23 = vld [vmem:[#allocation74_spill] sm:$0xff]  ;;  %v5295_v28 = vld [vmem:[#allocation69_spill] sm:$0xff] }
 0x1f9   :  { %591 = vmatpush1.msra.mxu0 %v2690_v22  ;;  %518 = vmatpush1.msra.mxu1 %v3110_v38  ;;  %v5283_v22 = vld [vmem:[#allocation75_spill] sm:$0xff]  ;;  %v5301_v31 = vld [vmem:[#allocation66_spill] sm:$0xff] }
 0x1fa   :  { %592 = vmatprep.subr.mxu0 %v2688_v21  ;;  %519 = vmatprep.subr.mxu1 %v3114_v48  ;;  %v5281_v21 = vld [vmem:[#allocation76_spill] sm:$0xff] }
 0x1fb   :  { %593 = vmatpush1.msra.mxu0 %v2686_v20  ;;  %520 = vmatpush1.msra.mxu1 %v3118_v54  ;;  %v5280_v20 = vld [vmem:[#allocation77_spill] sm:$0xff] }
 0x1fc   :  { %594 = vmatprep.subr.mxu0 %v2684_v19  ;;  %521 = vmatprep.subr.mxu1 %v3122_v47  ;;  %v5279_v19 = vld [vmem:[#allocation78_spill] sm:$0xff] }
 0x1fd   :  { %595 = vmatpush1.msra.mxu0 %v2682_v18  ;;  %522 = vmatpush1.msra.mxu1 %v3126_v44  ;;  %v5278_v18 = vld [vmem:[#allocation79_spill] sm:$0xff] }
 0x1fe   :  { %596 = vmatprep.subr.mxu0 %v2680_v17  ;;  %523 = vmatprep.subr.mxu1 %v3130_v40  ;;  %v5277_v17 = vld [vmem:[#allocation80_spill] sm:$0xff] }
 0x1ff   :  { %597 = vmatpush1.msra.mxu0 %v2678_v16  ;;  %524 = vmatpush1.msra.mxu1 %v3134_v36  ;;  %v5276_v16 = vld [vmem:[#allocation81_spill] sm:$0xff] }
 0x200   :  { %598 = vmatprep.subr.mxu0 %v2676_v15  ;;  %v3138_v15 = vld [vmem:[#allocation3 + $0x88] sm:$0xff] }
 0x201   :  { %599 = vmatpush1.msra.mxu0 %v2674_v14  ;;  %v3142_v14 = vld [vmem:[#allocation3 + $0x80] sm:$0xff]  ;;  %525 = vmatprep.subr.mxu1 %v3138_v15 }
 0x202   :  { %600 = vmatprep.subr.mxu0 %v2672_v13  ;;  %v3146_v13 = vld [vmem:[#allocation3 + $0x78] sm:$0xff]  ;;  %526 = vmatpush1.msra.mxu1 %v3142_v14 }
 0x203   :  { %601 = vmatpush1.msra.mxu0 %v2670_v12  ;;  %v3150_v12 = vld [vmem:[#allocation3 + $0x70] sm:$0xff]  ;;  %527 = vmatprep.subr.mxu1 %v3146_v13 }
 0x204   :  { %602 = vmatprep.subr.mxu0 %v2668_v11  ;;  %v3154_v11 = vld [vmem:[#allocation3 + $0x68] sm:$0xff]  ;;  %528 = vmatpush1.msra.mxu1 %v3150_v12 }
 0x205   :  { %603 = vmatpush1.msra.mxu0 %v2666_v10  ;;  %v3158_v10 = vld [vmem:[#allocation3 + $0x60] sm:$0xff]  ;;  %529 = vmatprep.subr.mxu1 %v3154_v11 }
 0x206   :  { %604 = vmatprep.subr.mxu0 %v2664_v9  ;;  %v3162_v9 = vld [vmem:[#allocation3 + $0x58] sm:$0xff]  ;;  %530 = vmatpush1.msra.mxu1 %v3158_v10 }
 0x207   :  { %605 = vmatpush1.msra.mxu0 %v2662_v8  ;;  %v3166_v8 = vld [vmem:[#allocation3 + $0x50] sm:$0xff]  ;;  %531 = vmatprep.subr.mxu1 %v3162_v9 }
 0x208   :  { %606 = vmatprep.subr.mxu0 %v2660_v7  ;;  %v3170_v7 = vld [vmem:[#allocation3 + $0x48] sm:$0xff]  ;;  %532 = vmatpush1.msra.mxu1 %v3166_v8 }
 0x209   :  { %607 = vmatpush1.msra.mxu0 %v2658_v6  ;;  %v3174_v6 = vld [vmem:[#allocation3 + $0x40] sm:$0xff]  ;;  %533 = vmatprep.subr.mxu1 %v3170_v7 }
 0x20a   :  { %608 = vmatprep.subr.mxu0 %v2656_v5  ;;  %v3178_v5 = vld [vmem:[#allocation3 + $0x38] sm:$0xff]  ;;  %534 = vmatpush1.msra.mxu1 %v3174_v6 }
 0x20b   :  { %609 = vmatpush1.msra.mxu0 %v2654_v4  ;;  %v3182_v4 = vld [vmem:[#allocation3 + $0x30] sm:$0xff]  ;;  %535 = vmatprep.subr.mxu1 %v3178_v5 }
 0x20c   :  { %610 = vmatprep.subr.mxu0 %v2652_v3  ;;  %v3186_v3 = vld [vmem:[#allocation3 + $0x28] sm:$0xff]  ;;  %536 = vmatpush1.msra.mxu1 %v3182_v4 }
 0x20d   :  { %611 = vmatpush1.msra.mxu0 %v2650_v2  ;;  %v3190_v2 = vld [vmem:[#allocation3 + $0x20] sm:$0xff]  ;;  %537 = vmatprep.subr.mxu1 %v3186_v3 }
 0x20e   :  { %612 = vmatprep.subr.mxu0 %v2648_v1  ;;  %v3194_v1 = vld [vmem:[#allocation3 + $0x18] sm:$0xff]  ;;  %538 = vmatpush1.msra.mxu1 %v3190_v2 }
 0x20f   :  { %613 = vmatpush1.msra.mxu0 %v2646_v0  ;;  %v3198_v0 = vld [vmem:[#allocation3 + $0x10] sm:$0xff]  ;;  %539 = vmatprep.subr.mxu1 %v3194_v1 }
 0x210   :  { %614 = vmatprep.subr.mxu0 %v2784_v37  ;;  %v3202_v37 = vld [vmem:[#allocation3 + $0x8] sm:$0xff]  ;;  %540 = vmatpush1.msra.mxu1 %v3198_v0 }
 0x211   :  { %615 = vmatpush2.msra.mxu0 %v2778_v34  ;;  %v3206_v34 = vld [vmem:[#allocation3] sm:$0xff]  ;;  %541 = vmatprep.subr.mxu1 %v3202_v37 }
 0x212   :  { %616 = vmatprep.subr.mxu0 %v2776_v32  ;;  %v3210_v32 = vld [vmem:[#allocation3 + $0x1f8] sm:$0xff]  ;;  %542 = vmatpush1.msra.mxu1 %v3206_v34 }
 0x213   :  { %617 = vmatpush2.msra.mxu0 %v2774_v33  ;;  %v3214_v33 = vld [vmem:[#allocation3 + $0x1f0] sm:$0xff]  ;;  %543 = vmatprep.subr.mxu1 %v3210_v32 }
 0x214   :  { %618 = vmatprep.subr.mxu0 %v2772_v63  ;;  %v3218_v63 = vld [vmem:[#allocation3 + $0x1e8] sm:$0xff]  ;;  %544 = vmatpush2.msra.mxu1 %v3214_v33 }
 0x215   :  { %619 = vmatpush2.msra.mxu0 %v2770_v62  ;;  %v3222_v62 = vld [vmem:[#allocation3 + $0x1e0] sm:$0xff]  ;;  %545 = vmatprep.subr.mxu1 %v3218_v63 }
 0x216   :  { %620 = vmatprep.subr.mxu0 %v2768_v61  ;;  %v3226_v61 = vld [vmem:[#allocation3 + $0x1d8] sm:$0xff]  ;;  %546 = vmatpush2.msra.mxu1 %v3222_v62 }
 0x217   :  { %621 = vmatpush2.msra.mxu0 %v2760_v58  ;;  %v3230_v58 = vld [vmem:[#allocation3 + $0x1d0] sm:$0xff]  ;;  %547 = vmatprep.subr.mxu1 %v3226_v61 }
 0x218   :  { %622 = vmatprep.subr.mxu0 %v2758_v57  ;;  %v3234_v57 = vld [vmem:[#allocation3 + $0x1c8] sm:$0xff]  ;;  %548 = vmatpush2.msra.mxu1 %v3230_v58 }
 0x219   :  { %623 = vmatpush2.msra.mxu0 %v5276_v16  ;;  %v3238_v16 = vld [vmem:[#allocation3 + $0x1c0] sm:$0xff]  ;;  %549 = vmatprep.subr.mxu1 %v3234_v57 }
 0x21a   :  { %624 = vmatprep.subr.mxu0 %v5277_v17  ;;  %v3242_v17 = vld [vmem:[#allocation3 + $0x1b8] sm:$0xff]  ;;  %550 = vmatpush2.msra.mxu1 %v3238_v16 }
 0x21b   :  { %625 = vmatpush2.msra.mxu0 %v5278_v18  ;;  %v3246_v18 = vld [vmem:[#allocation3 + $0x1b0] sm:$0xff]  ;;  %551 = vmatprep.subr.mxu1 %v3242_v17 }
 0x21c   :  { %626 = vmatprep.subr.mxu0 %v5279_v19  ;;  %5282 = vst [vmem:[#allocation171_spill] sm:$0xff] %v3246_v18  ;;  %v3250_v19 = vld [vmem:[#allocation3 + $0x1a8] sm:$0xff]  ;;  %552 = vmatpush2.msra.mxu1 %v3246_v18 }
 0x21d   :  { %627 = vmatpush2.msra.mxu0 %v5280_v20  ;;  %5284 = vst [vmem:[#allocation172_spill] sm:$0xff] %v3250_v19  ;;  %v3254_v20 = vld [vmem:[#allocation3 + $0x1a0] sm:$0xff]  ;;  %553 = vmatprep.subr.mxu1 %v3250_v19 }
 0x21e   :  { %628 = vmatprep.subr.mxu0 %v5281_v21  ;;  %5286 = vst [vmem:[#allocation173_spill] sm:$0xff] %v3254_v20  ;;  %v3258_v21 = vld [vmem:[#allocation3 + $0x198] sm:$0xff]  ;;  %554 = vmatpush2.msra.mxu1 %v3254_v20 }
 0x21f   :  { %629 = vmatpush2.msra.mxu0 %v5283_v22  ;;  %5288 = vst [vmem:[#allocation174_spill] sm:$0xff] %v3258_v21  ;;  %v3262_v22 = vld [vmem:[#allocation3 + $0x190] sm:$0xff]  ;;  %555 = vmatprep.subr.mxu1 %v3258_v21 }
 0x220   :  { %630 = vmatprep.subr.mxu0 %v5285_v23  ;;  %5290 = vst [vmem:[#allocation175_spill] sm:$0xff] %v3262_v22  ;;  %v3266_v23 = vld [vmem:[#allocation3 + $0x188] sm:$0xff]  ;;  %556 = vmatpush2.msra.mxu1 %v3262_v22 }
 0x221   :  { %631 = vmatpush2.msra.mxu0 %v5287_v24  ;;  %5292 = vst [vmem:[#allocation176_spill] sm:$0xff] %v3266_v23  ;;  %v3270_v24 = vld [vmem:[#allocation3 + $0x180] sm:$0xff]  ;;  %557 = vmatprep.subr.mxu1 %v3266_v23  ;;  %v5303_v22 = vld [vmem:[#allocation65_spill] sm:$0xff] }
 0x222   :  { %632 = vmatprep.subr.mxu0 %v5289_v25  ;;  %5294 = vst [vmem:[#allocation177_spill] sm:$0xff] %v3270_v24  ;;  %v3274_v25 = vld [vmem:[#allocation3 + $0x178] sm:$0xff]  ;;  %558 = vmatpush2.msra.mxu1 %v3270_v24  ;;  %v5304_v23 = vld [vmem:[#allocation64_spill] sm:$0xff] }
 0x223   :  { %633 = vmatpush2.msra.mxu0 %v5291_v26  ;;  %5296 = vst [vmem:[#allocation178_spill] sm:$0xff] %v3274_v25  ;;  %v3278_v26 = vld [vmem:[#allocation3 + $0x170] sm:$0xff]  ;;  %559 = vmatprep.subr.mxu1 %v3274_v25  ;;  %v5306_v24 = vld [vmem:[#allocation63_spill] sm:$0xff] }
 0x224   :  { %634 = vmatprep.subr.mxu0 %v5293_v27  ;;  %5298 = vst [vmem:[#allocation179_spill] sm:$0xff] %v3278_v26  ;;  %v3282_v27 = vld [vmem:[#allocation3 + $0x168] sm:$0xff]  ;;  %560 = vmatpush2.msra.mxu1 %v3278_v26  ;;  %v5307_v25 = vld [vmem:[#allocation62_spill] sm:$0xff] }
 0x225   :  { %635 = vmatpush2.msra.mxu0 %v5295_v28  ;;  %5300 = vst [vmem:[#allocation180_spill] sm:$0xff] %v3282_v27  ;;  %v3286_v28 = vld [vmem:[#allocation3 + $0x160] sm:$0xff]  ;;  %561 = vmatprep.subr.mxu1 %v3282_v27  ;;  %v5308_v26 = vld [vmem:[#allocation61_spill] sm:$0xff] }
 0x226   :  { %636 = vmatprep.subr.mxu0 %v5297_v29  ;;  %5302 = vst [vmem:[#allocation181_spill] sm:$0xff] %v3286_v28  ;;  %v3290_v29 = vld [vmem:[#allocation3 + $0x158] sm:$0xff]  ;;  %562 = vmatpush2.msra.mxu1 %v3286_v28  ;;  %v5309_v27 = vld [vmem:[#allocation60_spill] sm:$0xff] }
 0x227   :  { %637 = vmatpush2.msra.mxu0 %v5299_v30  ;;  %v3294_v30 = vld [vmem:[#allocation3 + $0x150] sm:$0xff]  ;;  %563 = vmatprep.subr.mxu1 %v3290_v29  ;;  %v5310_v28 = vld [vmem:[#allocation59_spill] sm:$0xff] }
 0x228   :  { %638 = vmatprep.subr.mxu0 %v5301_v31  ;;  %5305 = vst [vmem:[#allocation182_spill] sm:$0xff] %v3294_v30  ;;  %v3298_v31 = vld [vmem:[#allocation3 + $0x148] sm:$0xff]  ;;  %564 = vmatpush2.msra.mxu1 %v3294_v30  ;;  %v3321_v30 = vld [vmem:[#allocation3 + $0x118] sm:$0xff] }
 0x229   :  { %639 = vmatpush2.msra.mxu0 %v5303_v22  ;;  %v3302_v22 = vld [vmem:[#allocation3 + $0x140] sm:$0xff]  ;;  %565 = vmatprep.subr.mxu1 %v3298_v31  ;;  %5313 = vst [vmem:[#allocation185_spill] sm:$0xff] %v3321_v30 }
 0x22a   :  { %640 = vmatprep.subr.mxu0 %v5304_v23  ;;  %v3306_v23 = vld [vmem:[#allocation3 + $0x138] sm:$0xff]  ;;  %566 = vmatpush2.msra.mxu1 %v3302_v22 }
 0x22b   :  { %641 = vmatpush2.msra.mxu0 %v5306_v24  ;;  %v3310_v24 = vld [vmem:[#allocation3 + $0x130] sm:$0xff]  ;;  %567 = vmatprep.subr.mxu1 %v3306_v23 }
 0x22c   :  { %642 = vmatprep.subr.mxu0 %v5307_v25  ;;  %v3314_v25 = vld [vmem:[#allocation3 + $0x128] sm:$0xff]  ;;  %568 = vmatpush2.msra.mxu1 %v3310_v24 }
 0x22d   :  { %643 = vmatpush2.msra.mxu0 %v5308_v26  ;;  %5311 = vst [vmem:[#allocation183_spill] sm:$0xff] %v3314_v25  ;;  %v3318_v26 = vld [vmem:[#allocation3 + $0x120] sm:$0xff]  ;;  %569 = vmatprep.subr.mxu1 %v3314_v25 }
 0x22e   :  { %644 = vmatprep.subr.mxu0 %v5309_v27  ;;  %5312 = vst [vmem:[#allocation184_spill] sm:$0xff] %v3318_v26  ;;  %v3325_v27 = vld [vmem:[#allocation3 + $0x110] sm:$0xff]  ;;  %570 = vmatpush2.msra.mxu1 %v3318_v26 }
 0x22f   :  { %645 = vmatpush2.msra.mxu0 %v5310_v28  ;;  %5314 = vst [vmem:[#allocation186_spill] sm:$0xff] %v3325_v27  ;;  %v3329_v28 = vld [vmem:[#allocation3 + $0x108] sm:$0xff]  ;;  %571 = vmatprep.subr.mxu1 %v3321_v30 }
 0x230   :  { %647 = vmatmul.mubr.f32.vlgmr.msra.gmra.mxu0 %v2864_v55  ;;  %732 = vmatprep.subr.mxu0 %v3086_v39  ;;  %5315 = vst [vmem:[#allocation187_spill] sm:$0xff] %v3329_v28  ;;  %v3333_v55 = vld [vmem:[#allocation3 + $0x100] sm:$0xff] }
 0x231   :  { %733 = vmatpush1.msra.mxu0 %v3088_v46  ;;  %5316 = vst [vmem:[#allocation188_spill] sm:$0xff] %v3333_v55  ;;  %572 = vmatpush2.msra.mxu1 %v3325_v27 }
 0x232   :  { %734 = vmatprep.subr.mxu0 %v3090_v59  ;;  %573 = vmatprep.subr.mxu1 %v3329_v28 }
 0x233   :  { %735 = vmatpush1.msra.mxu0 %v3094_v43  ;;  %574 = vmatpush2.msra.mxu1 %v3333_v55 }
 0x234   :  { %736 = vmatprep.subr.mxu0 %v3098_v41  ;;  %576 = vmatmul.mubr.f32.vlgmr.msra.gmra.mxu1 %v3075_v52  ;;  %v5317_v52 = vld [vmem:[#allocation112_spill] sm:$0xff] }
 0x235   :  { %737 = vmatpush1.msra.mxu0 %v3102_v60  ;;  %657 = vmatprep.subr.mxu1 %v2869_v50 }
 0x236   :  { %738 = vmatprep.subr.mxu0 %v3106_v45  ;;  %658 = vmatpush1.msra.mxu1 %v2871_v56  ;;  %v5351_v56 = vld [vmem:[#allocation145_spill] sm:$0xff] }
 0x237   :  { %739 = vmatpush1.msra.mxu0 %v3110_v38  ;;  %659 = vmatprep.subr.mxu1 %v2873_v35  ;;  %v5318_v35 = vld [vmem:[#allocation113_spill] sm:$0xff] }
 0x238   :  { %740 = vmatprep.subr.mxu0 %v3114_v48  ;;  %660 = vmatpush1.msra.mxu1 %v2876_v51  ;;  %v5319_v51 = vld [vmem:[#allocation114_spill] sm:$0xff] }
 0x239   :  { %741 = vmatpush1.msra.mxu0 %v3118_v54  ;;  %661 = vmatprep.subr.mxu1 %v2879_v49  ;;  %v5320_v49 = vld [vmem:[#allocation115_spill] sm:$0xff] }
 0x23a   :  { %742 = vmatprep.subr.mxu0 %v3122_v47  ;;  %662 = vmatpush1.msra.mxu1 %v2882_v53  ;;  %v5321_v53 = vld [vmem:[#allocation116_spill] sm:$0xff] }
 0x23b   :  { %743 = vmatpush1.msra.mxu0 %v3126_v44  ;;  %663 = vmatprep.subr.mxu1 %v2885_v42  ;;  %v5322_v42 = vld [vmem:[#allocation117_spill] sm:$0xff] }
 0x23c   :  { %744 = vmatprep.subr.mxu0 %v3130_v40  ;;  %664 = vmatpush1.msra.mxu1 %v5317_v52  ;;  %v5323_v52 = vld [vmem:[#allocation118_spill] sm:$0xff] }
 0x23d   :  { %745 = vmatpush1.msra.mxu0 %v3134_v36  ;;  %665 = vmatprep.subr.mxu1 %v5318_v35  ;;  %v5324_v35 = vld [vmem:[#allocation119_spill] sm:$0xff] }
 0x23e   :  { %746 = vmatprep.subr.mxu0 %v3138_v15  ;;  %666 = vmatpush1.msra.mxu1 %v5319_v51  ;;  %v5325_v51 = vld [vmem:[#allocation120_spill] sm:$0xff] }
 0x23f   :  { %747 = vmatpush1.msra.mxu0 %v3142_v14  ;;  %667 = vmatprep.subr.mxu1 %v5320_v49  ;;  %v5326_v49 = vld [vmem:[#allocation121_spill] sm:$0xff] }
 0x240   :  { %748 = vmatprep.subr.mxu0 %v3146_v13  ;;  %668 = vmatpush1.msra.mxu1 %v5321_v53  ;;  %v5327_v53 = vld [vmem:[#allocation122_spill] sm:$0xff] }
 0x241   :  { %749 = vmatpush1.msra.mxu0 %v3150_v12  ;;  %669 = vmatprep.subr.mxu1 %v5322_v42  ;;  %v5328_v42 = vld [vmem:[#allocation123_spill] sm:$0xff] }
 0x242   :  { %750 = vmatprep.subr.mxu0 %v3154_v11  ;;  %670 = vmatpush1.msra.mxu1 %v5323_v52  ;;  %v5329_v52 = vld [vmem:[#allocation124_spill] sm:$0xff] }
 0x243   :  { %751 = vmatpush1.msra.mxu0 %v3158_v10  ;;  %671 = vmatprep.subr.mxu1 %v5324_v35  ;;  %v5330_v35 = vld [vmem:[#allocation125_spill] sm:$0xff] }
 0x244   :  { %752 = vmatprep.subr.mxu0 %v3162_v9  ;;  %672 = vmatpush1.msra.mxu1 %v5325_v51  ;;  %v5331_v51 = vld [vmem:[#allocation126_spill] sm:$0xff] }
 0x245   :  { %753 = vmatpush1.msra.mxu0 %v3166_v8  ;;  %673 = vmatprep.subr.mxu1 %v5326_v49  ;;  %v5332_v49 = vld [vmem:[#allocation127_spill] sm:$0xff] }
 0x246   :  { %754 = vmatprep.subr.mxu0 %v3170_v7  ;;  %674 = vmatpush1.msra.mxu1 %v5327_v53  ;;  %v5333_v53 = vld [vmem:[#allocation128_spill] sm:$0xff] }
 0x247   :  { %755 = vmatpush1.msra.mxu0 %v3174_v6  ;;  %675 = vmatprep.subr.mxu1 %v5328_v42  ;;  %v5334_v42 = vld [vmem:[#allocation129_spill] sm:$0xff] }
 0x248   :  { %756 = vmatprep.subr.mxu0 %v3178_v5  ;;  %676 = vmatpush1.msra.mxu1 %v5329_v52  ;;  %v5335_v52 = vld [vmem:[#allocation130_spill] sm:$0xff] }
 0x249   :  { %757 = vmatpush1.msra.mxu0 %v3182_v4  ;;  %677 = vmatprep.subr.mxu1 %v5330_v35  ;;  %v5336_v35 = vld [vmem:[#allocation131_spill] sm:$0xff] }
 0x24a   :  { %758 = vmatprep.subr.mxu0 %v3186_v3  ;;  %678 = vmatpush1.msra.mxu1 %v5331_v51  ;;  %v5337_v51 = vld [vmem:[#allocation132_spill] sm:$0xff] }
 0x24b   :  { %759 = vmatpush1.msra.mxu0 %v3190_v2  ;;  %679 = vmatprep.subr.mxu1 %v5332_v49  ;;  %v5338_v49 = vld [vmem:[#allocation133_spill] sm:$0xff] }
 0x24c   :  { %760 = vmatprep.subr.mxu0 %v3194_v1  ;;  %680 = vmatpush1.msra.mxu1 %v5333_v53  ;;  %v5339_v53 = vld [vmem:[#allocation134_spill] sm:$0xff] }
 0x24d   :  { %761 = vmatpush1.msra.mxu0 %v3198_v0  ;;  %681 = vmatprep.subr.mxu1 %v5334_v42  ;;  %v5340_v42 = vld [vmem:[#allocation135_spill] sm:$0xff] }
 0x24e   :  { %762 = vmatprep.subr.mxu0 %v3202_v37  ;;  %682 = vmatpush1.msra.mxu1 %v5335_v52  ;;  %v5341_v52 = vld [vmem:[#allocation136_spill] sm:$0xff] }
 0x24f   :  { %763 = vmatpush1.msra.mxu0 %v3206_v34  ;;  %683 = vmatprep.subr.mxu1 %v5336_v35  ;;  %v5342_v35 = vld [vmem:[#allocation137_spill] sm:$0xff] }
 0x250   :  { %764 = vmatprep.subr.mxu0 %v3210_v32  ;;  %684 = vmatpush1.msra.mxu1 %v5337_v51  ;;  %v5343_v51 = vld [vmem:[#allocation138_spill] sm:$0xff] }
 0x251   :  { %765 = vmatpush2.msra.mxu0 %v3214_v33  ;;  %685 = vmatprep.subr.mxu1 %v5338_v49  ;;  %v5344_v49 = vld [vmem:[#allocation139_spill] sm:$0xff] }
 0x252   :  { %766 = vmatprep.subr.mxu0 %v3218_v63  ;;  %686 = vmatpush1.msra.mxu1 %v5339_v53  ;;  %v5345_v53 = vld [vmem:[#allocation140_spill] sm:$0xff] }
 0x253   :  { %767 = vmatpush2.msra.mxu0 %v3222_v62  ;;  %687 = vmatprep.subr.mxu1 %v5340_v42  ;;  %v5346_v42 = vld [vmem:[#allocation141_spill] sm:$0xff] }
 0x254   :  { %768 = vmatprep.subr.mxu0 %v3226_v61  ;;  %688 = vmatpush1.msra.mxu1 %v5341_v52  ;;  %v5347_v52 = vld [vmem:[#allocation142_spill] sm:$0xff] }
 0x255   :  { %769 = vmatpush2.msra.mxu0 %v3230_v58  ;;  %689 = vmatprep.subr.mxu1 %v5342_v35  ;;  %v5348_v35 = vld [vmem:[#allocation143_spill] sm:$0xff] }
 0x256   :  { %770 = vmatprep.subr.mxu0 %v3234_v57  ;;  %690 = vmatpush2.msra.mxu1 %v5343_v51  ;;  %v5349_v51 = vld [vmem:[#allocation144_spill] sm:$0xff] }
 0x257   :  { %771 = vmatpush2.msra.mxu0 %v3238_v16  ;;  %691 = vmatprep.subr.mxu1 %v5344_v49  ;;  %v5350_v49 = vld [vmem:[#allocation175_spill] sm:$0xff] }
 0x258   :  { %772 = vmatprep.subr.mxu0 %v3242_v17  ;;  %692 = vmatpush2.msra.mxu1 %v5345_v53  ;;  %v5352_v53 = vld [vmem:[#allocation176_spill] sm:$0xff] }
 0x259   :  { %773 = vmatpush2.msra.mxu0 %v3246_v18  ;;  %693 = vmatprep.subr.mxu1 %v5346_v42  ;;  %v5353_v18 = vld [vmem:[#allocation146_spill] sm:$0xff]  ;;  %v5354_v42 = vld [vmem:[#allocation177_spill] sm:$0xff] }
 0x25a   :  { %774 = vmatprep.subr.mxu0 %v3250_v19  ;;  %694 = vmatpush2.msra.mxu1 %v5347_v52  ;;  %v5355_v19 = vld [vmem:[#allocation147_spill] sm:$0xff]  ;;  %v5356_v52 = vld [vmem:[#allocation178_spill] sm:$0xff] }
 0x25b   :  { %775 = vmatpush2.msra.mxu0 %v3254_v20  ;;  %695 = vmatprep.subr.mxu1 %v5348_v35  ;;  %v5357_v20 = vld [vmem:[#allocation148_spill] sm:$0xff]  ;;  %v5358_v35 = vld [vmem:[#allocation179_spill] sm:$0xff] }
 0x25c   :  { %776 = vmatprep.subr.mxu0 %v3258_v21  ;;  %696 = vmatpush2.msra.mxu1 %v5349_v51  ;;  %v5359_v21 = vld [vmem:[#allocation149_spill] sm:$0xff]  ;;  %v5360_v51 = vld [vmem:[#allocation180_spill] sm:$0xff] }
 0x25d   :  { %777 = vmatpush2.msra.mxu0 %v5350_v49  ;;  %697 = vmatprep.subr.mxu1 %v5351_v56  ;;  %v5361_v49 = vld [vmem:[#allocation150_spill] sm:$0xff]  ;;  %v5362_v56 = vld [vmem:[#allocation181_spill] sm:$0xff] }
 0x25e   :  { %778 = vmatprep.subr.mxu0 %v5352_v53  ;;  %698 = vmatpush2.msra.mxu1 %v5353_v18  ;;  %v5363_v53 = vld [vmem:[#allocation151_spill] sm:$0xff]  ;;  %v5364_v18 = vld [vmem:[#allocation152_spill] sm:$0xff] }
 0x25f   :  { %779 = vmatpush2.msra.mxu0 %v5354_v42  ;;  %699 = vmatprep.subr.mxu1 %v5355_v19  ;;  %v5365_v19 = vld [vmem:[#allocation182_spill] sm:$0xff] }
 0x260   :  { %780 = vmatprep.subr.mxu0 %v5356_v52  ;;  %700 = vmatpush2.msra.mxu1 %v5357_v20  ;;  %v5366_v52 = vld [vmem:[#allocation153_spill] sm:$0xff]  ;;  %v5367_v20 = vld [vmem:[#allocation154_spill] sm:$0xff] }
 0x261   :  { %781 = vmatpush2.msra.mxu0 %v5358_v35  ;;  %701 = vmatprep.subr.mxu1 %v5359_v21  ;;  %v5368_v21 = vld [vmem:[#allocation155_spill] sm:$0xff] }
 0x262   :  { %782 = vmatprep.subr.mxu0 %v5360_v51  ;;  %702 = vmatpush2.msra.mxu1 %v5361_v49  ;;  %v5369_v49 = vld [vmem:[#allocation156_spill] sm:$0xff] }
 0x263   :  { %783 = vmatpush2.msra.mxu0 %v5362_v56  ;;  %703 = vmatprep.subr.mxu1 %v5363_v53  ;;  %v5370_v53 = vld [vmem:[#allocation157_spill] sm:$0xff] }
 0x264   :  { %784 = vmatprep.subr.mxu0 %v3290_v29  ;;  %704 = vmatpush2.msra.mxu1 %v5364_v18  ;;  %v5371_v18 = vld [vmem:[#allocation158_spill] sm:$0xff] }
 0x265   :  { %785 = vmatpush2.msra.mxu0 %v5365_v19  ;;  %705 = vmatprep.subr.mxu1 %v5366_v52  ;;  %v5372_v52 = vld [vmem:[#allocation159_spill] sm:$0xff] }
 0x266   :  { %786 = vmatprep.subr.mxu0 %v3298_v31  ;;  %706 = vmatpush2.msra.mxu1 %v5367_v20  ;;  %v5373_v20 = vld [vmem:[#allocation160_spill] sm:$0xff] }
 0x267   :  { %787 = vmatpush2.msra.mxu0 %v3302_v22  ;;  %707 = vmatprep.subr.mxu1 %v5368_v21  ;;  %v5374_v21 = vld [vmem:[#allocation161_spill] sm:$0xff] }
 0x268   :  { %788 = vmatprep.subr.mxu0 %v3306_v23  ;;  %708 = vmatpush2.msra.mxu1 %v5369_v49  ;;  %v5375_v49 = vld [vmem:[#allocation162_spill] sm:$0xff] }
 0x269   :  { %789 = vmatpush2.msra.mxu0 %v3310_v24  ;;  %709 = vmatprep.subr.mxu1 %v5370_v53  ;;  %v5376_v53 = vld [vmem:[#allocation163_spill] sm:$0xff] }
 0x26a   :  { %790 = vmatprep.subr.mxu0 %v3314_v25  ;;  %710 = vmatpush2.msra.mxu1 %v5371_v18  ;;  %v5377_v18 = vld [vmem:[#allocation164_spill] sm:$0xff] }
 0x26b   :  { %791 = vmatpush2.msra.mxu0 %v3318_v26  ;;  %711 = vmatprep.subr.mxu1 %v5372_v52  ;;  %v5378_v52 = vld [vmem:[#allocation165_spill] sm:$0xff]  ;;  %v5384_v25 = vld [vmem:[#allocation96_spill] sm:$0xff] }
 0x26c   :  { %792 = vmatprep.subr.mxu0 %v3321_v30  ;;  %712 = vmatpush2.msra.mxu1 %v5373_v20  ;;  %v5379_v30 = vld [vmem:[#allocation166_spill] sm:$0xff]  ;;  %v5380_v20 = vld [vmem:[#allocation167_spill] sm:$0xff] }
 0x26d   :  { %793 = vmatpush2.msra.mxu0 %v3325_v27  ;;  %713 = vmatprep.subr.mxu1 %v5374_v21  ;;  %v5381_v27 = vld [vmem:[#allocation168_spill] sm:$0xff]  ;;  %v5382_v21 = vld [vmem:[#allocation58_spill] sm:$0xff] }
 0x26e   :  { %794 = vmatprep.subr.mxu0 %v3329_v28  ;;  %714 = vmatpush2.msra.mxu1 %v5375_v49  ;;  %v5383_v49 = vld [vmem:[#allocation95_spill] sm:$0xff] }
 0x26f   :  { %795 = vmatpush2.msra.mxu0 %v3333_v55  ;;  %715 = vmatprep.subr.mxu1 %v5376_v53 }
 0x270   :  { %878 = vmatprep.subr.mxu0 %v2869_v50  ;;  %716 = vmatpush2.msra.mxu1 %v5377_v18 }
 0x271   :  { %717 = vmatprep.subr.mxu1 %v5378_v52 }
 0x272   :  { %718 = vmatpush2.msra.mxu1 %v5379_v30  ;;  %v5385_v30 = vld [vmem:[#allocation57_spill] sm:$0xff] }
 0x273   :  { %719 = vmatprep.subr.mxu1 %v5380_v20  ;;  %v5388_v20 = vld [vmem:[#allocation54_spill] sm:$0xff] }
 0x274   :  { %720 = vmatpush2.msra.mxu1 %v5381_v27  ;;  %v5386_v27 = vld [vmem:[#allocation56_spill] sm:$0xff] }
 0x275   :  { %803 = vmatprep.subr.mxu1 %v5382_v21  ;;  %v5387_v21 = vld [vmem:[#allocation55_spill] sm:$0xff] }
 0x2f0   :  { %v648_v28 = vpop.f32.mrf.mxu0 }
 0x2f1   :  { %v653_v26 = vadd.f32 %v648_v28, %v5383_v49  ;;  %v5389_v28 = vld [vmem:[#allocation53_spill] sm:$0xff]  ;;  %v5392_v49 = vld [vmem:[#allocation50_spill] sm:$0xff] }
 0x2f2   :  { %v650_v55 = vpop.f32.mrf.mxu0 }
 0x2f3   :  { %v654_v53 = vadd.f32 %v650_v55, %v5384_v25  ;;  %v5390_v25 = vld [vmem:[#allocation52_spill] sm:$0xff] }
 0x2f4   :  { %v5394_v55 = vld [vmem:[#allocation48_spill] sm:$0xff] }
 0x2f5   :  { %2265 = vtanh.f32 %v654_v53  ;;  %v5393_v53 = vld [vmem:[#allocation49_spill] sm:$0xff] }
 0x2f6   :  { %2267 = vtanh.f32 %v653_v26  ;;  %v5391_v26 = vld [vmem:[#allocation51_spill] sm:$0xff] }
 0x302   :  { %v2266_v50 = vpop.eup %2265 }
 0x303   :  { %v3468_v18 = vpop.eup %2267  ;;  %721 = vmatprep.mubr.f32.mxu1 %v2266_v50 }
 0x304   :  { %722 = vmatmul.mubr.f32.vlgmr.msra.gmra.mxu1 %v3468_v18 }
 0x305   :  { %804 = vmatpush1.msra.mxu1 %v5385_v30  ;;  %867 = vmatprep.mubr.f32.mxu1 %v2266_v50  ;;  %v5395_v30 = vld [vmem:[#allocation47_spill] sm:$0xff]  ;;  %v5396_v50 = vld [vmem:[#allocation46_spill] sm:$0xff] }
 0x306   :  { %805 = vmatprep.subr.mxu1 %v5386_v27  ;;  %v5397_v27 = vld [vmem:[#allocation45_spill] sm:$0xff] }
 0x307   :  { %806 = vmatpush1.msra.mxu1 %v5387_v21  ;;  %v5398_v21 = vld [vmem:[#allocation44_spill] sm:$0xff] }
 0x308   :  { %807 = vmatprep.subr.mxu1 %v5388_v20  ;;  %v5399_v20 = vld [vmem:[#allocation43_spill] sm:$0xff] }
 0x309   :  { %808 = vmatpush1.msra.mxu1 %v5389_v28  ;;  %v5400_v28 = vld [vmem:[#allocation42_spill] sm:$0xff] }
 0x30a   :  { %809 = vmatprep.subr.mxu1 %v5390_v25  ;;  %v5401_v25 = vld [vmem:[#allocation41_spill] sm:$0xff] }
 0x30b   :  { %810 = vmatpush1.msra.mxu1 %v5391_v26  ;;  %v5402_v26 = vld [vmem:[#allocation40_spill] sm:$0xff] }
 0x30c   :  { %811 = vmatprep.subr.mxu1 %v5392_v49  ;;  %v5403_v49 = vld [vmem:[#allocation39_spill] sm:$0xff] }
 0x30d   :  { %812 = vmatpush1.msra.mxu1 %v5393_v53  ;;  %v5404_v53 = vld [vmem:[#allocation38_spill] sm:$0xff] }
 0x30e   :  { %813 = vmatprep.subr.mxu1 %v5394_v55  ;;  %v5405_v55 = vld [vmem:[#allocation37_spill] sm:$0xff] }
 0x30f   :  { %814 = vmatpush1.msra.mxu1 %v5395_v30  ;;  %v5406_v30 = vld [vmem:[#allocation36_spill] sm:$0xff] }
 0x310   :  { %815 = vmatprep.subr.mxu1 %v5396_v50  ;;  %v5407_v50 = vld [vmem:[#allocation35_spill] sm:$0xff] }
 0x311   :  { %816 = vmatpush1.msra.mxu1 %v5397_v27  ;;  %v5408_v27 = vld [vmem:[#allocation34_spill] sm:$0xff] }
 0x312   :  { %817 = vmatprep.subr.mxu1 %v5398_v21  ;;  %v5409_v21 = vld [vmem:[#allocation33_spill] sm:$0xff] }
 0x313   :  { %818 = vmatpush1.msra.mxu1 %v5399_v20  ;;  %v5410_v20 = vld [vmem:[#allocation32_spill] sm:$0xff] }
 0x314   :  { %819 = vmatprep.subr.mxu1 %v5400_v28  ;;  %v5411_v28 = vld [vmem:[#allocation31_spill] sm:$0xff] }
 0x315   :  { %820 = vmatpush1.msra.mxu1 %v5401_v25  ;;  %v5412_v25 = vld [vmem:[#allocation30_spill] sm:$0xff] }
 0x316   :  { %821 = vmatprep.subr.mxu1 %v5402_v26  ;;  %v5413_v26 = vld [vmem:[#allocation29_spill] sm:$0xff] }
 0x317   :  { %822 = vmatpush1.msra.mxu1 %v5403_v49  ;;  %v5414_v49 = vld [vmem:[#allocation28_spill] sm:$0xff] }
 0x318   :  { %823 = vmatprep.subr.mxu1 %v5404_v53  ;;  %v5415_v53 = vld [vmem:[#allocation27_spill] sm:$0xff] }
 0x319   :  { %824 = vmatpush1.msra.mxu1 %v5405_v55  ;;  %v5416_v55 = vld [vmem:[#allocation90_spill] sm:$0xff] }
 0x31a   :  { %825 = vmatprep.subr.mxu1 %v5406_v30  ;;  %v5417_v30 = vld [vmem:[#allocation89_spill] sm:$0xff] }
 0x31b   :  { %826 = vmatpush1.msra.mxu1 %v5407_v50  ;;  %v5418_v50 = vld [vmem:[#allocation88_spill] sm:$0xff] }
 0x31c   :  { %827 = vmatprep.subr.mxu1 %v5408_v27  ;;  %v5419_v27 = vld [vmem:[#allocation87_spill] sm:$0xff] }
 0x31d   :  { %828 = vmatpush1.msra.mxu1 %v5409_v21  ;;  %v5420_v21 = vld [vmem:[#allocation86_spill] sm:$0xff] }
 0x31e   :  { %829 = vmatprep.subr.mxu1 %v5410_v20  ;;  %v5421_v20 = vld [vmem:[#allocation85_spill] sm:$0xff] }
 0x31f   :  { %830 = vmatpush1.msra.mxu1 %v5411_v28  ;;  %v5422_v28 = vld [vmem:[#allocation84_spill] sm:$0xff] }
 0x320   :  { %831 = vmatprep.subr.mxu1 %v5412_v25  ;;  %v5423_v25 = vld [vmem:[#allocation83_spill] sm:$0xff] }
 0x321   :  { %832 = vmatpush1.msra.mxu1 %v5413_v26  ;;  %v5424_v26 = vld [vmem:[#allocation82_spill] sm:$0xff] }
 0x322   :  { %833 = vmatprep.subr.mxu1 %v5414_v49  ;;  %v5425_v49 = vld [vmem:[#allocation81_spill] sm:$0xff] }
 0x323   :  { %834 = vmatpush1.msra.mxu1 %v5415_v53  ;;  %v5426_v53 = vld [vmem:[#allocation80_spill] sm:$0xff] }
 0x324   :  { %835 = vmatprep.subr.mxu1 %v5416_v55  ;;  %v5427_v55 = vld [vmem:[#allocation79_spill] sm:$0xff] }
 0x325   :  { %836 = vmatpush2.msra.mxu1 %v5417_v30  ;;  %v5428_v30 = vld [vmem:[#allocation78_spill] sm:$0xff] }
 0x326   :  { %837 = vmatprep.subr.mxu1 %v5418_v50  ;;  %v5429_v50 = vld [vmem:[#allocation77_spill] sm:$0xff] }
 0x327   :  { %838 = vmatpush2.msra.mxu1 %v5419_v27  ;;  %v5430_v27 = vld [vmem:[#allocation76_spill] sm:$0xff] }
 0x328   :  { %839 = vmatprep.subr.mxu1 %v5420_v21  ;;  %v5431_v21 = vld [vmem:[#allocation75_spill] sm:$0xff] }
 0x329   :  { %840 = vmatpush2.msra.mxu1 %v5421_v20  ;;  %v5432_v20 = vld [vmem:[#allocation74_spill] sm:$0xff] }
 0x32a   :  { %841 = vmatprep.subr.mxu1 %v5422_v28  ;;  %v5433_v28 = vld [vmem:[#allocation73_spill] sm:$0xff] }
 0x32b   :  { %842 = vmatpush2.msra.mxu1 %v5423_v25  ;;  %v5434_v25 = vld [vmem:[#allocation72_spill] sm:$0xff] }
 0x32c   :  { %843 = vmatprep.subr.mxu1 %v5424_v26  ;;  %v5435_v26 = vld [vmem:[#allocation71_spill] sm:$0xff] }
 0x32d   :  { %844 = vmatpush2.msra.mxu1 %v5425_v49  ;;  %v5436_v49 = vld [vmem:[#allocation70_spill] sm:$0xff] }
 0x32e   :  { %845 = vmatprep.subr.mxu1 %v5426_v53  ;;  %v5437_v53 = vld [vmem:[#allocation69_spill] sm:$0xff] }
 0x32f   :  { %846 = vmatpush2.msra.mxu1 %v5427_v55  ;;  %v5438_v55 = vld [vmem:[#allocation68_spill] sm:$0xff] }
 0x330   :  { %847 = vmatprep.subr.mxu1 %v5428_v30  ;;  %v5439_v30 = vld [vmem:[#allocation67_spill] sm:$0xff] }
 0x331   :  { %848 = vmatpush2.msra.mxu1 %v5429_v50  ;;  %v5440_v50 = vld [vmem:[#allocation66_spill] sm:$0xff] }
 0x332   :  { %849 = vmatprep.subr.mxu1 %v5430_v27  ;;  %v5441_v27 = vld [vmem:[#allocation65_spill] sm:$0xff] }
 0x333   :  { %850 = vmatpush2.msra.mxu1 %v5431_v21  ;;  %v5442_v21 = vld [vmem:[#allocation64_spill] sm:$0xff] }
 0x334   :  { %851 = vmatprep.subr.mxu1 %v5432_v20  ;;  %v5443_v20 = vld [vmem:[#allocation63_spill] sm:$0xff] }
 0x335   :  { %852 = vmatpush2.msra.mxu1 %v5433_v28  ;;  %v5444_v28 = vld [vmem:[#allocation62_spill] sm:$0xff] }
 0x336   :  { %853 = vmatprep.subr.mxu1 %v5434_v25  ;;  %v5445_v25 = vld [vmem:[#allocation61_spill] sm:$0xff] }
 0x337   :  { %854 = vmatpush2.msra.mxu1 %v5435_v26  ;;  %v5446_v26 = vld [vmem:[#allocation60_spill] sm:$0xff] }
 0x338   :  { %855 = vmatprep.subr.mxu1 %v5436_v49  ;;  %v5447_v49 = vld [vmem:[#allocation59_spill] sm:$0xff] }
 0x339   :  { %856 = vmatpush2.msra.mxu1 %v5437_v53 }
 0x33a   :  { %857 = vmatprep.subr.mxu1 %v5438_v55 }
 0x33b   :  { %858 = vmatpush2.msra.mxu1 %v5439_v30 }
 0x33c   :  { %859 = vmatprep.subr.mxu1 %v5440_v50 }
 0x33d   :  { %860 = vmatpush2.msra.mxu1 %v5441_v27 }
 0x33e   :  { %861 = vmatprep.subr.mxu1 %v5442_v21 }
 0x33f   :  { %862 = vmatpush2.msra.mxu1 %v5443_v20 }
 0x340   :  { %863 = vmatprep.subr.mxu1 %v5444_v28 }
 0x341   :  { %864 = vmatpush2.msra.mxu1 %v5445_v25 }
 0x342   :  { %865 = vmatprep.subr.mxu1 %v5446_v26 }
 0x343   :  { %866 = vmatpush2.msra.mxu1 %v5447_v49 }
 0x344   :  { %868 = vmatmul.mubr.f32.vlgmr.msra.gmra.mxu1 %v3468_v18  ;;  %953 = vmatprep.subr.mxu1 %v3086_v39  ;;  %v5471_v39 = vld [vmem:[#allocation113_spill] sm:$0xff] }
 0x345   :  { %954 = vmatpush1.msra.mxu1 %v3088_v46  ;;  %v5472_v46 = vld [vmem:[#allocation114_spill] sm:$0xff] }
 0x346   :  { %955 = vmatprep.subr.mxu1 %v3090_v59  ;;  %v5473_v59 = vld [vmem:[#allocation115_spill] sm:$0xff] }
 0x347   :  { %956 = vmatpush1.msra.mxu1 %v3094_v43  ;;  %v5474_v43 = vld [vmem:[#allocation116_spill] sm:$0xff] }
 0x348   :  { %957 = vmatprep.subr.mxu1 %v3098_v41  ;;  %v5475_v41 = vld [vmem:[#allocation117_spill] sm:$0xff] }
 0x349   :  { %958 = vmatpush1.msra.mxu1 %v3102_v60  ;;  %v5476_v60 = vld [vmem:[#allocation118_spill] sm:$0xff] }
 0x34a   :  { %959 = vmatprep.subr.mxu1 %v3106_v45  ;;  %v5477_v45 = vld [vmem:[#allocation119_spill] sm:$0xff] }
 0x34b   :  { %960 = vmatpush1.msra.mxu1 %v3110_v38  ;;  %v5478_v38 = vld [vmem:[#allocation120_spill] sm:$0xff] }
 0x34c   :  { %961 = vmatprep.subr.mxu1 %v3114_v48  ;;  %v5479_v48 = vld [vmem:[#allocation121_spill] sm:$0xff] }
 0x34d   :  { %962 = vmatpush1.msra.mxu1 %v3118_v54  ;;  %v5480_v54 = vld [vmem:[#allocation122_spill] sm:$0xff] }
 0x34e   :  { %963 = vmatprep.subr.mxu1 %v3122_v47  ;;  %v5481_v47 = vld [vmem:[#allocation123_spill] sm:$0xff] }
 0x34f   :  { %964 = vmatpush1.msra.mxu1 %v3126_v44  ;;  %v5482_v44 = vld [vmem:[#allocation124_spill] sm:$0xff] }
 0x350   :  { %965 = vmatprep.subr.mxu1 %v3130_v40  ;;  %v5467_v40 = vld [vmem:[#allocation109_spill] sm:$0xff] }
 0x351   :  { %966 = vmatpush1.msra.mxu1 %v3134_v36  ;;  %v5466_v36 = vld [vmem:[#allocation108_spill] sm:$0xff] }
 0x352   :  { %967 = vmatprep.subr.mxu1 %v3138_v15 }
 0x353   :  { %968 = vmatpush1.msra.mxu1 %v3142_v14  ;;  %v577_v14 = vpop.f32.mrf.mxu1 }
 0x354   :  { %969 = vmatprep.subr.mxu1 %v3146_v13  ;;  %v5461_v13 = vld [vmem:[#allocation105_spill] sm:$0xff] }
 0x355   :  { %970 = vmatpush1.msra.mxu1 %v3150_v12  ;;  %v5460_v12 = vld [vmem:[#allocation188_spill] sm:$0xff]  ;;  %v579_v15 = vpop.f32.mrf.mxu1 }
 0x356   :  { %971 = vmatprep.subr.mxu1 %v3154_v11  ;;  %v5459_v11 = vld [vmem:[#allocation187_spill] sm:$0xff] }
 0x357   :  { %972 = vmatpush1.msra.mxu1 %v3158_v10  ;;  %v5458_v10 = vld [vmem:[#allocation186_spill] sm:$0xff] }
 0x358   :  { %973 = vmatprep.subr.mxu1 %v3162_v9  ;;  %v5457_v9 = vld [vmem:[#allocation185_spill] sm:$0xff] }
 0x359   :  { %974 = vmatpush1.msra.mxu1 %v3166_v8  ;;  %v5456_v8 = vld [vmem:[#allocation184_spill] sm:$0xff] }
 0x35a   :  { %975 = vmatprep.subr.mxu1 %v3170_v7  ;;  %v5455_v7 = vld [vmem:[#allocation183_spill] sm:$0xff] }
 0x35b   :  { %976 = vmatpush1.msra.mxu1 %v3174_v6  ;;  %v5454_v6 = vld [vmem:[#allocation178_spill] sm:$0xff] }
 0x35c   :  { %977 = vmatprep.subr.mxu1 %v3178_v5  ;;  %v5453_v5 = vld [vmem:[#allocation176_spill] sm:$0xff] }
 0x35d   :  { %978 = vmatpush1.msra.mxu1 %v3182_v4  ;;  %v5452_v4 = vld [vmem:[#allocation175_spill] sm:$0xff] }
 0x35e   :  { %979 = vmatprep.subr.mxu1 %v3186_v3  ;;  %v5451_v3 = vld [vmem:[#allocation174_spill] sm:$0xff] }
 0x35f   :  { %980 = vmatpush1.msra.mxu1 %v3190_v2  ;;  %v5450_v2 = vld [vmem:[#allocation173_spill] sm:$0xff] }
 0x360   :  { %981 = vmatprep.subr.mxu1 %v3194_v1  ;;  %v5449_v1 = vld [vmem:[#allocation172_spill] sm:$0xff] }
 0x361   :  { %982 = vmatpush1.msra.mxu1 %v3198_v0  ;;  %v5448_v0 = vld [vmem:[#allocation171_spill] sm:$0xff] }
 0x362   :  { %983 = vmatprep.subr.mxu1 %v3202_v37 }
 0x363   :  { %984 = vmatpush1.msra.mxu1 %v3206_v34  ;;  %v5462_v34 = vld [vmem:[#allocation169_spill] sm:$0xff] }
 0x364   :  { %985 = vmatprep.subr.mxu1 %v3210_v32 }
 0x365   :  { %986 = vmatpush2.msra.mxu1 %v3214_v33  ;;  %v5465_v33 = vld [vmem:[#allocation107_spill] sm:$0xff] }
 0x366   :  { %987 = vmatprep.subr.mxu1 %v3218_v63  ;;  %v5464_v63 = vld [vmem:[#allocation106_spill] sm:$0xff] }
 0x367   :  { %988 = vmatpush2.msra.mxu1 %v3222_v62 }
 0x368   :  { %989 = vmatprep.subr.mxu1 %v3226_v61 }
 0x369   :  { %990 = vmatpush2.msra.mxu1 %v3230_v58 }
 0x36a   :  { %991 = vmatprep.subr.mxu1 %v3234_v57  ;;  %v5463_v57 = vld [vmem:[#allocation170_spill] sm:$0xff] }
 0x36b   :  { %992 = vmatpush2.msra.mxu1 %v3238_v16 }
 0x36c   :  { %993 = vmatprep.subr.mxu1 %v3242_v17 }
 0x36d   :  { %994 = vmatpush2.msra.mxu1 %v5448_v0  ;;  %v5483_v0 = vld [vmem:[#allocation125_spill] sm:$0xff] }
 0x36e   :  { %995 = vmatprep.subr.mxu1 %v5449_v1  ;;  %v5484_v1 = vld [vmem:[#allocation126_spill] sm:$0xff] }
 0x36f   :  { %996 = vmatpush2.msra.mxu1 %v5450_v2  ;;  %v5485_v2 = vld [vmem:[#allocation127_spill] sm:$0xff] }
 0x370   :  { %997 = vmatprep.subr.mxu1 %v5451_v3  ;;  %v5486_v3 = vld [vmem:[#allocation128_spill] sm:$0xff] }
 0x371   :  { %998 = vmatpush2.msra.mxu1 %v5452_v4  ;;  %v5487_v4 = vld [vmem:[#allocation129_spill] sm:$0xff] }
 0x372   :  { %999 = vmatprep.subr.mxu1 %v5453_v5  ;;  %v5488_v5 = vld [vmem:[#allocation130_spill] sm:$0xff] }
 0x373   :  { %1000 = vmatpush2.msra.mxu1 %v5354_v42  ;;  %v5470_v42 = vld [vmem:[#allocation112_spill] sm:$0xff] }
 0x374   :  { %1001 = vmatprep.subr.mxu1 %v5454_v6  ;;  %v5489_v6 = vld [vmem:[#allocation131_spill] sm:$0xff] }
 0x375   :  { %1002 = vmatpush2.msra.mxu1 %v5358_v35  ;;  %v5468_v35 = vld [vmem:[#allocation110_spill] sm:$0xff] }
 0x376   :  { %1003 = vmatprep.subr.mxu1 %v5360_v51  ;;  %v5469_v51 = vld [vmem:[#allocation111_spill] sm:$0xff] }
 0x377   :  { %1004 = vmatpush2.msra.mxu1 %v5362_v56 }
 0x378   :  { %1005 = vmatprep.subr.mxu1 %v3290_v29 }
 0x379   :  { %1006 = vmatpush2.msra.mxu1 %v5365_v19 }
 0x37a   :  { %1007 = vmatprep.subr.mxu1 %v3298_v31 }
 0x37b   :  { %1008 = vmatpush2.msra.mxu1 %v3302_v22 }
 0x37c   :  { %1009 = vmatprep.subr.mxu1 %v3306_v23 }
 0x37d   :  { %1010 = vmatpush2.msra.mxu1 %v3310_v24 }
 0x37e   :  { %1011 = vmatprep.subr.mxu1 %v5455_v7 }
 0x37f   :  { %1012 = vmatpush2.msra.mxu1 %v5456_v8 }
 0x380   :  { %1013 = vmatprep.subr.mxu1 %v5457_v9 }
 0x381   :  { %1014 = vmatpush2.msra.mxu1 %v5458_v10 }
 0x382   :  { %1015 = vmatprep.subr.mxu1 %v5459_v11 }
 0x383   :  { %1016 = vmatpush2.msra.mxu1 %v5460_v12 }
 0x384   :  { %1099 = vmatprep.subr.mxu1 %v5461_v13 }
 0x3c4   :  { %v723_v16 = vpop.f32.mrf.mxu1 }
 0x3c5   :  { %v724_v17 = vadd.f32 %v723_v16, %v577_v14  ;;  %v5490_v14 = vld [vmem:[#allocation132_spill] sm:$0xff]  ;;  %v5492_v16 = vld [vmem:[#allocation134_spill] sm:$0xff] }
 0x3c6   :  { %v725_v18 = vpop.f32.mrf.mxu1 }
 0x3c7   :  { %v726_v32 = vadd.f32 %v725_v18, %v579_v15  ;;  %v728_v37 = vadd.f32 %v724_v17, %v5462_v34  ;;  %v5491_v15 = vld [vmem:[#allocation133_spill] sm:$0xff]  ;;  %v5493_v17 = vld [vmem:[#allocation135_spill] sm:$0xff]  ;;  %v5494_v18 = vld [vmem:[#allocation136_spill] sm:$0xff] }
 0x3c9   :  { %v729_v58 = vadd.f32 %v726_v32, %v5463_v57  ;;  %v5495_v32 = vld [vmem:[#allocation137_spill] sm:$0xff] }
 0x3cb   :  { %2269 = vtanh.f32 %v729_v58  ;;  %v5497_v58 = vld [vmem:[#allocation139_spill] sm:$0xff] }
 0x3cc   :  { %2271 = vtanh.f32 %v728_v37  ;;  %v5496_v37 = vld [vmem:[#allocation138_spill] sm:$0xff] }
 0x3d8   :  { %v2270_v61 = vpop.eup %2269 }
 0x3d9   :  { %v2272_v62 = vpop.eup %2271  ;;  %796 = vmatprep.mubr.f32.mxu0 %v2270_v61  ;;  %v5498_v61 = vld [vmem:[#allocation140_spill] sm:$0xff] }
 0x3da   :  { %797 = vmatmul.mubr.f32.vlgmr.msra.gmra.mxu0 %v2272_v62  ;;  %v5499_v62 = vld [vmem:[#allocation141_spill] sm:$0xff] }
 0x3db   :  { %879 = vmatpush1.msra.mxu0 %v5464_v63 }
 0x3dc   :  { %880 = vmatprep.subr.mxu0 %v5465_v33 }
 0x3dd   :  { %881 = vmatpush1.msra.mxu0 %v5466_v36 }
 0x3de   :  { %882 = vmatprep.subr.mxu0 %v5467_v40 }
 0x3df   :  { %883 = vmatpush1.msra.mxu0 %v5468_v35 }
 0x3e0   :  { %884 = vmatprep.subr.mxu0 %v5469_v51 }
 0x3e1   :  { %885 = vmatpush1.msra.mxu0 %v5470_v42 }
 0x3e2   :  { %886 = vmatprep.subr.mxu0 %v5471_v39 }
 0x3e3   :  { %887 = vmatpush1.msra.mxu0 %v5472_v46 }
 0x3e4   :  { %888 = vmatprep.subr.mxu0 %v5473_v59 }
 0x3e5   :  { %889 = vmatpush1.msra.mxu0 %v5474_v43 }
 0x3e6   :  { %890 = vmatprep.subr.mxu0 %v5475_v41 }
 0x3e7   :  { %891 = vmatpush1.msra.mxu0 %v5476_v60 }
 0x3e8   :  { %892 = vmatprep.subr.mxu0 %v5477_v45 }
 0x3e9   :  { %893 = vmatpush1.msra.mxu0 %v5478_v38 }
 0x3ea   :  { %894 = vmatprep.subr.mxu0 %v5479_v48 }
 0x3eb   :  { %895 = vmatpush1.msra.mxu0 %v5480_v54 }
 0x3ec   :  { %896 = vmatprep.subr.mxu0 %v5481_v47 }
 0x3ed   :  { %897 = vmatpush1.msra.mxu0 %v5482_v44 }
 0x3ee   :  { %898 = vmatprep.subr.mxu0 %v5483_v0 }
 0x3ef   :  { %899 = vmatpush1.msra.mxu0 %v5484_v1 }
 0x3f0   :  { %900 = vmatprep.subr.mxu0 %v5485_v2 }
 0x3f1   :  { %901 = vmatpush1.msra.mxu0 %v5486_v3  ;;  %v5511_v3 = vld [vmem:[#allocation151_spill] sm:$0xff] }
 0x3f2   :  { %902 = vmatprep.subr.mxu0 %v5487_v4  ;;  %v5509_v4 = vld [vmem:[#allocation150_spill] sm:$0xff] }
 0x3f3   :  { %903 = vmatpush1.msra.mxu0 %v5488_v5  ;;  %v5507_v5 = vld [vmem:[#allocation149_spill] sm:$0xff] }
 0x3f4   :  { %904 = vmatprep.subr.mxu0 %v5489_v6  ;;  %v5500_v6 = vld [vmem:[#allocation142_spill] sm:$0xff] }
 0x3f5   :  { %905 = vmatpush1.msra.mxu0 %v5490_v14  ;;  %v5501_v14 = vld [vmem:[#allocation143_spill] sm:$0xff] }
 0x3f6   :  { %906 = vmatprep.subr.mxu0 %v5491_v15  ;;  %v5502_v15 = vld [vmem:[#allocation144_spill] sm:$0xff] }
 0x3f7   :  { %907 = vmatpush1.msra.mxu0 %v5492_v16  ;;  %v5503_v16 = vld [vmem:[#allocation145_spill] sm:$0xff] }
 0x3f8   :  { %908 = vmatprep.subr.mxu0 %v5493_v17  ;;  %v5504_v17 = vld [vmem:[#allocation146_spill] sm:$0xff] }
 0x3f9   :  { %909 = vmatpush1.msra.mxu0 %v5494_v18 }
 0x3fa   :  { %910 = vmatprep.subr.mxu0 %v5495_v32  ;;  %v5505_v32 = vld [vmem:[#allocation147_spill] sm:$0xff] }
 0x3fb   :  { %911 = vmatpush2.msra.mxu0 %v5496_v37  ;;  %v5506_v37 = vld [vmem:[#allocation148_spill] sm:$0xff] }
 0x3fc   :  { %912 = vmatprep.subr.mxu0 %v5497_v58 }
 0x3fd   :  { %913 = vmatpush2.msra.mxu0 %v5498_v61  ;;  %v5508_v61 = vld [vmem:[#allocation92_spill] sm:$0xff] }
 0x3fe   :  { %914 = vmatprep.subr.mxu0 %v5499_v62 }
 0x3ff   :  { %915 = vmatpush2.msra.mxu0 %v5500_v6  ;;  %v5510_v6 = vld [vmem:[#allocation91_spill] sm:$0xff] }
 0x400   :  { %916 = vmatprep.subr.mxu0 %v5501_v14 }
 0x401   :  { %917 = vmatpush2.msra.mxu0 %v5502_v15  ;;  %v5514_v15 = vld [vmem:[#allocation154_spill] sm:$0xff] }
 0x402   :  { %918 = vmatprep.subr.mxu0 %v5503_v16  ;;  %v5512_v16 = vld [vmem:[#allocation152_spill] sm:$0xff] }
 0x403   :  { %919 = vmatpush2.msra.mxu0 %v5504_v17  ;;  %v5513_v17 = vld [vmem:[#allocation153_spill] sm:$0xff] }
 0x404   :  { %v869_v18 = vpop.f32.mrf.mxu1  ;;  %920 = vmatprep.subr.mxu0 %v5505_v32  ;;  %v5516_v32 = vld [vmem:[#allocation156_spill] sm:$0xff] }
 0x405   :  { %921 = vmatpush2.msra.mxu0 %v5506_v37  ;;  %v874_v14 = vadd.f32 %v869_v18, %v5510_v6  ;;  %v5515_v37 = vld [vmem:[#allocation155_spill] sm:$0xff]  ;;  %v5520_v6 = vld [vmem:[#allocation160_spill] sm:$0xff]  ;;  %v5521_v18 = vld [vmem:[#allocation161_spill] sm:$0xff] }
 0x406   :  { %v871_v58 = vpop.f32.mrf.mxu1  ;;  %922 = vmatprep.subr.mxu0 %v5507_v5  ;;  %v5517_v5 = vld [vmem:[#allocation157_spill] sm:$0xff] }
 0x407   :  { %v875_v62 = vadd.f32 %v871_v58, %v5508_v61  ;;  %923 = vmatpush2.msra.mxu0 %v5509_v4  ;;  %v5518_v58 = vld [vmem:[#allocation158_spill] sm:$0xff]  ;;  %v5519_v61 = vld [vmem:[#allocation159_spill] sm:$0xff] }
 0x408   :  { %924 = vmatprep.subr.mxu0 %v5511_v3 }
 0x409   :  { %2273 = vtanh.f32 %v875_v62  ;;  %925 = vmatpush2.msra.mxu0 %v5512_v16  ;;  %v5522_v62 = vld [vmem:[#allocation162_spill] sm:$0xff] }
 0x40a   :  { %926 = vmatprep.subr.mxu0 %v5513_v17  ;;  %2275 = vtanh.f32 %v874_v14  ;;  %v5523_v17 = vld [vmem:[#allocation163_spill] sm:$0xff] }
 0x40b   :  { %927 = vmatpush2.msra.mxu0 %v5514_v15  ;;  %v5524_v15 = vld [vmem:[#allocation164_spill] sm:$0xff] }
 0x40c   :  { %928 = vmatprep.subr.mxu0 %v5515_v37  ;;  %v5537_v37 = vld [vmem:[#allocation49_spill] sm:$0xff] }
 0x40d   :  { %929 = vmatpush2.msra.mxu0 %v5516_v32  ;;  %v5525_v32 = vld [vmem:[#allocation166_spill] sm:$0xff] }
 0x40e   :  { %930 = vmatprep.subr.mxu0 %v5517_v5  ;;  %v5526_v5 = vld [vmem:[#allocation167_spill] sm:$0xff] }
 0x40f   :  { %931 = vmatpush2.msra.mxu0 %v5518_v58 }
 0x410   :  { %932 = vmatprep.subr.mxu0 %v5519_v61  ;;  %v5527_v61 = vld [vmem:[#allocation168_spill] sm:$0xff] }
 0x411   :  { %933 = vmatpush2.msra.mxu0 %v5520_v6  ;;  %v5535_v6 = vld [vmem:[#allocation51_spill] sm:$0xff] }
 0x412   :  { %934 = vmatprep.subr.mxu0 %v5521_v18  ;;  %v5528_v18 = vld [vmem:[#allocation58_spill] sm:$0xff] }
 0x413   :  { %935 = vmatpush2.msra.mxu0 %v5522_v62  ;;  %v5529_v62 = vld [vmem:[#allocation57_spill] sm:$0xff] }
 0x414   :  { %936 = vmatprep.subr.mxu0 %v5523_v17  ;;  %v5531_v17 = vld [vmem:[#allocation55_spill] sm:$0xff] }
 0x415   :  { %937 = vmatpush2.msra.mxu0 %v5524_v15  ;;  %v5530_v15 = vld [vmem:[#allocation56_spill] sm:$0xff] }
 0x416   :  { %v2274_v14 = vpop.eup %2273  ;;  %938 = vmatprep.subr.mxu0 %v5378_v52  ;;  %v5532_v52 = vld [vmem:[#allocation54_spill] sm:$0xff] }
 0x417   :  { %939 = vmatpush2.msra.mxu0 %v5525_v32  ;;  %942 = vmatprep.mubr.f32.mxu0 %v2274_v14  ;;  %v3666_v58 = vpop.eup %2275  ;;  %v5533_v32 = vld [vmem:[#allocation53_spill] sm:$0xff] }
 0x418   :  { %940 = vmatprep.subr.mxu0 %v5526_v5  ;;  %v5534_v5 = vld [vmem:[#allocation52_spill] sm:$0xff] }
 0x419   :  { %941 = vmatpush2.msra.mxu0 %v5527_v61  ;;  %v5536_v61 = vld [vmem:[#allocation50_spill] sm:$0xff] }
 0x41a   :  { %943 = vmatmul.mubr.f32.vlgmr.msra.gmra.mxu0 %v3666_v58  ;;  %1024 = vmatprep.subr.mxu0 %v5528_v18  ;;  %v5538_v18 = vld [vmem:[#allocation48_spill] sm:$0xff] }
 0x41b   :  { %1025 = vmatpush1.msra.mxu0 %v5529_v62  ;;  %1088 = vmatprep.mubr.f32.mxu0 %v2274_v14  ;;  %v5539_v62 = vld [vmem:[#allocation47_spill] sm:$0xff]  ;;  %v5540_v14 = vld [vmem:[#allocation46_spill] sm:$0xff] }
 0x41c   :  { %1026 = vmatprep.subr.mxu0 %v5530_v15  ;;  %v5541_v15 = vld [vmem:[#allocation45_spill] sm:$0xff] }
 0x41d   :  { %1027 = vmatpush1.msra.mxu0 %v5531_v17  ;;  %v5542_v17 = vld [vmem:[#allocation44_spill] sm:$0xff] }
 0x41e   :  { %1028 = vmatprep.subr.mxu0 %v5532_v52  ;;  %v5543_v52 = vld [vmem:[#allocation43_spill] sm:$0xff] }
 0x41f   :  { %1029 = vmatpush1.msra.mxu0 %v5533_v32  ;;  %v5544_v32 = vld [vmem:[#allocation42_spill] sm:$0xff] }
 0x420   :  { %1030 = vmatprep.subr.mxu0 %v5534_v5  ;;  %v5545_v5 = vld [vmem:[#allocation41_spill] sm:$0xff] }
 0x421   :  { %1031 = vmatpush1.msra.mxu0 %v5535_v6  ;;  %v5546_v6 = vld [vmem:[#allocation40_spill] sm:$0xff] }
 0x422   :  { %1032 = vmatprep.subr.mxu0 %v5536_v61  ;;  %v5547_v61 = vld [vmem:[#allocation39_spill] sm:$0xff] }
 0x423   :  { %1033 = vmatpush1.msra.mxu0 %v5537_v37  ;;  %v5548_v37 = vld [vmem:[#allocation38_spill] sm:$0xff] }
 0x424   :  { %1034 = vmatprep.subr.mxu0 %v5538_v18  ;;  %v5549_v18 = vld [vmem:[#allocation37_spill] sm:$0xff] }
 0x425   :  { %1035 = vmatpush1.msra.mxu0 %v5539_v62  ;;  %v5550_v62 = vld [vmem:[#allocation36_spill] sm:$0xff] }
 0x426   :  { %1036 = vmatprep.subr.mxu0 %v5540_v14  ;;  %v5551_v14 = vld [vmem:[#allocation35_spill] sm:$0xff] }
 0x427   :  { %1037 = vmatpush1.msra.mxu0 %v5541_v15  ;;  %v5552_v15 = vld [vmem:[#allocation34_spill] sm:$0xff] }
 0x428   :  { %1038 = vmatprep.subr.mxu0 %v5542_v17  ;;  %v5553_v17 = vld [vmem:[#allocation33_spill] sm:$0xff] }
 0x429   :  { %1039 = vmatpush1.msra.mxu0 %v5543_v52  ;;  %v5554_v52 = vld [vmem:[#allocation32_spill] sm:$0xff] }
 0x42a   :  { %1040 = vmatprep.subr.mxu0 %v5544_v32  ;;  %v5555_v32 = vld [vmem:[#allocation31_spill] sm:$0xff] }
 0x42b   :  { %1041 = vmatpush1.msra.mxu0 %v5545_v5  ;;  %v5556_v5 = vld [vmem:[#allocation30_spill] sm:$0xff] }
 0x42c   :  { %1042 = vmatprep.subr.mxu0 %v5546_v6  ;;  %v5557_v6 = vld [vmem:[#allocation29_spill] sm:$0xff] }
 0x42d   :  { %1043 = vmatpush1.msra.mxu0 %v5547_v61  ;;  %v5558_v61 = vld [vmem:[#allocation28_spill] sm:$0xff] }
 0x42e   :  { %1044 = vmatprep.subr.mxu0 %v5548_v37  ;;  %v5559_v37 = vld [vmem:[#allocation27_spill] sm:$0xff] }
 0x42f   :  { %1045 = vmatpush1.msra.mxu0 %v5549_v18  ;;  %v5560_v18 = vld [vmem:[#allocation90_spill] sm:$0xff] }
 0x430   :  { %1046 = vmatprep.subr.mxu0 %v5550_v62  ;;  %v5561_v62 = vld [vmem:[#allocation89_spill] sm:$0xff] }
 0x431   :  { %1047 = vmatpush1.msra.mxu0 %v5551_v14  ;;  %v5562_v14 = vld [vmem:[#allocation88_spill] sm:$0xff] }
 0x432   :  { %1048 = vmatprep.subr.mxu0 %v5552_v15  ;;  %v5563_v15 = vld [vmem:[#allocation87_spill] sm:$0xff] }
 0x433   :  { %1049 = vmatpush1.msra.mxu0 %v5553_v17  ;;  %v5564_v17 = vld [vmem:[#allocation86_spill] sm:$0xff] }
 0x434   :  { %1050 = vmatprep.subr.mxu0 %v5554_v52  ;;  %v5565_v52 = vld [vmem:[#allocation85_spill] sm:$0xff] }
 0x435   :  { %1051 = vmatpush1.msra.mxu0 %v5555_v32  ;;  %v5566_v32 = vld [vmem:[#allocation84_spill] sm:$0xff] }
 0x436   :  { %1052 = vmatprep.subr.mxu0 %v5556_v5  ;;  %v5567_v5 = vld [vmem:[#allocation83_spill] sm:$0xff] }
 0x437   :  { %1053 = vmatpush1.msra.mxu0 %v5557_v6  ;;  %v5568_v6 = vld [vmem:[#allocation82_spill] sm:$0xff] }
 0x438   :  { %1054 = vmatprep.subr.mxu0 %v5558_v61  ;;  %v5569_v61 = vld [vmem:[#allocation81_spill] sm:$0xff] }
 0x439   :  { %1055 = vmatpush1.msra.mxu0 %v5559_v37  ;;  %v5570_v37 = vld [vmem:[#allocation80_spill] sm:$0xff] }
 0x43a   :  { %1056 = vmatprep.subr.mxu0 %v5560_v18  ;;  %v5571_v18 = vld [vmem:[#allocation79_spill] sm:$0xff] }
 0x43b   :  { %1057 = vmatpush2.msra.mxu0 %v5561_v62  ;;  %v5572_v62 = vld [vmem:[#allocation78_spill] sm:$0xff] }
 0x43c   :  { %1058 = vmatprep.subr.mxu0 %v5562_v14  ;;  %v5573_v14 = vld [vmem:[#allocation77_spill] sm:$0xff] }
 0x43d   :  { %1059 = vmatpush2.msra.mxu0 %v5563_v15  ;;  %v5574_v15 = vld [vmem:[#allocation76_spill] sm:$0xff] }
 0x43e   :  { %1060 = vmatprep.subr.mxu0 %v5564_v17  ;;  %v5575_v17 = vld [vmem:[#allocation75_spill] sm:$0xff] }
 0x43f   :  { %1061 = vmatpush2.msra.mxu0 %v5565_v52  ;;  %v5576_v52 = vld [vmem:[#allocation74_spill] sm:$0xff] }
 0x440   :  { %1062 = vmatprep.subr.mxu0 %v5566_v32  ;;  %v5577_v32 = vld [vmem:[#allocation73_spill] sm:$0xff] }
 0x441   :  { %1063 = vmatpush2.msra.mxu0 %v5567_v5  ;;  %v5578_v5 = vld [vmem:[#allocation72_spill] sm:$0xff] }
 0x442   :  { %1064 = vmatprep.subr.mxu0 %v5568_v6  ;;  %v5579_v6 = vld [vmem:[#allocation71_spill] sm:$0xff] }
 0x443   :  { %1065 = vmatpush2.msra.mxu0 %v5569_v61  ;;  %v5580_v61 = vld [vmem:[#allocation70_spill] sm:$0xff] }
 0x444   :  { %1066 = vmatprep.subr.mxu0 %v5570_v37 }
 0x445   :  { %1067 = vmatpush2.msra.mxu0 %v5571_v18 }
 0x446   :  { %1068 = vmatprep.subr.mxu0 %v5572_v62 }
 0x447   :  { %1069 = vmatpush2.msra.mxu0 %v5573_v14 }
 0x448   :  { %1070 = vmatprep.subr.mxu0 %v5574_v15 }
 0x449   :  { %1071 = vmatpush2.msra.mxu0 %v5575_v17 }
 0x44a   :  { %1072 = vmatprep.subr.mxu0 %v5576_v52 }
 0x44b   :  { %1073 = vmatpush2.msra.mxu0 %v5577_v32 }
 0x44c   :  { %1074 = vmatprep.subr.mxu0 %v5578_v5 }
 0x44d   :  { %1075 = vmatpush2.msra.mxu0 %v5579_v6 }
 0x44e   :  { %1076 = vmatprep.subr.mxu0 %v5580_v61 }
 0x44f   :  { %1077 = vmatpush2.msra.mxu0 %v5437_v53 }
 0x450   :  { %1078 = vmatprep.subr.mxu0 %v5438_v55  ;;  %v3735_v55 = vld [vmem:[#allocation3 + $0xf8] sm:$0xff] }
 0x451   :  { %1079 = vmatpush2.msra.mxu0 %v5439_v30  ;;  %5581 = vst [vmem:[#allocation177_spill] sm:$0xff] %v3735_v55 }
 0x452   :  { %1080 = vmatprep.subr.mxu0 %v5440_v50  ;;  %v3738_v50 = vld [vmem:[#allocation3 + $0xf0] sm:$0xff] }
 0x453   :  { %1081 = vmatpush2.msra.mxu0 %v5441_v27  ;;  %5582 = vst [vmem:[#allocation179_spill] sm:$0xff] %v3738_v50 }
 0x454   :  { %1082 = vmatprep.subr.mxu0 %v5442_v21  ;;  %v3741_v21 = vld [vmem:[#allocation3 + $0xe8] sm:$0xff] }
 0x455   :  { %1083 = vmatpush2.msra.mxu0 %v5443_v20  ;;  %5583 = vst [vmem:[#allocation180_spill] sm:$0xff] %v3741_v21 }
 0x456   :  { %1084 = vmatprep.subr.mxu0 %v5444_v28  ;;  %v3744_v28 = vld [vmem:[#allocation3 + $0xe0] sm:$0xff] }
 0x457   :  { %1085 = vmatpush2.msra.mxu0 %v5445_v25  ;;  %5584 = vst [vmem:[#allocation181_spill] sm:$0xff] %v3744_v28 }
 0x458   :  { %1086 = vmatprep.subr.mxu0 %v5446_v26  ;;  %v3747_v26 = vld [vmem:[#allocation3 + $0xd8] sm:$0xff] }
 0x459   :  { %1087 = vmatpush2.msra.mxu0 %v5447_v49  ;;  %5585 = vst [vmem:[#allocation182_spill] sm:$0xff] %v3747_v26 }
 0x45a   :  { %1089 = vmatmul.mubr.f32.vlgmr.msra.gmra.mxu0 %v3666_v58  ;;  %1174 = vmatprep.subr.mxu0 %v3735_v55  ;;  %v3750_v58 = vld [vmem:[#allocation3 + $0xd0] sm:$0xff]  ;;  %v3753_v55 = vld [vmem:[#allocation3 + $0xc8] sm:$0xff] }
 0x45b   :  { %1175 = vmatpush1.msra.mxu0 %v3738_v50  ;;  %5586 = vst [vmem:[#allocation95_spill] sm:$0xff] %v3750_v58  ;;  %5587 = vst [vmem:[#allocation96_spill] sm:$0xff] %v3753_v55  ;;  %v3756_v50 = vld [vmem:[#allocation3 + $0xc0] sm:$0xff] }
 0x45c   :  { %1176 = vmatprep.subr.mxu0 %v3741_v21  ;;  %5588 = vst [vmem:[#allocation69_spill] sm:$0xff] %v3756_v50  ;;  %v3759_v21 = vld [vmem:[#allocation3 + $0xb8] sm:$0xff] }
 0x45d   :  { %1177 = vmatpush1.msra.mxu0 %v3744_v28  ;;  %5589 = vst [vmem:[#allocation171_spill] sm:$0xff] %v3759_v21  ;;  %v3762_v28 = vld [vmem:[#allocation3 + $0xb0] sm:$0xff] }
 0x45e   :  { %1178 = vmatprep.subr.mxu0 %v3747_v26  ;;  %5590 = vst [vmem:[#allocation172_spill] sm:$0xff] %v3762_v28  ;;  %v3765_v26 = vld [vmem:[#allocation3 + $0xa8] sm:$0xff] }
 0x45f   :  { %1179 = vmatpush1.msra.mxu0 %v3750_v58  ;;  %5591 = vst [vmem:[#allocation173_spill] sm:$0xff] %v3765_v26  ;;  %v3768_v58 = vld [vmem:[#allocation3 + $0xa0] sm:$0xff] }
 0x460   :  { %1180 = vmatprep.subr.mxu0 %v3753_v55  ;;  %5592 = vst [vmem:[#allocation174_spill] sm:$0xff] %v3768_v58  ;;  %v3771_v55 = vld [vmem:[#allocation3 + $0x98] sm:$0xff] }
 0x461   :  { %1181 = vmatpush1.msra.mxu0 %v3756_v50  ;;  %5593 = vst [vmem:[#allocation175_spill] sm:$0xff] %v3771_v55  ;;  %v3774_v50 = vld [vmem:[#allocation3 + $0x90] sm:$0xff] }
 0x462   :  { %1182 = vmatprep.subr.mxu0 %v3759_v21  ;;  %5594 = vst [vmem:[#allocation176_spill] sm:$0xff] %v3774_v50  ;;  %v3777_v21 = vld [vmem:[#allocation3 + $0x88] sm:$0xff] }
 0x463   :  { %1183 = vmatpush1.msra.mxu0 %v3762_v28  ;;  %5595 = vst [vmem:[#allocation178_spill] sm:$0xff] %v3777_v21  ;;  %v3780_v28 = vld [vmem:[#allocation3 + $0x80] sm:$0xff] }
 0x464   :  { %1184 = vmatprep.subr.mxu0 %v3765_v26  ;;  %5596 = vst [vmem:[#allocation183_spill] sm:$0xff] %v3780_v28  ;;  %v3783_v26 = vld [vmem:[#allocation3 + $0x78] sm:$0xff] }
 0x465   :  { %1185 = vmatpush1.msra.mxu0 %v3768_v58  ;;  %5597 = vst [vmem:[#allocation184_spill] sm:$0xff] %v3783_v26  ;;  %v3786_v58 = vld [vmem:[#allocation3 + $0x70] sm:$0xff] }
 0x466   :  { %1186 = vmatprep.subr.mxu0 %v3771_v55  ;;  %5598 = vst [vmem:[#allocation185_spill] sm:$0xff] %v3786_v58  ;;  %v3789_v55 = vld [vmem:[#allocation3 + $0x68] sm:$0xff] }
 0x467   :  { %1187 = vmatpush1.msra.mxu0 %v3774_v50  ;;  %5599 = vst [vmem:[#allocation186_spill] sm:$0xff] %v3789_v55  ;;  %v3792_v50 = vld [vmem:[#allocation3 + $0x60] sm:$0xff] }
 0x468   :  { %1188 = vmatprep.subr.mxu0 %v3777_v21  ;;  %5600 = vst [vmem:[#allocation187_spill] sm:$0xff] %v3792_v50  ;;  %v3795_v21 = vld [vmem:[#allocation3 + $0x58] sm:$0xff] }
 0x469   :  { %1189 = vmatpush1.msra.mxu0 %v3780_v28  ;;  %5601 = vst [vmem:[#allocation188_spill] sm:$0xff] %v3795_v21  ;;  %v3798_v28 = vld [vmem:[#allocation3 + $0x50] sm:$0xff] }
 0x46a   :  { %1190 = vmatprep.subr.mxu0 %v3783_v26  ;;  %5602 = vst [vmem:[#allocation105_spill] sm:$0xff] %v3798_v28  ;;  %v3801_v26 = vld [vmem:[#allocation3 + $0x48] sm:$0xff] }
 0x46b   :  { %1191 = vmatpush1.msra.mxu0 %v3786_v58  ;;  %5603 = vst [vmem:[#allocation169_spill] sm:$0xff] %v3801_v26  ;;  %v3804_v58 = vld [vmem:[#allocation3 + $0x40] sm:$0xff] }
 0x46c   :  { %1192 = vmatprep.subr.mxu0 %v3789_v55  ;;  %5604 = vst [vmem:[#allocation170_spill] sm:$0xff] %v3804_v58  ;;  %v3807_v55 = vld [vmem:[#allocation3 + $0x38] sm:$0xff] }
 0x46d   :  { %1193 = vmatpush1.msra.mxu0 %v3792_v50  ;;  %5605 = vst [vmem:[#allocation106_spill] sm:$0xff] %v3807_v55  ;;  %v3810_v50 = vld [vmem:[#allocation3 + $0x30] sm:$0xff] }
 0x46e   :  { %1194 = vmatprep.subr.mxu0 %v3795_v21  ;;  %5606 = vst [vmem:[#allocation107_spill] sm:$0xff] %v3810_v50  ;;  %v3813_v21 = vld [vmem:[#allocation3 + $0x28] sm:$0xff] }
 0x46f   :  { %1195 = vmatpush1.msra.mxu0 %v3798_v28  ;;  %5607 = vst [vmem:[#allocation108_spill] sm:$0xff] %v3813_v21  ;;  %v3816_v28 = vld [vmem:[#allocation3 + $0x20] sm:$0xff] }
 0x470   :  { %1196 = vmatprep.subr.mxu0 %v3801_v26  ;;  %5608 = vst [vmem:[#allocation109_spill] sm:$0xff] %v3816_v28  ;;  %v3819_v26 = vld [vmem:[#allocation3 + $0x18] sm:$0xff] }
 0x471   :  { %1197 = vmatpush1.msra.mxu0 %v3804_v58  ;;  %5609 = vst [vmem:[#allocation110_spill] sm:$0xff] %v3819_v26  ;;  %v3822_v58 = vld [vmem:[#allocation3 + $0x10] sm:$0xff] }
 0x472   :  { %1198 = vmatprep.subr.mxu0 %v3807_v55  ;;  %5610 = vst [vmem:[#allocation111_spill] sm:$0xff] %v3822_v58  ;;  %v3825_v55 = vld [vmem:[#allocation3 + $0x8] sm:$0xff] }
 0x473   :  { %1199 = vmatpush1.msra.mxu0 %v3810_v50  ;;  %5611 = vst [vmem:[#allocation112_spill] sm:$0xff] %v3825_v55  ;;  %v3828_v50 = vld [vmem:[#allocation3] sm:$0xff] }
 0x474   :  { %1200 = vmatprep.subr.mxu0 %v3813_v21  ;;  %5612 = vst [vmem:[#allocation113_spill] sm:$0xff] %v3828_v50  ;;  %v3831_v21 = vld [vmem:[#allocation3 + $0x1f8] sm:$0xff] }
 0x475   :  { %1201 = vmatpush1.msra.mxu0 %v3816_v28  ;;  %5613 = vst [vmem:[#allocation114_spill] sm:$0xff] %v3831_v21  ;;  %v3834_v28 = vld [vmem:[#allocation3 + $0x1f0] sm:$0xff] }
 0x476   :  { %1202 = vmatprep.subr.mxu0 %v3819_v26  ;;  %5614 = vst [vmem:[#allocation115_spill] sm:$0xff] %v3834_v28  ;;  %v3837_v26 = vld [vmem:[#allocation3 + $0x1e8] sm:$0xff] }
 0x477   :  { %1203 = vmatpush1.msra.mxu0 %v3822_v58  ;;  %5615 = vst [vmem:[#allocation116_spill] sm:$0xff] %v3837_v26  ;;  %v3840_v58 = vld [vmem:[#allocation3 + $0x1e0] sm:$0xff] }
 0x478   :  { %1204 = vmatprep.subr.mxu0 %v3825_v55  ;;  %5616 = vst [vmem:[#allocation117_spill] sm:$0xff] %v3840_v58  ;;  %v3843_v55 = vld [vmem:[#allocation3 + $0x1d8] sm:$0xff] }
 0x479   :  { %1205 = vmatpush1.msra.mxu0 %v3828_v50  ;;  %5617 = vst [vmem:[#allocation118_spill] sm:$0xff] %v3843_v55  ;;  %v3846_v50 = vld [vmem:[#allocation3 + $0x1d0] sm:$0xff] }
 0x47a   :  { %1206 = vmatprep.subr.mxu0 %v3831_v21  ;;  %5618 = vst [vmem:[#allocation119_spill] sm:$0xff] %v3846_v50  ;;  %v3849_v21 = vld [vmem:[#allocation3 + $0x1c8] sm:$0xff] }
 0x47b   :  { %1207 = vmatpush2.msra.mxu0 %v3834_v28  ;;  %5619 = vst [vmem:[#allocation120_spill] sm:$0xff] %v3849_v21  ;;  %v3852_v28 = vld [vmem:[#allocation3 + $0x1c0] sm:$0xff] }
 0x47c   :  { %1208 = vmatprep.subr.mxu0 %v3837_v26  ;;  %5620 = vst [vmem:[#allocation121_spill] sm:$0xff] %v3852_v28  ;;  %v3855_v26 = vld [vmem:[#allocation3 + $0x1b8] sm:$0xff] }
 0x47d   :  { %1209 = vmatpush2.msra.mxu0 %v3840_v58  ;;  %5621 = vst [vmem:[#allocation122_spill] sm:$0xff] %v3855_v26  ;;  %v3858_v58 = vld [vmem:[#allocation3 + $0x1b0] sm:$0xff] }
 0x47e   :  { %1210 = vmatprep.subr.mxu0 %v3843_v55  ;;  %5622 = vst [vmem:[#allocation123_spill] sm:$0xff] %v3858_v58  ;;  %v3861_v55 = vld [vmem:[#allocation3 + $0x1a8] sm:$0xff] }
 0x47f   :  { %1211 = vmatpush2.msra.mxu0 %v3846_v50  ;;  %5623 = vst [vmem:[#allocation124_spill] sm:$0xff] %v3861_v55  ;;  %v3864_v50 = vld [vmem:[#allocation3 + $0x1a0] sm:$0xff] }
 0x480   :  { %1212 = vmatprep.subr.mxu0 %v3849_v21  ;;  %5624 = vst [vmem:[#allocation125_spill] sm:$0xff] %v3864_v50  ;;  %v3867_v21 = vld [vmem:[#allocation3 + $0x198] sm:$0xff] }
 0x481   :  { %1213 = vmatpush2.msra.mxu0 %v3852_v28  ;;  %5625 = vst [vmem:[#allocation92_spill] sm:$0xff] %v3867_v21  ;;  %v3870_v28 = vld [vmem:[#allocation3 + $0x190] sm:$0xff] }
 0x482   :  { %1214 = vmatprep.subr.mxu0 %v3855_v26  ;;  %5626 = vst [vmem:[#allocation150_spill] sm:$0xff] %v3870_v28  ;;  %v3873_v26 = vld [vmem:[#allocation3 + $0x188] sm:$0xff] }
 0x483   :  { %1215 = vmatpush2.msra.mxu0 %v3858_v58  ;;  %5627 = vst [vmem:[#allocation91_spill] sm:$0xff] %v3873_v26  ;;  %v3876_v58 = vld [vmem:[#allocation3 + $0x180] sm:$0xff] }
 0x484   :  { %1216 = vmatprep.subr.mxu0 %v3861_v55  ;;  %5628 = vst [vmem:[#allocation151_spill] sm:$0xff] %v3876_v58  ;;  %v3879_v55 = vld [vmem:[#allocation3 + $0x178] sm:$0xff] }
 0x485   :  { %1217 = vmatpush2.msra.mxu0 %v3864_v50  ;;  %5629 = vst [vmem:[#allocation80_spill] sm:$0xff] %v3879_v55  ;;  %v3882_v50 = vld [vmem:[#allocation3 + $0x170] sm:$0xff] }
 0x486   :  { %1218 = vmatprep.subr.mxu0 %v3867_v21  ;;  %5630 = vst [vmem:[#allocation189_spill] sm:$0xff] %v3882_v50  ;;  %v3885_v21 = vld [vmem:[#allocation3 + $0x168] sm:$0xff] }
 0x487   :  { %1219 = vmatpush2.msra.mxu0 %v3870_v28  ;;  %5631 = vst [vmem:[#allocation190_spill] sm:$0xff] %v3885_v21 }
 0x488   :  { %1220 = vmatprep.subr.mxu0 %v3873_v26 }
 0x489   :  { %1221 = vmatpush2.msra.mxu0 %v3876_v58 }
 0x48a   :  { %1222 = vmatprep.subr.mxu0 %v3879_v55 }
 0x48b   :  { %1223 = vmatpush2.msra.mxu0 %v3882_v50 }
 0x48c   :  { %1224 = vmatprep.subr.mxu0 %v3885_v21 }
 0x48d   :  { %1225 = vmatpush2.msra.mxu0 %v5362_v56 }
 0x48e   :  { %1226 = vmatprep.subr.mxu0 %v3290_v29 }
 0x48f   :  { %1227 = vmatpush2.msra.mxu0 %v5365_v19 }
 0x490   :  { %1228 = vmatprep.subr.mxu0 %v3298_v31 }
 0x491   :  { %1229 = vmatpush2.msra.mxu0 %v3302_v22 }
 0x492   :  { %1230 = vmatprep.subr.mxu0 %v3306_v23 }
 0x493   :  { %1231 = vmatpush2.msra.mxu0 %v3310_v24 }
 0x494   :  { %1232 = vmatprep.subr.mxu0 %v5455_v7 }
 0x495   :  { %1233 = vmatpush2.msra.mxu0 %v5456_v8 }
 0x496   :  { %1234 = vmatprep.subr.mxu0 %v5457_v9 }
 0x497   :  { %1235 = vmatpush2.msra.mxu0 %v5458_v10  ;;  %v5632_v10 = vld [vmem:[#allocation128_spill] sm:$0xff] }
 0x498   :  { %1236 = vmatprep.subr.mxu0 %v5459_v11  ;;  %v5633_v11 = vld [vmem:[#allocation129_spill] sm:$0xff] }
 0x499   :  { %1237 = vmatpush2.msra.mxu0 %v5460_v12  ;;  %v5634_v12 = vld [vmem:[#allocation130_spill] sm:$0xff] }
 0x49a   :  { %1320 = vmatprep.subr.mxu0 %v5461_v13  ;;  %v798_v19 = vpop.f32.mrf.mxu0 }
 0x49c   :  { %v800_v22 = vpop.f32.mrf.mxu0 }
 0x4da   :  { %v944_v29 = vpop.f32.mrf.mxu0 }
 0x4db   :  { %v945_v23 = vadd.f32 %v944_v29, %v798_v19  ;;  %v5635_v19 = vld [vmem:[#allocation131_spill] sm:$0xff]  ;;  %v5637_v29 = vld [vmem:[#allocation133_spill] sm:$0xff] }
 0x4dc   :  { %v946_v31 = vpop.f32.mrf.mxu0 }
 0x4dd   :  { %v947_v24 = vadd.f32 %v946_v31, %v800_v22  ;;  %v949_v56 = vadd.f32 %v945_v23, %v5462_v34  ;;  %v5636_v22 = vld [vmem:[#allocation132_spill] sm:$0xff]  ;;  %v5638_v23 = vld [vmem:[#allocation134_spill] sm:$0xff]  ;;  %v5639_v31 = vld [vmem:[#allocation135_spill] sm:$0xff] }
 0x4df   :  { %v950_v7 = vadd.f32 %v947_v24, %v5463_v57  ;;  %v5640_v24 = vld [vmem:[#allocation136_spill] sm:$0xff] }
 0x4e1   :  { %2277 = vtanh.f32 %v950_v7  ;;  %v5642_v7 = vld [vmem:[#allocation138_spill] sm:$0xff] }
 0x4e2   :  { %2279 = vtanh.f32 %v949_v56  ;;  %v5641_v56 = vld [vmem:[#allocation137_spill] sm:$0xff] }
 0x4ee   :  { %v2278_v8 = vpop.eup %2277 }
 0x4ef   :  { %v2280_v9 = vpop.eup %2279  ;;  %1017 = vmatprep.mubr.f32.mxu1 %v2278_v8  ;;  %v5643_v8 = vld [vmem:[#allocation139_spill] sm:$0xff] }
 0x4f0   :  { %1018 = vmatmul.mubr.f32.vlgmr.msra.gmra.mxu1 %v2280_v9  ;;  %v5644_v9 = vld [vmem:[#allocation140_spill] sm:$0xff] }
 0x4f1   :  { %1100 = vmatpush1.msra.mxu1 %v5464_v63 }
 0x4f2   :  { %1101 = vmatprep.subr.mxu1 %v5465_v33 }
 0x4f3   :  { %1102 = vmatpush1.msra.mxu1 %v5466_v36 }
 0x4f4   :  { %1103 = vmatprep.subr.mxu1 %v5467_v40 }
 0x4f5   :  { %1104 = vmatpush1.msra.mxu1 %v5468_v35 }
 0x4f6   :  { %1105 = vmatprep.subr.mxu1 %v5469_v51 }
 0x4f7   :  { %1106 = vmatpush1.msra.mxu1 %v5470_v42 }
 0x4f8   :  { %1107 = vmatprep.subr.mxu1 %v5471_v39 }
 0x4f9   :  { %1108 = vmatpush1.msra.mxu1 %v5472_v46 }
 0x4fa   :  { %1109 = vmatprep.subr.mxu1 %v5473_v59 }
 0x4fb   :  { %1110 = vmatpush1.msra.mxu1 %v5474_v43 }
 0x4fc   :  { %1111 = vmatprep.subr.mxu1 %v5475_v41 }
 0x4fd   :  { %1112 = vmatpush1.msra.mxu1 %v5476_v60 }
 0x4fe   :  { %1113 = vmatprep.subr.mxu1 %v5477_v45 }
 0x4ff   :  { %1114 = vmatpush1.msra.mxu1 %v5478_v38 }
 0x500   :  { %1115 = vmatprep.subr.mxu1 %v5479_v48 }
 0x501   :  { %1116 = vmatpush1.msra.mxu1 %v5480_v54 }
 0x502   :  { %1117 = vmatprep.subr.mxu1 %v5481_v47 }
 0x503   :  { %1118 = vmatpush1.msra.mxu1 %v5482_v44 }
 0x504   :  { %1119 = vmatprep.subr.mxu1 %v5483_v0 }
 0x505   :  { %1120 = vmatpush1.msra.mxu1 %v5484_v1 }
 0x506   :  { %1121 = vmatprep.subr.mxu1 %v5485_v2 }
 0x507   :  { %1122 = vmatpush1.msra.mxu1 %v5632_v10 }
 0x508   :  { %1123 = vmatprep.subr.mxu1 %v5633_v11  ;;  %v5654_v11 = vld [vmem:[#allocation94_spill] sm:$0xff] }
 0x509   :  { %1124 = vmatpush1.msra.mxu1 %v5634_v12  ;;  %v5645_v12 = vld [vmem:[#allocation141_spill] sm:$0xff] }
 0x50a   :  { %1125 = vmatprep.subr.mxu1 %v5635_v19  ;;  %v5646_v19 = vld [vmem:[#allocation142_spill] sm:$0xff] }
 0x50b   :  { %1126 = vmatpush1.msra.mxu1 %v5636_v22  ;;  %v5647_v22 = vld [vmem:[#allocation143_spill] sm:$0xff] }
 0x50c   :  { %1127 = vmatprep.subr.mxu1 %v5637_v29  ;;  %v5648_v29 = vld [vmem:[#allocation144_spill] sm:$0xff] }
 0x50d   :  { %1128 = vmatpush1.msra.mxu1 %v5638_v23  ;;  %v5649_v23 = vld [vmem:[#allocation145_spill] sm:$0xff] }
 0x50e   :  { %1129 = vmatprep.subr.mxu1 %v5639_v31  ;;  %v5650_v31 = vld [vmem:[#allocation146_spill] sm:$0xff] }
 0x50f   :  { %1130 = vmatpush1.msra.mxu1 %v5640_v24  ;;  %v5651_v24 = vld [vmem:[#allocation147_spill] sm:$0xff] }
 0x510   :  { %1131 = vmatprep.subr.mxu1 %v5641_v56 }
 0x511   :  { %1132 = vmatpush2.msra.mxu1 %v5642_v7  ;;  %v5652_v7 = vld [vmem:[#allocation148_spill] sm:$0xff] }
 0x512   :  { %1133 = vmatprep.subr.mxu1 %v5643_v8  ;;  %v5653_v8 = vld [vmem:[#allocation149_spill] sm:$0xff] }
 0x513   :  { %1134 = vmatpush2.msra.mxu1 %v5644_v9 }
 0x514   :  { %1135 = vmatprep.subr.mxu1 %v5645_v12 }
 0x515   :  { %1136 = vmatpush2.msra.mxu1 %v5646_v19  ;;  %v5655_v19 = vld [vmem:[#allocation93_spill] sm:$0xff] }
 0x516   :  { %1137 = vmatprep.subr.mxu1 %v5647_v22 }
 0x517   :  { %1138 = vmatpush2.msra.mxu1 %v5648_v29 }
 0x518   :  { %1139 = vmatprep.subr.mxu1 %v5649_v23  ;;  %v5660_v23 = vld [vmem:[#allocation157_spill] sm:$0xff] }
 0x519   :  { %1140 = vmatpush2.msra.mxu1 %v5650_v31  ;;  %v5656_v31 = vld [vmem:[#allocation153_spill] sm:$0xff] }
 0x51a   :  { %1141 = vmatprep.subr.mxu1 %v5651_v24  ;;  %v1090_v56 = vpop.f32.mrf.mxu0  ;;  %v5657_v24 = vld [vmem:[#allocation154_spill] sm:$0xff] }
 0x51b   :  { %1142 = vmatpush2.msra.mxu1 %v5652_v7  ;;  %v1095_v22 = vadd.f32 %v1090_v56, %v5655_v19  ;;  %v5658_v7 = vld [vmem:[#allocation155_spill] sm:$0xff]  ;;  %v5663_v19 = vld [vmem:[#allocation160_spill] sm:$0xff]  ;;  %v5665_v56 = vld [vmem:[#allocation162_spill] sm:$0xff] }
 0x51c   :  { %1143 = vmatprep.subr.mxu1 %v5653_v8  ;;  %v1092_v9 = vpop.f32.mrf.mxu0  ;;  %v5659_v8 = vld [vmem:[#allocation156_spill] sm:$0xff] }
 0x51d   :  { %v1096_v12 = vadd.f32 %v1092_v9, %v5654_v11  ;;  %1144 = vmatpush2.msra.mxu1 %v5509_v4  ;;  %v5661_v11 = vld [vmem:[#allocation158_spill] sm:$0xff]  ;;  %v5662_v9 = vld [vmem:[#allocation159_spill] sm:$0xff] }
 0x51e   :  { %1145 = vmatprep.subr.mxu1 %v5511_v3 }
 0x51f   :  { %2281 = vtanh.f32 %v1096_v12  ;;  %1146 = vmatpush2.msra.mxu1 %v5512_v16  ;;  %v5664_v12 = vld [vmem:[#allocation161_spill] sm:$0xff] }
 0x520   :  { %1147 = vmatprep.subr.mxu1 %v5656_v31  ;;  %2283 = vtanh.f32 %v1095_v22  ;;  %v5666_v31 = vld [vmem:[#allocation163_spill] sm:$0xff]  ;;  %v5681_v16 = vld [vmem:[#allocation49_spill] sm:$0xff] }
 0x521   :  { %1148 = vmatpush2.msra.mxu1 %v5657_v24  ;;  %v5667_v24 = vld [vmem:[#allocation164_spill] sm:$0xff] }
 0x522   :  { %1149 = vmatprep.subr.mxu1 %v5658_v7  ;;  %v5668_v7 = vld [vmem:[#allocation165_spill] sm:$0xff] }
 0x523   :  { %1150 = vmatpush2.msra.mxu1 %v5659_v8  ;;  %v5669_v8 = vld [vmem:[#allocation166_spill] sm:$0xff] }
 0x524   :  { %1151 = vmatprep.subr.mxu1 %v5660_v23  ;;  %v5670_v23 = vld [vmem:[#allocation167_spill] sm:$0xff] }
 0x525   :  { %1152 = vmatpush2.msra.mxu1 %v5661_v11 }
 0x526   :  { %1153 = vmatprep.subr.mxu1 %v5662_v9  ;;  %v5671_v9 = vld [vmem:[#allocation168_spill] sm:$0xff] }
 0x527   :  { %1154 = vmatpush2.msra.mxu1 %v5663_v19  ;;  %v5679_v19 = vld [vmem:[#allocation51_spill] sm:$0xff] }
 0x528   :  { %1155 = vmatprep.subr.mxu1 %v5664_v12  ;;  %v5672_v12 = vld [vmem:[#allocation58_spill] sm:$0xff] }
 0x529   :  { %1156 = vmatpush2.msra.mxu1 %v5665_v56  ;;  %v5673_v56 = vld [vmem:[#allocation57_spill] sm:$0xff] }
 0x52a   :  { %1157 = vmatprep.subr.mxu1 %v5666_v31  ;;  %v5675_v31 = vld [vmem:[#allocation55_spill] sm:$0xff] }
 0x52b   :  { %1158 = vmatpush2.msra.mxu1 %v5667_v24  ;;  %v5674_v24 = vld [vmem:[#allocation56_spill] sm:$0xff] }
 0x52c   :  { %v2282_v22 = vpop.eup %2281  ;;  %1159 = vmatprep.subr.mxu1 %v5668_v7  ;;  %v5676_v7 = vld [vmem:[#allocation54_spill] sm:$0xff] }
 0x52d   :  { %1160 = vmatpush2.msra.mxu1 %v5669_v8  ;;  %1163 = vmatprep.mubr.f32.mxu1 %v2282_v22  ;;  %v3968_v11 = vpop.eup %2283  ;;  %v5677_v8 = vld [vmem:[#allocation53_spill] sm:$0xff] }
 0x52e   :  { %1161 = vmatprep.subr.mxu1 %v5670_v23  ;;  %v5678_v23 = vld [vmem:[#allocation52_spill] sm:$0xff] }
 0x52f   :  { %1162 = vmatpush2.msra.mxu1 %v5671_v9  ;;  %v5680_v9 = vld [vmem:[#allocation50_spill] sm:$0xff] }
 0x530   :  { %1164 = vmatmul.mubr.f32.vlgmr.msra.gmra.mxu1 %v3968_v11  ;;  %1245 = vmatprep.subr.mxu1 %v5672_v12  ;;  %v5682_v12 = vld [vmem:[#allocation48_spill] sm:$0xff] }
 0x531   :  { %1246 = vmatpush1.msra.mxu1 %v5673_v56  ;;  %1309 = vmatprep.mubr.f32.mxu1 %v2282_v22  ;;  %v5683_v56 = vld [vmem:[#allocation47_spill] sm:$0xff]  ;;  %v5684_v22 = vld [vmem:[#allocation46_spill] sm:$0xff] }
 0x532   :  { %1247 = vmatprep.subr.mxu1 %v5674_v24  ;;  %v5685_v24 = vld [vmem:[#allocation45_spill] sm:$0xff] }
 0x533   :  { %1248 = vmatpush1.msra.mxu1 %v5675_v31  ;;  %v5686_v31 = vld [vmem:[#allocation44_spill] sm:$0xff] }
 0x534   :  { %1249 = vmatprep.subr.mxu1 %v5676_v7  ;;  %v5687_v7 = vld [vmem:[#allocation43_spill] sm:$0xff] }
 0x535   :  { %1250 = vmatpush1.msra.mxu1 %v5677_v8  ;;  %v5688_v8 = vld [vmem:[#allocation42_spill] sm:$0xff] }
 0x536   :  { %1251 = vmatprep.subr.mxu1 %v5678_v23  ;;  %v5689_v23 = vld [vmem:[#allocation41_spill] sm:$0xff] }
 0x537   :  { %1252 = vmatpush1.msra.mxu1 %v5679_v19  ;;  %v5690_v19 = vld [vmem:[#allocation40_spill] sm:$0xff] }
 0x538   :  { %1253 = vmatprep.subr.mxu1 %v5680_v9  ;;  %v5691_v9 = vld [vmem:[#allocation39_spill] sm:$0xff] }
 0x539   :  { %1254 = vmatpush1.msra.mxu1 %v5681_v16  ;;  %v5692_v16 = vld [vmem:[#allocation38_spill] sm:$0xff] }
 0x53a   :  { %1255 = vmatprep.subr.mxu1 %v5682_v12  ;;  %v5693_v12 = vld [vmem:[#allocation37_spill] sm:$0xff] }
 0x53b   :  { %1256 = vmatpush1.msra.mxu1 %v5683_v56  ;;  %v5694_v56 = vld [vmem:[#allocation36_spill] sm:$0xff] }
 0x53c   :  { %1257 = vmatprep.subr.mxu1 %v5684_v22  ;;  %v5695_v22 = vld [vmem:[#allocation35_spill] sm:$0xff] }
 0x53d   :  { %1258 = vmatpush1.msra.mxu1 %v5685_v24  ;;  %v5696_v24 = vld [vmem:[#allocation34_spill] sm:$0xff] }
 0x53e   :  { %1259 = vmatprep.subr.mxu1 %v5686_v31  ;;  %v5697_v31 = vld [vmem:[#allocation33_spill] sm:$0xff] }
 0x53f   :  { %1260 = vmatpush1.msra.mxu1 %v5687_v7  ;;  %v5698_v7 = vld [vmem:[#allocation32_spill] sm:$0xff] }
 0x540   :  { %1261 = vmatprep.subr.mxu1 %v5688_v8  ;;  %v5699_v8 = vld [vmem:[#allocation31_spill] sm:$0xff] }
 0x541   :  { %1262 = vmatpush1.msra.mxu1 %v5689_v23  ;;  %v5700_v23 = vld [vmem:[#allocation30_spill] sm:$0xff] }
 0x542   :  { %1263 = vmatprep.subr.mxu1 %v5690_v19  ;;  %v5701_v19 = vld [vmem:[#allocation29_spill] sm:$0xff] }
 0x543   :  { %1264 = vmatpush1.msra.mxu1 %v5691_v9  ;;  %v5702_v9 = vld [vmem:[#allocation28_spill] sm:$0xff] }
 0x544   :  { %1265 = vmatprep.subr.mxu1 %v5692_v16  ;;  %v5703_v16 = vld [vmem:[#allocation27_spill] sm:$0xff] }
 0x545   :  { %1266 = vmatpush1.msra.mxu1 %v5693_v12  ;;  %v5704_v12 = vld [vmem:[#allocation90_spill] sm:$0xff] }
 0x546   :  { %1267 = vmatprep.subr.mxu1 %v5694_v56  ;;  %v5705_v56 = vld [vmem:[#allocation89_spill] sm:$0xff] }
 0x547   :  { %1268 = vmatpush1.msra.mxu1 %v5695_v22  ;;  %v5706_v22 = vld [vmem:[#allocation88_spill] sm:$0xff] }
 0x548   :  { %1269 = vmatprep.subr.mxu1 %v5696_v24  ;;  %v5707_v24 = vld [vmem:[#allocation87_spill] sm:$0xff] }
 0x549   :  { %1270 = vmatpush1.msra.mxu1 %v5697_v31  ;;  %v5708_v31 = vld [vmem:[#allocation86_spill] sm:$0xff] }
 0x54a   :  { %1271 = vmatprep.subr.mxu1 %v5698_v7  ;;  %v5709_v7 = vld [vmem:[#allocation85_spill] sm:$0xff] }
 0x54b   :  { %1272 = vmatpush1.msra.mxu1 %v5699_v8  ;;  %v5710_v8 = vld [vmem:[#allocation84_spill] sm:$0xff] }
 0x54c   :  { %1273 = vmatprep.subr.mxu1 %v5700_v23  ;;  %v5711_v23 = vld [vmem:[#allocation83_spill] sm:$0xff] }
 0x54d   :  { %1274 = vmatpush1.msra.mxu1 %v5701_v19  ;;  %v5712_v19 = vld [vmem:[#allocation82_spill] sm:$0xff] }
 0x54e   :  { %1275 = vmatprep.subr.mxu1 %v5702_v9  ;;  %v5713_v9 = vld [vmem:[#allocation81_spill] sm:$0xff] }
 0x54f   :  { %1276 = vmatpush1.msra.mxu1 %v5703_v16 }
 0x550   :  { %1277 = vmatprep.subr.mxu1 %v5704_v12 }
 0x551   :  { %1278 = vmatpush2.msra.mxu1 %v5705_v56 }
 0x552   :  { %1279 = vmatprep.subr.mxu1 %v5706_v22 }
 0x553   :  { %1280 = vmatpush2.msra.mxu1 %v5707_v24 }
 0x554   :  { %1281 = vmatprep.subr.mxu1 %v5708_v31 }
 0x555   :  { %1282 = vmatpush2.msra.mxu1 %v5709_v7 }
 0x556   :  { %1283 = vmatprep.subr.mxu1 %v5710_v8 }
 0x557   :  { %1284 = vmatpush2.msra.mxu1 %v5711_v23 }
 0x558   :  { %1285 = vmatprep.subr.mxu1 %v5712_v19 }
 0x559   :  { %1286 = vmatpush2.msra.mxu1 %v5713_v9 }
 0x55a   :  { %1287 = vmatprep.subr.mxu1 %v5570_v37 }
 0x55b   :  { %1288 = vmatpush2.msra.mxu1 %v5571_v18  ;;  %v5714_v18 = vld [vmem:[#allocation68_spill] sm:$0xff] }
 0x55c   :  { %1289 = vmatprep.subr.mxu1 %v5572_v62 }
 0x55d   :  { %1290 = vmatpush2.msra.mxu1 %v5573_v14  ;;  %v5715_v14 = vld [vmem:[#allocation66_spill] sm:$0xff] }
 0x55e   :  { %1291 = vmatprep.subr.mxu1 %v5574_v15 }
 0x55f   :  { %1292 = vmatpush2.msra.mxu1 %v5575_v17  ;;  %v5716_v17 = vld [vmem:[#allocation64_spill] sm:$0xff] }
 0x560   :  { %1293 = vmatprep.subr.mxu1 %v5576_v52 }
 0x561   :  { %1294 = vmatpush2.msra.mxu1 %v5577_v32  ;;  %v5717_v32 = vld [vmem:[#allocation62_spill] sm:$0xff] }
 0x562   :  { %1295 = vmatprep.subr.mxu1 %v5578_v5 }
 0x563   :  { %1296 = vmatpush2.msra.mxu1 %v5579_v6  ;;  %v5718_v6 = vld [vmem:[#allocation60_spill] sm:$0xff] }
 0x564   :  { %1297 = vmatprep.subr.mxu1 %v5580_v61 }
 0x565   :  { %1298 = vmatpush2.msra.mxu1 %v5437_v53 }
 0x566   :  { %1299 = vmatprep.subr.mxu1 %v5714_v18  ;;  %v5719_v18 = vld [vmem:[#allocation177_spill] sm:$0xff] }
 0x567   :  { %1300 = vmatpush2.msra.mxu1 %v5439_v30  ;;  %v5720_v30 = vld [vmem:[#allocation179_spill] sm:$0xff] }
 0x568   :  { %1301 = vmatprep.subr.mxu1 %v5715_v14  ;;  %v5721_v14 = vld [vmem:[#allocation180_spill] sm:$0xff] }
 0x569   :  { %1302 = vmatpush2.msra.mxu1 %v5441_v27  ;;  %v5722_v27 = vld [vmem:[#allocation181_spill] sm:$0xff] }
 0x56a   :  { %1303 = vmatprep.subr.mxu1 %v5716_v17  ;;  %v5723_v17 = vld [vmem:[#allocation182_spill] sm:$0xff] }
 0x56b   :  { %1304 = vmatpush2.msra.mxu1 %v5443_v20  ;;  %v5724_v20 = vld [vmem:[#allocation95_spill] sm:$0xff] }
 0x56c   :  { %1305 = vmatprep.subr.mxu1 %v5717_v32  ;;  %v5725_v32 = vld [vmem:[#allocation96_spill] sm:$0xff] }
 0x56d   :  { %1306 = vmatpush2.msra.mxu1 %v5445_v25  ;;  %v5726_v25 = vld [vmem:[#allocation69_spill] sm:$0xff] }
 0x56e   :  { %1307 = vmatprep.subr.mxu1 %v5718_v6  ;;  %v5727_v6 = vld [vmem:[#allocation171_spill] sm:$0xff] }
 0x56f   :  { %1308 = vmatpush2.msra.mxu1 %v5447_v49  ;;  %v5728_v49 = vld [vmem:[#allocation172_spill] sm:$0xff] }
 0x570   :  { %1310 = vmatmul.mubr.f32.vlgmr.msra.gmra.mxu1 %v3968_v11  ;;  %1395 = vmatprep.subr.mxu1 %v5719_v18  ;;  %v5729_v11 = vld [vmem:[#allocation173_spill] sm:$0xff]  ;;  %v5730_v18 = vld [vmem:[#allocation174_spill] sm:$0xff] }
 0x571   :  { %1396 = vmatpush1.msra.mxu1 %v5720_v30  ;;  %v5731_v30 = vld [vmem:[#allocation175_spill] sm:$0xff] }
 0x572   :  { %1397 = vmatprep.subr.mxu1 %v5721_v14  ;;  %v5732_v14 = vld [vmem:[#allocation176_spill] sm:$0xff] }
 0x573   :  { %1398 = vmatpush1.msra.mxu1 %v5722_v27  ;;  %v5733_v27 = vld [vmem:[#allocation178_spill] sm:$0xff] }
 0x574   :  { %1399 = vmatprep.subr.mxu1 %v5723_v17  ;;  %v5734_v17 = vld [vmem:[#allocation183_spill] sm:$0xff] }
 0x575   :  { %1400 = vmatpush1.msra.mxu1 %v5724_v20  ;;  %v5735_v20 = vld [vmem:[#allocation184_spill] sm:$0xff] }
 0x576   :  { %1401 = vmatprep.subr.mxu1 %v5725_v32  ;;  %v5736_v32 = vld [vmem:[#allocation185_spill] sm:$0xff] }
 0x577   :  { %1402 = vmatpush1.msra.mxu1 %v5726_v25  ;;  %v5737_v25 = vld [vmem:[#allocation186_spill] sm:$0xff] }
 0x578   :  { %1403 = vmatprep.subr.mxu1 %v5727_v6  ;;  %v5738_v6 = vld [vmem:[#allocation187_spill] sm:$0xff] }
 0x579   :  { %1404 = vmatpush1.msra.mxu1 %v5728_v49  ;;  %v5739_v49 = vld [vmem:[#allocation188_spill] sm:$0xff] }
 0x57a   :  { %1405 = vmatprep.subr.mxu1 %v5729_v11  ;;  %v5740_v11 = vld [vmem:[#allocation105_spill] sm:$0xff] }
 0x57b   :  { %1406 = vmatpush1.msra.mxu1 %v5730_v18  ;;  %v5741_v18 = vld [vmem:[#allocation169_spill] sm:$0xff] }
 0x57c   :  { %1407 = vmatprep.subr.mxu1 %v5731_v30  ;;  %v5742_v30 = vld [vmem:[#allocation170_spill] sm:$0xff] }
 0x57d   :  { %1408 = vmatpush1.msra.mxu1 %v5732_v14  ;;  %v5743_v14 = vld [vmem:[#allocation106_spill] sm:$0xff] }
 0x57e   :  { %1409 = vmatprep.subr.mxu1 %v5733_v27  ;;  %v5744_v27 = vld [vmem:[#allocation107_spill] sm:$0xff] }
 0x57f   :  { %1410 = vmatpush1.msra.mxu1 %v5734_v17  ;;  %v5745_v17 = vld [vmem:[#allocation108_spill] sm:$0xff] }
 0x580   :  { %1411 = vmatprep.subr.mxu1 %v5735_v20  ;;  %v5746_v20 = vld [vmem:[#allocation109_spill] sm:$0xff] }
 0x581   :  { %1412 = vmatpush1.msra.mxu1 %v5736_v32  ;;  %v5747_v32 = vld [vmem:[#allocation110_spill] sm:$0xff] }
 0x582   :  { %1413 = vmatprep.subr.mxu1 %v5737_v25  ;;  %v5748_v25 = vld [vmem:[#allocation111_spill] sm:$0xff] }
 0x583   :  { %1414 = vmatpush1.msra.mxu1 %v5738_v6  ;;  %v5749_v6 = vld [vmem:[#allocation112_spill] sm:$0xff] }
 0x584   :  { %1415 = vmatprep.subr.mxu1 %v5739_v49  ;;  %v5750_v49 = vld [vmem:[#allocation113_spill] sm:$0xff] }
 0x585   :  { %1416 = vmatpush1.msra.mxu1 %v5740_v11  ;;  %v5751_v11 = vld [vmem:[#allocation114_spill] sm:$0xff] }
 0x586   :  { %1417 = vmatprep.subr.mxu1 %v5741_v18  ;;  %v5752_v18 = vld [vmem:[#allocation115_spill] sm:$0xff] }
 0x587   :  { %1418 = vmatpush1.msra.mxu1 %v5742_v30  ;;  %v5753_v30 = vld [vmem:[#allocation116_spill] sm:$0xff] }
 0x588   :  { %1419 = vmatprep.subr.mxu1 %v5743_v14  ;;  %v5754_v14 = vld [vmem:[#allocation117_spill] sm:$0xff] }
 0x589   :  { %1420 = vmatpush1.msra.mxu1 %v5744_v27  ;;  %v5755_v27 = vld [vmem:[#allocation118_spill] sm:$0xff] }
 0x58a   :  { %1421 = vmatprep.subr.mxu1 %v5745_v17  ;;  %v5756_v17 = vld [vmem:[#allocation119_spill] sm:$0xff] }
 0x58b   :  { %1422 = vmatpush1.msra.mxu1 %v5746_v20  ;;  %v5757_v20 = vld [vmem:[#allocation120_spill] sm:$0xff] }
 0x58c   :  { %1423 = vmatprep.subr.mxu1 %v5747_v32  ;;  %v5758_v32 = vld [vmem:[#allocation121_spill] sm:$0xff] }
 0x58d   :  { %1424 = vmatpush1.msra.mxu1 %v5748_v25  ;;  %v5759_v25 = vld [vmem:[#allocation122_spill] sm:$0xff] }
 0x58e   :  { %1425 = vmatprep.subr.mxu1 %v5749_v6  ;;  %v5760_v6 = vld [vmem:[#allocation123_spill] sm:$0xff] }
 0x58f   :  { %1426 = vmatpush1.msra.mxu1 %v5750_v49  ;;  %v5761_v49 = vld [vmem:[#allocation124_spill] sm:$0xff] }
 0x590   :  { %1427 = vmatprep.subr.mxu1 %v5751_v11  ;;  %v5762_v11 = vld [vmem:[#allocation125_spill] sm:$0xff] }
 0x591   :  { %1428 = vmatpush2.msra.mxu1 %v5752_v18  ;;  %v5763_v18 = vld [vmem:[#allocation92_spill] sm:$0xff] }
 0x592   :  { %1429 = vmatprep.subr.mxu1 %v5753_v30 }
 0x593   :  { %1430 = vmatpush2.msra.mxu1 %v5754_v14 }
 0x594   :  { %1431 = vmatprep.subr.mxu1 %v5755_v27 }
 0x595   :  { %1432 = vmatpush2.msra.mxu1 %v5756_v17 }
 0x596   :  { %1433 = vmatprep.subr.mxu1 %v5757_v20 }
 0x597   :  { %1434 = vmatpush2.msra.mxu1 %v5758_v32 }
 0x598   :  { %1435 = vmatprep.subr.mxu1 %v5759_v25  ;;  %v4088_v25 = vld [vmem:[#allocation3 + $0x160] sm:$0xff] }
 0x599   :  { %1436 = vmatpush2.msra.mxu1 %v5760_v6  ;;  %5764 = vst [vmem:[#allocation94_spill] sm:$0xff] %v4088_v25 }
 0x59a   :  { %1437 = vmatprep.subr.mxu1 %v5761_v49  ;;  %v4091_v49 = vld [vmem:[#allocation3 + $0x158] sm:$0xff] }
 0x59b   :  { %1438 = vmatpush2.msra.mxu1 %v5762_v11  ;;  %5765 = vst [vmem:[#allocation93_spill] sm:$0xff] %v4091_v49 }
 0x59c   :  { %1439 = vmatprep.subr.mxu1 %v5763_v18  ;;  %v4094_v18 = vld [vmem:[#allocation3 + $0x150] sm:$0xff] }
 0x59d   :  { %1440 = vmatpush2.msra.mxu1 %v3870_v28  ;;  %5766 = vst [vmem:[#allocation27_spill] sm:$0xff] %v4094_v18 }
 0x59e   :  { %1441 = vmatprep.subr.mxu1 %v3873_v26  ;;  %v4097_v26 = vld [vmem:[#allocation3 + $0x148] sm:$0xff] }
 0x59f   :  { %1442 = vmatpush2.msra.mxu1 %v3876_v58  ;;  %5767 = vst [vmem:[#allocation116_spill] sm:$0xff] %v4097_v26 }
 0x5a0   :  { %1443 = vmatprep.subr.mxu1 %v3879_v55  ;;  %v4100_v55 = vld [vmem:[#allocation3 + $0x140] sm:$0xff] }
 0x5a1   :  { %1444 = vmatpush2.msra.mxu1 %v3882_v50  ;;  %5768 = vst [vmem:[#allocation117_spill] sm:$0xff] %v4100_v55 }
 0x5a2   :  { %1445 = vmatprep.subr.mxu1 %v3885_v21  ;;  %v4103_v21 = vld [vmem:[#allocation3 + $0x138] sm:$0xff] }
 0x5a3   :  { %1446 = vmatpush2.msra.mxu1 %v4088_v25  ;;  %5769 = vst [vmem:[#allocation118_spill] sm:$0xff] %v4103_v21  ;;  %v4106_v25 = vld [vmem:[#allocation3 + $0x130] sm:$0xff] }
 0x5a4   :  { %1447 = vmatprep.subr.mxu1 %v4091_v49  ;;  %5770 = vst [vmem:[#allocation119_spill] sm:$0xff] %v4106_v25  ;;  %v4109_v49 = vld [vmem:[#allocation3 + $0x128] sm:$0xff] }
 0x5a5   :  { %1448 = vmatpush2.msra.mxu1 %v4094_v18  ;;  %5771 = vst [vmem:[#allocation120_spill] sm:$0xff] %v4109_v49  ;;  %v4112_v18 = vld [vmem:[#allocation3 + $0x120] sm:$0xff] }
 0x5a6   :  { %1449 = vmatprep.subr.mxu1 %v4097_v26  ;;  %5772 = vst [vmem:[#allocation121_spill] sm:$0xff] %v4112_v18  ;;  %v4115_v26 = vld [vmem:[#allocation3 + $0x118] sm:$0xff] }
 0x5a7   :  { %1450 = vmatpush2.msra.mxu1 %v4100_v55  ;;  %5773 = vst [vmem:[#allocation191_spill] sm:$0xff] %v4115_v26  ;;  %v4118_v55 = vld [vmem:[#allocation3 + $0x110] sm:$0xff] }
 0x5a8   :  { %1451 = vmatprep.subr.mxu1 %v4103_v21  ;;  %5774 = vst [vmem:[#allocation192_spill] sm:$0xff] %v4118_v55  ;;  %v4121_v21 = vld [vmem:[#allocation3 + $0x108] sm:$0xff] }
 0x5a9   :  { %1452 = vmatpush2.msra.mxu1 %v4106_v25  ;;  %5775 = vst [vmem:[#allocation193_spill] sm:$0xff] %v4121_v21  ;;  %v4124_v25 = vld [vmem:[#allocation3 + $0x100] sm:$0xff] }
 0x5aa   :  { %1453 = vmatprep.subr.mxu1 %v4109_v49 }
 0x5ab   :  { %1454 = vmatpush2.msra.mxu1 %v4112_v18 }
 0x5ac   :  { %1455 = vmatprep.subr.mxu1 %v4115_v26 }
 0x5ad   :  { %1456 = vmatpush2.msra.mxu1 %v4118_v55 }
 0x5ae   :  { %1457 = vmatprep.subr.mxu1 %v4121_v21 }
 0x5af   :  { %1458 = vmatpush2.msra.mxu1 %v4124_v25 }
 0x5b0   :  { %1541 = vmatprep.subr.mxu1 %v5461_v13  ;;  %v1019_v49 = vpop.f32.mrf.mxu1 }
 0x5b2   :  { %v1021_v18 = vpop.f32.mrf.mxu1 }
 0x5f0   :  { %v1165_v50 = vpop.f32.mrf.mxu1 }
 0x5f1   :  { %v1166_v58 = vadd.f32 %v1165_v50, %v1019_v49  ;;  %v5779_v49 = vld [vmem:[#allocation132_spill] sm:$0xff]  ;;  %v5781_v50 = vld [vmem:[#allocation134_spill] sm:$0xff] }
 0x5f2   :  { %v1167_v28 = vpop.f32.mrf.mxu1 }
 0x5f3   :  { %v1168_v26 = vadd.f32 %v1167_v28, %v1021_v18  ;;  %v1170_v11 = vadd.f32 %v1166_v58, %v5462_v34  ;;  %v5777_v28 = vld [vmem:[#allocation130_spill] sm:$0xff]  ;;  %v5783_v18 = vld [vmem:[#allocation136_spill] sm:$0xff]  ;;  %v5784_v58 = vld [vmem:[#allocation137_spill] sm:$0xff] }
 0x5f5   :  { %v1171_v55 = vadd.f32 %v1168_v26, %v5463_v57  ;;  %v5778_v26 = vld [vmem:[#allocation131_spill] sm:$0xff] }
 0x5f7   :  { %2285 = vtanh.f32 %v1171_v55  ;;  %v5780_v55 = vld [vmem:[#allocation133_spill] sm:$0xff] }
 0x5f8   :  { %2287 = vtanh.f32 %v1170_v11  ;;  %v5785_v11 = vld [vmem:[#allocation138_spill] sm:$0xff] }
 0x604   :  { %v2286_v6 = vpop.eup %2285 }
 0x605   :  { %v2288_v21 = vpop.eup %2287  ;;  %1238 = vmatprep.mubr.f32.mxu0 %v2286_v6  ;;  %v5782_v6 = vld [vmem:[#allocation135_spill] sm:$0xff] }
 0x606   :  { %1239 = vmatmul.mubr.f32.vlgmr.msra.gmra.mxu0 %v2288_v21  ;;  %v5776_v21 = vld [vmem:[#allocation129_spill] sm:$0xff] }
 0x607   :  { %1321 = vmatpush1.msra.mxu0 %v5464_v63 }
 0x608   :  { %1322 = vmatprep.subr.mxu0 %v5465_v33 }
 0x609   :  { %1323 = vmatpush1.msra.mxu0 %v5466_v36 }
 0x60a   :  { %1324 = vmatprep.subr.mxu0 %v5467_v40 }
 0x60b   :  { %1325 = vmatpush1.msra.mxu0 %v5468_v35 }
 0x60c   :  { %1326 = vmatprep.subr.mxu0 %v5469_v51 }
 0x60d   :  { %1327 = vmatpush1.msra.mxu0 %v5470_v42 }
 0x60e   :  { %1328 = vmatprep.subr.mxu0 %v5471_v39 }
 0x60f   :  { %1329 = vmatpush1.msra.mxu0 %v5472_v46 }
 0x610   :  { %1330 = vmatprep.subr.mxu0 %v5473_v59 }
 0x611   :  { %1331 = vmatpush1.msra.mxu0 %v5474_v43 }
 0x612   :  { %1332 = vmatprep.subr.mxu0 %v5475_v41 }
 0x613   :  { %1333 = vmatpush1.msra.mxu0 %v5476_v60 }
 0x614   :  { %1334 = vmatprep.subr.mxu0 %v5477_v45 }
 0x615   :  { %1335 = vmatpush1.msra.mxu0 %v5478_v38 }
 0x616   :  { %1336 = vmatprep.subr.mxu0 %v5479_v48 }
 0x617   :  { %1337 = vmatpush1.msra.mxu0 %v5480_v54 }
 0x618   :  { %1338 = vmatprep.subr.mxu0 %v5481_v47 }
 0x619   :  { %1339 = vmatpush1.msra.mxu0 %v5482_v44 }
 0x61a   :  { %1340 = vmatprep.subr.mxu0 %v5483_v0 }
 0x61b   :  { %1341 = vmatpush1.msra.mxu0 %v5484_v1 }
 0x61c   :  { %1342 = vmatprep.subr.mxu0 %v5485_v2 }
 0x61d   :  { %1343 = vmatpush1.msra.mxu0 %v5632_v10  ;;  %v5786_v10 = vld [vmem:[#allocation139_spill] sm:$0xff] }
 0x61e   :  { %1344 = vmatprep.subr.mxu0 %v5776_v21  ;;  %v5787_v21 = vld [vmem:[#allocation140_spill] sm:$0xff] }
 0x61f   :  { %1345 = vmatpush1.msra.mxu0 %v5777_v28  ;;  %v5788_v28 = vld [vmem:[#allocation141_spill] sm:$0xff] }
 0x620   :  { %1346 = vmatprep.subr.mxu0 %v5778_v26  ;;  %v5789_v26 = vld [vmem:[#allocation142_spill] sm:$0xff] }
 0x621   :  { %1347 = vmatpush1.msra.mxu0 %v5779_v49  ;;  %v5790_v49 = vld [vmem:[#allocation143_spill] sm:$0xff] }
 0x622   :  { %1348 = vmatprep.subr.mxu0 %v5780_v55  ;;  %v5796_v55 = vld [vmem:[#allocation100_spill] sm:$0xff] }
 0x623   :  { %1349 = vmatpush1.msra.mxu0 %v5781_v50  ;;  %v5791_v50 = vld [vmem:[#allocation145_spill] sm:$0xff] }
 0x624   :  { %1350 = vmatprep.subr.mxu0 %v5782_v6  ;;  %v5792_v6 = vld [vmem:[#allocation146_spill] sm:$0xff] }
 0x625   :  { %1351 = vmatpush1.msra.mxu0 %v5783_v18  ;;  %v5793_v18 = vld [vmem:[#allocation147_spill] sm:$0xff] }
 0x626   :  { %1352 = vmatprep.subr.mxu0 %v5784_v58 }
 0x627   :  { %1353 = vmatpush2.msra.mxu0 %v5785_v11  ;;  %v5794_v11 = vld [vmem:[#allocation148_spill] sm:$0xff] }
 0x628   :  { %1354 = vmatprep.subr.mxu0 %v5786_v10  ;;  %v5795_v10 = vld [vmem:[#allocation149_spill] sm:$0xff] }
 0x629   :  { %1355 = vmatpush2.msra.mxu0 %v5787_v21 }
 0x62a   :  { %1356 = vmatprep.subr.mxu0 %v5788_v28 }
 0x62b   :  { %1357 = vmatpush2.msra.mxu0 %v5789_v26  ;;  %v5797_v26 = vld [vmem:[#allocation99_spill] sm:$0xff] }
 0x62c   :  { %1358 = vmatprep.subr.mxu0 %v5790_v49 }
 0x62d   :  { %1359 = vmatpush2.msra.mxu0 %v5648_v29  ;;  %v5803_v29 = vld [vmem:[#allocation157_spill] sm:$0xff] }
 0x62e   :  { %1360 = vmatprep.subr.mxu0 %v5791_v50  ;;  %v5798_v50 = vld [vmem:[#allocation152_spill] sm:$0xff] }
 0x62f   :  { %1361 = vmatpush2.msra.mxu0 %v5792_v6  ;;  %v5799_v6 = vld [vmem:[#allocation153_spill] sm:$0xff] }
 0x630   :  { %1362 = vmatprep.subr.mxu0 %v5793_v18  ;;  %v1311_v58 = vpop.f32.mrf.mxu1  ;;  %v5800_v18 = vld [vmem:[#allocation154_spill] sm:$0xff] }
 0x631   :  { %1363 = vmatpush2.msra.mxu0 %v5794_v11  ;;  %v1316_v49 = vadd.f32 %v1311_v58, %v5797_v26  ;;  %v5801_v11 = vld [vmem:[#allocation155_spill] sm:$0xff]  ;;  %v5806_v26 = vld [vmem:[#allocation160_spill] sm:$0xff]  ;;  %v5808_v58 = vld [vmem:[#allocation162_spill] sm:$0xff] }
 0x632   :  { %1364 = vmatprep.subr.mxu0 %v5795_v10  ;;  %v1313_v21 = vpop.f32.mrf.mxu1  ;;  %v5802_v10 = vld [vmem:[#allocation156_spill] sm:$0xff] }
 0x633   :  { %v1317_v28 = vadd.f32 %v1313_v21, %v5796_v55  ;;  %1365 = vmatpush2.msra.mxu0 %v5509_v4  ;;  %v5804_v21 = vld [vmem:[#allocation158_spill] sm:$0xff]  ;;  %v5805_v55 = vld [vmem:[#allocation159_spill] sm:$0xff] }
 0x634   :  { %1366 = vmatprep.subr.mxu0 %v5511_v3 }
 0x635   :  { %2289 = vtanh.f32 %v1317_v28  ;;  %1367 = vmatpush2.msra.mxu0 %v5798_v50  ;;  %v5807_v28 = vld [vmem:[#allocation161_spill] sm:$0xff] }
 0x636   :  { %1368 = vmatprep.subr.mxu0 %v5799_v6  ;;  %2291 = vtanh.f32 %v1316_v49  ;;  %v5809_v6 = vld [vmem:[#allocation163_spill] sm:$0xff]  ;;  %v5824_v50 = vld [vmem:[#allocation49_spill] sm:$0xff] }
 0x637   :  { %1369 = vmatpush2.msra.mxu0 %v5800_v18  ;;  %v5810_v18 = vld [vmem:[#allocation164_spill] sm:$0xff] }
 0x638   :  { %1370 = vmatprep.subr.mxu0 %v5801_v11  ;;  %v5811_v11 = vld [vmem:[#allocation165_spill] sm:$0xff] }
 0x639   :  { %1371 = vmatpush2.msra.mxu0 %v5802_v10  ;;  %v5812_v10 = vld [vmem:[#allocation166_spill] sm:$0xff] }
 0x63a   :  { %1372 = vmatprep.subr.mxu0 %v5803_v29  ;;  %v5813_v29 = vld [vmem:[#allocation167_spill] sm:$0xff] }
 0x63b   :  { %1373 = vmatpush2.msra.mxu0 %v5804_v21 }
 0x63c   :  { %1374 = vmatprep.subr.mxu0 %v5805_v55  ;;  %v5814_v55 = vld [vmem:[#allocation168_spill] sm:$0xff] }
 0x63d   :  { %1375 = vmatpush2.msra.mxu0 %v5806_v26  ;;  %v5822_v26 = vld [vmem:[#allocation51_spill] sm:$0xff] }
 0x63e   :  { %1376 = vmatprep.subr.mxu0 %v5807_v28  ;;  %v5815_v28 = vld [vmem:[#allocation58_spill] sm:$0xff] }
 0x63f   :  { %1377 = vmatpush2.msra.mxu0 %v5808_v58  ;;  %v5816_v58 = vld [vmem:[#allocation57_spill] sm:$0xff] }
 0x640   :  { %1378 = vmatprep.subr.mxu0 %v5809_v6  ;;  %v5818_v6 = vld [vmem:[#allocation55_spill] sm:$0xff] }
 0x641   :  { %1379 = vmatpush2.msra.mxu0 %v5810_v18  ;;  %v5817_v18 = vld [vmem:[#allocation56_spill] sm:$0xff] }
 0x642   :  { %v2290_v49 = vpop.eup %2289  ;;  %1380 = vmatprep.subr.mxu0 %v5811_v11  ;;  %v5819_v11 = vld [vmem:[#allocation54_spill] sm:$0xff] }
 0x643   :  { %1381 = vmatpush2.msra.mxu0 %v5812_v10  ;;  %1384 = vmatprep.mubr.f32.mxu0 %v2290_v49  ;;  %v4194_v21 = vpop.eup %2291  ;;  %v5820_v10 = vld [vmem:[#allocation53_spill] sm:$0xff] }
 0x644   :  { %1382 = vmatprep.subr.mxu0 %v5813_v29  ;;  %v5821_v29 = vld [vmem:[#allocation52_spill] sm:$0xff] }
 0x645   :  { %1383 = vmatpush2.msra.mxu0 %v5814_v55  ;;  %v5823_v55 = vld [vmem:[#allocation50_spill] sm:$0xff] }
 0x646   :  { %1385 = vmatmul.mubr.f32.vlgmr.msra.gmra.mxu0 %v4194_v21  ;;  %1466 = vmatprep.subr.mxu0 %v5815_v28  ;;  %v5825_v28 = vld [vmem:[#allocation48_spill] sm:$0xff] }
 0x647   :  { %1467 = vmatpush1.msra.mxu0 %v5816_v58  ;;  %1530 = vmatprep.mubr.f32.mxu0 %v2290_v49  ;;  %v5826_v58 = vld [vmem:[#allocation47_spill] sm:$0xff]  ;;  %v5827_v49 = vld [vmem:[#allocation46_spill] sm:$0xff] }
 0x648   :  { %1468 = vmatprep.subr.mxu0 %v5817_v18  ;;  %v5828_v18 = vld [vmem:[#allocation45_spill] sm:$0xff] }
 0x649   :  { %1469 = vmatpush1.msra.mxu0 %v5818_v6  ;;  %v5829_v6 = vld [vmem:[#allocation44_spill] sm:$0xff] }
 0x64a   :  { %1470 = vmatprep.subr.mxu0 %v5819_v11  ;;  %v5830_v11 = vld [vmem:[#allocation43_spill] sm:$0xff] }
 0x64b   :  { %1471 = vmatpush1.msra.mxu0 %v5820_v10  ;;  %v5831_v10 = vld [vmem:[#allocation42_spill] sm:$0xff] }
 0x64c   :  { %1472 = vmatprep.subr.mxu0 %v5821_v29  ;;  %v5832_v29 = vld [vmem:[#allocation41_spill] sm:$0xff] }
 0x64d   :  { %1473 = vmatpush1.msra.mxu0 %v5822_v26  ;;  %v5833_v26 = vld [vmem:[#allocation40_spill] sm:$0xff] }
 0x64e   :  { %1474 = vmatprep.subr.mxu0 %v5823_v55  ;;  %v5834_v55 = vld [vmem:[#allocation39_spill] sm:$0xff] }
 0x64f   :  { %1475 = vmatpush1.msra.mxu0 %v5824_v50  ;;  %v5835_v50 = vld [vmem:[#allocation38_spill] sm:$0xff] }
 0x650   :  { %1476 = vmatprep.subr.mxu0 %v5825_v28  ;;  %v5836_v28 = vld [vmem:[#allocation37_spill] sm:$0xff] }
 0x651   :  { %1477 = vmatpush1.msra.mxu0 %v5826_v58  ;;  %v5837_v58 = vld [vmem:[#allocation36_spill] sm:$0xff] }
 0x652   :  { %1478 = vmatprep.subr.mxu0 %v5827_v49  ;;  %v5838_v49 = vld [vmem:[#allocation35_spill] sm:$0xff] }
 0x653   :  { %1479 = vmatpush1.msra.mxu0 %v5828_v18  ;;  %v5839_v18 = vld [vmem:[#allocation34_spill] sm:$0xff] }
 0x654   :  { %1480 = vmatprep.subr.mxu0 %v5829_v6  ;;  %v5840_v6 = vld [vmem:[#allocation33_spill] sm:$0xff] }
 0x655   :  { %1481 = vmatpush1.msra.mxu0 %v5830_v11  ;;  %v5841_v11 = vld [vmem:[#allocation32_spill] sm:$0xff] }
 0x656   :  { %1482 = vmatprep.subr.mxu0 %v5831_v10  ;;  %v5842_v10 = vld [vmem:[#allocation31_spill] sm:$0xff] }
 0x657   :  { %1483 = vmatpush1.msra.mxu0 %v5832_v29  ;;  %v5843_v29 = vld [vmem:[#allocation30_spill] sm:$0xff] }
 0x658   :  { %1484 = vmatprep.subr.mxu0 %v5833_v26  ;;  %v5844_v26 = vld [vmem:[#allocation29_spill] sm:$0xff] }
 0x659   :  { %1485 = vmatpush1.msra.mxu0 %v5834_v55  ;;  %v5845_v55 = vld [vmem:[#allocation28_spill] sm:$0xff] }
 0x65a   :  { %1486 = vmatprep.subr.mxu0 %v5835_v50 }
 0x65b   :  { %1487 = vmatpush1.msra.mxu0 %v5836_v28 }
 0x65c   :  { %1488 = vmatprep.subr.mxu0 %v5837_v58 }
 0x65d   :  { %1489 = vmatpush1.msra.mxu0 %v5838_v49 }
 0x65e   :  { %1490 = vmatprep.subr.mxu0 %v5839_v18 }
 0x65f   :  { %1491 = vmatpush1.msra.mxu0 %v5840_v6 }
 0x660   :  { %1492 = vmatprep.subr.mxu0 %v5841_v11 }
 0x661   :  { %1493 = vmatpush1.msra.mxu0 %v5842_v10 }
 0x662   :  { %1494 = vmatprep.subr.mxu0 %v5843_v29 }
 0x663   :  { %1495 = vmatpush1.msra.mxu0 %v5844_v26 }
 0x664   :  { %1496 = vmatprep.subr.mxu0 %v5845_v55 }
 0x665   :  { %1497 = vmatpush1.msra.mxu0 %v5703_v16 }
 0x666   :  { %1498 = vmatprep.subr.mxu0 %v5704_v12  ;;  %v5846_v12 = vld [vmem:[#allocation79_spill] sm:$0xff] }
 0x667   :  { %1499 = vmatpush2.msra.mxu0 %v5705_v56 }
 0x668   :  { %1500 = vmatprep.subr.mxu0 %v5706_v22  ;;  %v5847_v22 = vld [vmem:[#allocation77_spill] sm:$0xff] }
 0x669   :  { %1501 = vmatpush2.msra.mxu0 %v5707_v24 }
 0x66a   :  { %1502 = vmatprep.subr.mxu0 %v5708_v31  ;;  %v5848_v31 = vld [vmem:[#allocation75_spill] sm:$0xff] }
 0x66b   :  { %1503 = vmatpush2.msra.mxu0 %v5709_v7 }
 0x66c   :  { %1504 = vmatprep.subr.mxu0 %v5710_v8  ;;  %v5849_v8 = vld [vmem:[#allocation73_spill] sm:$0xff] }
 0x66d   :  { %1505 = vmatpush2.msra.mxu0 %v5711_v23 }
 0x66e   :  { %1506 = vmatprep.subr.mxu0 %v5712_v19  ;;  %v5850_v19 = vld [vmem:[#allocation71_spill] sm:$0xff] }
 0x66f   :  { %1507 = vmatpush2.msra.mxu0 %v5713_v9 }
 0x670   :  { %1508 = vmatprep.subr.mxu0 %v5570_v37 }
 0x671   :  { %1509 = vmatpush2.msra.mxu0 %v5846_v12  ;;  %v5851_v12 = vld [vmem:[#allocation68_spill] sm:$0xff] }
 0x672   :  { %1510 = vmatprep.subr.mxu0 %v5572_v62  ;;  %v5852_v62 = vld [vmem:[#allocation67_spill] sm:$0xff] }
 0x673   :  { %1511 = vmatpush2.msra.mxu0 %v5847_v22  ;;  %v5853_v22 = vld [vmem:[#allocation66_spill] sm:$0xff] }
 0x674   :  { %1512 = vmatprep.subr.mxu0 %v5574_v15  ;;  %v5854_v15 = vld [vmem:[#allocation65_spill] sm:$0xff] }
 0x675   :  { %1513 = vmatpush2.msra.mxu0 %v5848_v31  ;;  %v5855_v31 = vld [vmem:[#allocation64_spill] sm:$0xff] }
 0x676   :  { %1514 = vmatprep.subr.mxu0 %v5576_v52  ;;  %v5856_v52 = vld [vmem:[#allocation63_spill] sm:$0xff] }
 0x677   :  { %1515 = vmatpush2.msra.mxu0 %v5849_v8  ;;  %v5857_v8 = vld [vmem:[#allocation62_spill] sm:$0xff] }
 0x678   :  { %1516 = vmatprep.subr.mxu0 %v5578_v5  ;;  %v5858_v5 = vld [vmem:[#allocation61_spill] sm:$0xff] }
 0x679   :  { %1517 = vmatpush2.msra.mxu0 %v5850_v19  ;;  %v5859_v19 = vld [vmem:[#allocation60_spill] sm:$0xff] }
 0x67a   :  { %1518 = vmatprep.subr.mxu0 %v5580_v61  ;;  %v5860_v61 = vld [vmem:[#allocation59_spill] sm:$0xff] }
 0x67b   :  { %1519 = vmatpush2.msra.mxu0 %v5437_v53 }
 0x67c   :  { %1520 = vmatprep.subr.mxu0 %v5851_v12  ;;  %v5861_v12 = vld [vmem:[#allocation177_spill] sm:$0xff] }
 0x67d   :  { %1521 = vmatpush2.msra.mxu0 %v5852_v62  ;;  %v5862_v62 = vld [vmem:[#allocation179_spill] sm:$0xff] }
 0x67e   :  { %1522 = vmatprep.subr.mxu0 %v5853_v22  ;;  %v5863_v22 = vld [vmem:[#allocation180_spill] sm:$0xff] }
 0x67f   :  { %1523 = vmatpush2.msra.mxu0 %v5854_v15  ;;  %v5864_v15 = vld [vmem:[#allocation181_spill] sm:$0xff] }
 0x680   :  { %1524 = vmatprep.subr.mxu0 %v5855_v31  ;;  %v5865_v31 = vld [vmem:[#allocation182_spill] sm:$0xff] }
 0x681   :  { %1525 = vmatpush2.msra.mxu0 %v5856_v52  ;;  %v5866_v52 = vld [vmem:[#allocation95_spill] sm:$0xff] }
 0x682   :  { %1526 = vmatprep.subr.mxu0 %v5857_v8  ;;  %v5867_v8 = vld [vmem:[#allocation96_spill] sm:$0xff] }
 0x683   :  { %1527 = vmatpush2.msra.mxu0 %v5858_v5  ;;  %v5868_v5 = vld [vmem:[#allocation69_spill] sm:$0xff] }
 0x684   :  { %1528 = vmatprep.subr.mxu0 %v5859_v19  ;;  %v5869_v19 = vld [vmem:[#allocation171_spill] sm:$0xff] }
 0x685   :  { %1529 = vmatpush2.msra.mxu0 %v5860_v61  ;;  %v5870_v61 = vld [vmem:[#allocation172_spill] sm:$0xff] }
 0x686   :  { %1531 = vmatmul.mubr.f32.vlgmr.msra.gmra.mxu0 %v4194_v21  ;;  %1616 = vmatprep.subr.mxu0 %v5861_v12  ;;  %v5871_v21 = vld [vmem:[#allocation173_spill] sm:$0xff]  ;;  %v5872_v12 = vld [vmem:[#allocation174_spill] sm:$0xff] }
 0x687   :  { %1617 = vmatpush1.msra.mxu0 %v5862_v62  ;;  %v5873_v62 = vld [vmem:[#allocation175_spill] sm:$0xff] }
 0x688   :  { %1618 = vmatprep.subr.mxu0 %v5863_v22  ;;  %v5874_v22 = vld [vmem:[#allocation176_spill] sm:$0xff] }
 0x689   :  { %1619 = vmatpush1.msra.mxu0 %v5864_v15  ;;  %v5875_v15 = vld [vmem:[#allocation178_spill] sm:$0xff] }
 0x68a   :  { %1620 = vmatprep.subr.mxu0 %v5865_v31  ;;  %v5876_v31 = vld [vmem:[#allocation183_spill] sm:$0xff] }
 0x68b   :  { %1621 = vmatpush1.msra.mxu0 %v5866_v52  ;;  %v5877_v52 = vld [vmem:[#allocation184_spill] sm:$0xff] }
 0x68c   :  { %1622 = vmatprep.subr.mxu0 %v5867_v8  ;;  %v5878_v8 = vld [vmem:[#allocation185_spill] sm:$0xff] }
 0x68d   :  { %1623 = vmatpush1.msra.mxu0 %v5868_v5  ;;  %v5879_v5 = vld [vmem:[#allocation186_spill] sm:$0xff] }
 0x68e   :  { %1624 = vmatprep.subr.mxu0 %v5869_v19  ;;  %v5880_v19 = vld [vmem:[#allocation187_spill] sm:$0xff] }
 0x68f   :  { %1625 = vmatpush1.msra.mxu0 %v5870_v61  ;;  %v5881_v61 = vld [vmem:[#allocation188_spill] sm:$0xff] }
 0x690   :  { %1626 = vmatprep.subr.mxu0 %v5871_v21  ;;  %v5882_v21 = vld [vmem:[#allocation105_spill] sm:$0xff] }
 0x691   :  { %1627 = vmatpush1.msra.mxu0 %v5872_v12  ;;  %v5883_v12 = vld [vmem:[#allocation169_spill] sm:$0xff] }
 0x692   :  { %1628 = vmatprep.subr.mxu0 %v5873_v62  ;;  %v5884_v62 = vld [vmem:[#allocation170_spill] sm:$0xff] }
 0x693   :  { %1629 = vmatpush1.msra.mxu0 %v5874_v22  ;;  %v5885_v22 = vld [vmem:[#allocation106_spill] sm:$0xff] }
 0x694   :  { %1630 = vmatprep.subr.mxu0 %v5875_v15  ;;  %v5886_v15 = vld [vmem:[#allocation107_spill] sm:$0xff] }
 0x695   :  { %1631 = vmatpush1.msra.mxu0 %v5876_v31  ;;  %v5887_v31 = vld [vmem:[#allocation108_spill] sm:$0xff] }
 0x696   :  { %1632 = vmatprep.subr.mxu0 %v5877_v52  ;;  %v5888_v52 = vld [vmem:[#allocation109_spill] sm:$0xff] }
 0x697   :  { %1633 = vmatpush1.msra.mxu0 %v5878_v8  ;;  %v5889_v8 = vld [vmem:[#allocation110_spill] sm:$0xff] }
 0x698   :  { %1634 = vmatprep.subr.mxu0 %v5879_v5  ;;  %v5890_v5 = vld [vmem:[#allocation111_spill] sm:$0xff] }
 0x699   :  { %1635 = vmatpush1.msra.mxu0 %v5880_v19  ;;  %v5891_v19 = vld [vmem:[#allocation112_spill] sm:$0xff] }
 0x69a   :  { %1636 = vmatprep.subr.mxu0 %v5881_v61  ;;  %v5892_v61 = vld [vmem:[#allocation113_spill] sm:$0xff] }
 0x69b   :  { %1637 = vmatpush1.msra.mxu0 %v5882_v21  ;;  %v5893_v21 = vld [vmem:[#allocation114_spill] sm:$0xff] }
 0x69c   :  { %1638 = vmatprep.subr.mxu0 %v5883_v12  ;;  %v5894_v12 = vld [vmem:[#allocation115_spill] sm:$0xff] }
 0x69d   :  { %1639 = vmatpush1.msra.mxu0 %v5884_v62  ;;  %v5895_v62 = vld [vmem:[#allocation122_spill] sm:$0xff] }
 0x69e   :  { %1640 = vmatprep.subr.mxu0 %v5885_v22  ;;  %v5896_v22 = vld [vmem:[#allocation123_spill] sm:$0xff] }
 0x69f   :  { %1641 = vmatpush1.msra.mxu0 %v5886_v15  ;;  %v5897_v15 = vld [vmem:[#allocation124_spill] sm:$0xff] }
 0x6a0   :  { %1642 = vmatprep.subr.mxu0 %v5887_v31  ;;  %v5898_v31 = vld [vmem:[#allocation125_spill] sm:$0xff] }
 0x6a1   :  { %1643 = vmatpush1.msra.mxu0 %v5888_v52  ;;  %v5899_v52 = vld [vmem:[#allocation92_spill] sm:$0xff] }
 0x6a2   :  { %1644 = vmatprep.subr.mxu0 %v5889_v8  ;;  %v5906_v8 = vld [vmem:[#allocation94_spill] sm:$0xff] }
 0x6a3   :  { %1645 = vmatpush1.msra.mxu0 %v5890_v5  ;;  %v5907_v5 = vld [vmem:[#allocation93_spill] sm:$0xff] }
 0x6a4   :  { %1646 = vmatprep.subr.mxu0 %v5891_v19  ;;  %v5908_v19 = vld [vmem:[#allocation27_spill] sm:$0xff] }
 0x6a5   :  { %1647 = vmatpush1.msra.mxu0 %v5892_v61  ;;  %v5909_v61 = vld [vmem:[#allocation116_spill] sm:$0xff] }
 0x6a6   :  { %1648 = vmatprep.subr.mxu0 %v5893_v21  ;;  %v5910_v21 = vld [vmem:[#allocation117_spill] sm:$0xff] }
 0x6a7   :  { %1649 = vmatpush2.msra.mxu0 %v5894_v12  ;;  %v5911_v12 = vld [vmem:[#allocation118_spill] sm:$0xff] }
 0x6a8   :  { %1650 = vmatprep.subr.mxu0 %v5753_v30  ;;  %v5900_v30 = vld [vmem:[#allocation150_spill] sm:$0xff] }
 0x6a9   :  { %1651 = vmatpush2.msra.mxu0 %v5754_v14  ;;  %v5901_v14 = vld [vmem:[#allocation91_spill] sm:$0xff] }
 0x6aa   :  { %1652 = vmatprep.subr.mxu0 %v5755_v27  ;;  %v5902_v27 = vld [vmem:[#allocation151_spill] sm:$0xff] }
 0x6ab   :  { %1653 = vmatpush2.msra.mxu0 %v5756_v17  ;;  %v5903_v17 = vld [vmem:[#allocation80_spill] sm:$0xff] }
 0x6ac   :  { %1654 = vmatprep.subr.mxu0 %v5757_v20  ;;  %v5904_v20 = vld [vmem:[#allocation189_spill] sm:$0xff] }
 0x6ad   :  { %1655 = vmatpush2.msra.mxu0 %v5758_v32  ;;  %v5905_v32 = vld [vmem:[#allocation190_spill] sm:$0xff] }
 0x6ae   :  { %1656 = vmatprep.subr.mxu0 %v5895_v62  ;;  %v5912_v62 = vld [vmem:[#allocation119_spill] sm:$0xff] }
 0x6af   :  { %1657 = vmatpush2.msra.mxu0 %v5896_v22  ;;  %v5913_v22 = vld [vmem:[#allocation120_spill] sm:$0xff] }
 0x6b0   :  { %1658 = vmatprep.subr.mxu0 %v5897_v15  ;;  %v5914_v15 = vld [vmem:[#allocation121_spill] sm:$0xff] }
 0x6b1   :  { %1659 = vmatpush2.msra.mxu0 %v5898_v31  ;;  %v5915_v31 = vld [vmem:[#allocation191_spill] sm:$0xff] }
 0x6b2   :  { %1660 = vmatprep.subr.mxu0 %v5899_v52  ;;  %v5916_v52 = vld [vmem:[#allocation192_spill] sm:$0xff] }
 0x6b3   :  { %1661 = vmatpush2.msra.mxu0 %v5900_v30  ;;  %v5917_v30 = vld [vmem:[#allocation193_spill] sm:$0xff] }
 0x6b4   :  { %1662 = vmatprep.subr.mxu0 %v5901_v14 }
 0x6b5   :  { %1663 = vmatpush2.msra.mxu0 %v5902_v27 }
 0x6b6   :  { %1664 = vmatprep.subr.mxu0 %v5903_v17 }
 0x6b7   :  { %1665 = vmatpush2.msra.mxu0 %v5904_v20 }
 0x6b8   :  { %1666 = vmatprep.subr.mxu0 %v5905_v32 }
 0x6b9   :  { %1667 = vmatpush2.msra.mxu0 %v5906_v8 }
 0x6ba   :  { %1668 = vmatprep.subr.mxu0 %v5907_v5 }
 0x6bb   :  { %1669 = vmatpush2.msra.mxu0 %v5908_v19 }
 0x6bc   :  { %1670 = vmatprep.subr.mxu0 %v5909_v61 }
 0x6bd   :  { %1671 = vmatpush2.msra.mxu0 %v5910_v21 }
 0x6be   :  { %1672 = vmatprep.subr.mxu0 %v5911_v12 }
 0x6bf   :  { %1673 = vmatpush2.msra.mxu0 %v5912_v62 }
 0x6c0   :  { %1674 = vmatprep.subr.mxu0 %v5913_v22 }
 0x6c1   :  { %1675 = vmatpush2.msra.mxu0 %v5914_v15 }
 0x6c2   :  { %1676 = vmatprep.subr.mxu0 %v5915_v31 }
 0x6c3   :  { %1677 = vmatpush2.msra.mxu0 %v5916_v52 }
 0x6c4   :  { %1678 = vmatprep.subr.mxu0 %v5917_v30 }
 0x6c5   :  { %1679 = vmatpush2.msra.mxu0 %v4124_v25 }
 0x6c6   :  { %1762 = vmatprep.subr.mxu0 %v5461_v13  ;;  %v1240_v14 = vpop.f32.mrf.mxu0 }
 0x6c8   :  { %v1242_v27 = vpop.f32.mrf.mxu0 }
 0x706   :  { %v1386_v17 = vpop.f32.mrf.mxu0 }
 0x707   :  { %v1387_v20 = vadd.f32 %v1386_v17, %v1240_v14  ;;  %v5923_v14 = vld [vmem:[#allocation133_spill] sm:$0xff]  ;;  %v5925_v17 = vld [vmem:[#allocation135_spill] sm:$0xff] }
 0x708   :  { %v1388_v32 = vpop.f32.mrf.mxu0 }
 0x709   :  { %v1389_v62 = vadd.f32 %v1388_v32, %v1242_v27  ;;  %v1391_v22 = vadd.f32 %v1387_v20, %v5462_v34  ;;  %v5924_v27 = vld [vmem:[#allocation134_spill] sm:$0xff]  ;;  %v5926_v20 = vld [vmem:[#allocation136_spill] sm:$0xff]  ;;  %v5927_v32 = vld [vmem:[#allocation137_spill] sm:$0xff] }
 0x70b   :  { %v1392_v15 = vadd.f32 %v1389_v62, %v5463_v57  ;;  %v5918_v62 = vld [vmem:[#allocation128_spill] sm:$0xff] }
 0x70d   :  { %2293 = vtanh.f32 %v1392_v15  ;;  %v5920_v15 = vld [vmem:[#allocation130_spill] sm:$0xff] }
 0x70e   :  { %2295 = vtanh.f32 %v1391_v22  ;;  %v5919_v22 = vld [vmem:[#allocation129_spill] sm:$0xff] }
 0x71a   :  { %v2294_v31 = vpop.eup %2293 }
 0x71b   :  { %v2296_v52 = vpop.eup %2295  ;;  %1459 = vmatprep.mubr.f32.mxu1 %v2294_v31  ;;  %v5921_v31 = vld [vmem:[#allocation131_spill] sm:$0xff] }
 0x71c   :  { %1460 = vmatmul.mubr.f32.vlgmr.msra.gmra.mxu1 %v2296_v52  ;;  %v5922_v52 = vld [vmem:[#allocation132_spill] sm:$0xff] }
 0x71d   :  { %1542 = vmatpush1.msra.mxu1 %v5464_v63 }
 0x71e   :  { %1543 = vmatprep.subr.mxu1 %v5465_v33 }
 0x71f   :  { %1544 = vmatpush1.msra.mxu1 %v5466_v36 }
 0x720   :  { %1545 = vmatprep.subr.mxu1 %v5467_v40 }
 0x721   :  { %1546 = vmatpush1.msra.mxu1 %v5468_v35 }
 0x722   :  { %1547 = vmatprep.subr.mxu1 %v5469_v51 }
 0x723   :  { %1548 = vmatpush1.msra.mxu1 %v5470_v42 }
 0x724   :  { %1549 = vmatprep.subr.mxu1 %v5471_v39 }
 0x725   :  { %1550 = vmatpush1.msra.mxu1 %v5472_v46 }
 0x726   :  { %1551 = vmatprep.subr.mxu1 %v5473_v59 }
 0x727   :  { %1552 = vmatpush1.msra.mxu1 %v5474_v43 }
 0x728   :  { %1553 = vmatprep.subr.mxu1 %v5475_v41 }
 0x729   :  { %1554 = vmatpush1.msra.mxu1 %v5476_v60 }
 0x72a   :  { %1555 = vmatprep.subr.mxu1 %v5477_v45 }
 0x72b   :  { %1556 = vmatpush1.msra.mxu1 %v5478_v38 }
 0x72c   :  { %1557 = vmatprep.subr.mxu1 %v5479_v48 }
 0x72d   :  { %1558 = vmatpush1.msra.mxu1 %v5480_v54 }
 0x72e   :  { %1559 = vmatprep.subr.mxu1 %v5481_v47 }
 0x72f   :  { %1560 = vmatpush1.msra.mxu1 %v5482_v44 }
 0x730   :  { %1561 = vmatprep.subr.mxu1 %v5483_v0 }
 0x731   :  { %1562 = vmatpush1.msra.mxu1 %v5484_v1  ;;  %v5940_v1 = vld [vmem:[#allocation98_spill] sm:$0xff] }
 0x732   :  { %1563 = vmatprep.subr.mxu1 %v5485_v2  ;;  %v5928_v2 = vld [vmem:[#allocation138_spill] sm:$0xff] }
 0x733   :  { %1564 = vmatpush1.msra.mxu1 %v5918_v62  ;;  %v5929_v62 = vld [vmem:[#allocation139_spill] sm:$0xff] }
 0x734   :  { %1565 = vmatprep.subr.mxu1 %v5919_v22  ;;  %v5930_v22 = vld [vmem:[#allocation140_spill] sm:$0xff] }
 0x735   :  { %1566 = vmatpush1.msra.mxu1 %v5920_v15  ;;  %v5931_v15 = vld [vmem:[#allocation141_spill] sm:$0xff] }
 0x736   :  { %1567 = vmatprep.subr.mxu1 %v5921_v31  ;;  %v5932_v31 = vld [vmem:[#allocation142_spill] sm:$0xff] }
 0x737   :  { %1568 = vmatpush1.msra.mxu1 %v5922_v52  ;;  %v5933_v52 = vld [vmem:[#allocation143_spill] sm:$0xff] }
 0x738   :  { %1569 = vmatprep.subr.mxu1 %v5923_v14  ;;  %v5934_v14 = vld [vmem:[#allocation144_spill] sm:$0xff] }
 0x739   :  { %1570 = vmatpush1.msra.mxu1 %v5924_v27  ;;  %v5935_v27 = vld [vmem:[#allocation145_spill] sm:$0xff] }
 0x73a   :  { %1571 = vmatprep.subr.mxu1 %v5925_v17  ;;  %v5936_v17 = vld [vmem:[#allocation146_spill] sm:$0xff] }
 0x73b   :  { %1572 = vmatpush1.msra.mxu1 %v5926_v20  ;;  %v5937_v20 = vld [vmem:[#allocation147_spill] sm:$0xff] }
 0x73c   :  { %1573 = vmatprep.subr.mxu1 %v5927_v32 }
 0x73d   :  { %1574 = vmatpush2.msra.mxu1 %v5928_v2  ;;  %v5938_v2 = vld [vmem:[#allocation148_spill] sm:$0xff] }
 0x73e   :  { %1575 = vmatprep.subr.mxu1 %v5929_v62  ;;  %v5939_v62 = vld [vmem:[#allocation149_spill] sm:$0xff] }
 0x73f   :  { %1576 = vmatpush2.msra.mxu1 %v5930_v22 }
 0x740   :  { %1577 = vmatprep.subr.mxu1 %v5931_v15 }
 0x741   :  { %1578 = vmatpush2.msra.mxu1 %v5932_v31  ;;  %v5941_v31 = vld [vmem:[#allocation97_spill] sm:$0xff] }
 0x742   :  { %1579 = vmatprep.subr.mxu1 %v5933_v52 }
 0x743   :  { %1580 = vmatpush2.msra.mxu1 %v5934_v14  ;;  %v5947_v14 = vld [vmem:[#allocation157_spill] sm:$0xff] }
 0x744   :  { %1581 = vmatprep.subr.mxu1 %v5935_v27  ;;  %v5942_v27 = vld [vmem:[#allocation152_spill] sm:$0xff] }
 0x745   :  { %1582 = vmatpush2.msra.mxu1 %v5936_v17  ;;  %v5943_v17 = vld [vmem:[#allocation153_spill] sm:$0xff] }
 0x746   :  { %1583 = vmatprep.subr.mxu1 %v5937_v20  ;;  %v1532_v32 = vpop.f32.mrf.mxu0  ;;  %v5944_v20 = vld [vmem:[#allocation154_spill] sm:$0xff] }
 0x747   :  { %1584 = vmatpush2.msra.mxu1 %v5938_v2  ;;  %v1537_v52 = vadd.f32 %v1532_v32, %v5941_v31  ;;  %v5945_v2 = vld [vmem:[#allocation155_spill] sm:$0xff]  ;;  %v5950_v31 = vld [vmem:[#allocation160_spill] sm:$0xff]  ;;  %v5952_v32 = vld [vmem:[#allocation162_spill] sm:$0xff] }
 0x748   :  { %1585 = vmatprep.subr.mxu1 %v5939_v62  ;;  %v1534_v22 = vpop.f32.mrf.mxu0  ;;  %v5946_v62 = vld [vmem:[#allocation156_spill] sm:$0xff] }
 0x749   :  { %v1538_v15 = vadd.f32 %v1534_v22, %v5940_v1  ;;  %1586 = vmatpush2.msra.mxu1 %v5509_v4  ;;  %v5948_v1 = vld [vmem:[#allocation158_spill] sm:$0xff]  ;;  %v5949_v22 = vld [vmem:[#allocation159_spill] sm:$0xff] }
 0x74a   :  { %1587 = vmatprep.subr.mxu1 %v5511_v3 }
 0x74b   :  { %2297 = vtanh.f32 %v1538_v15  ;;  %1588 = vmatpush2.msra.mxu1 %v5942_v27  ;;  %v5951_v15 = vld [vmem:[#allocation161_spill] sm:$0xff] }
 0x74c   :  { %1589 = vmatprep.subr.mxu1 %v5943_v17  ;;  %2299 = vtanh.f32 %v1537_v52  ;;  %v5953_v17 = vld [vmem:[#allocation163_spill] sm:$0xff]  ;;  %v5968_v27 = vld [vmem:[#allocation49_spill] sm:$0xff] }
 0x74d   :  { %1590 = vmatpush2.msra.mxu1 %v5944_v20  ;;  %v5954_v20 = vld [vmem:[#allocation164_spill] sm:$0xff] }
 0x74e   :  { %1591 = vmatprep.subr.mxu1 %v5945_v2  ;;  %v5955_v2 = vld [vmem:[#allocation165_spill] sm:$0xff] }
 0x74f   :  { %1592 = vmatpush2.msra.mxu1 %v5946_v62  ;;  %v5956_v62 = vld [vmem:[#allocation166_spill] sm:$0xff] }
 0x750   :  { %1593 = vmatprep.subr.mxu1 %v5947_v14  ;;  %v5957_v14 = vld [vmem:[#allocation167_spill] sm:$0xff] }
 0x751   :  { %1594 = vmatpush2.msra.mxu1 %v5948_v1 }
 0x752   :  { %1595 = vmatprep.subr.mxu1 %v5949_v22  ;;  %v5958_v22 = vld [vmem:[#allocation168_spill] sm:$0xff] }
 0x753   :  { %1596 = vmatpush2.msra.mxu1 %v5950_v31  ;;  %v5966_v31 = vld [vmem:[#allocation51_spill] sm:$0xff] }
 0x754   :  { %1597 = vmatprep.subr.mxu1 %v5951_v15  ;;  %v5959_v15 = vld [vmem:[#allocation58_spill] sm:$0xff] }
 0x755   :  { %1598 = vmatpush2.msra.mxu1 %v5952_v32  ;;  %v5960_v32 = vld [vmem:[#allocation57_spill] sm:$0xff] }
 0x756   :  { %1599 = vmatprep.subr.mxu1 %v5953_v17  ;;  %v5962_v17 = vld [vmem:[#allocation55_spill] sm:$0xff] }
 0x757   :  { %1600 = vmatpush2.msra.mxu1 %v5954_v20  ;;  %v5961_v20 = vld [vmem:[#allocation56_spill] sm:$0xff] }
 0x758   :  { %v2298_v52 = vpop.eup %2297  ;;  %1601 = vmatprep.subr.mxu1 %v5955_v2  ;;  %v5963_v2 = vld [vmem:[#allocation54_spill] sm:$0xff] }
 0x759   :  { %1602 = vmatpush2.msra.mxu1 %v5956_v62  ;;  %1605 = vmatprep.mubr.f32.mxu1 %v2298_v52  ;;  %v4394_v1 = vpop.eup %2299  ;;  %v5964_v62 = vld [vmem:[#allocation53_spill] sm:$0xff] }
 0x75a   :  { %1603 = vmatprep.subr.mxu1 %v5957_v14  ;;  %v5965_v14 = vld [vmem:[#allocation52_spill] sm:$0xff] }
 0x75b   :  { %1604 = vmatpush2.msra.mxu1 %v5958_v22  ;;  %v5967_v22 = vld [vmem:[#allocation50_spill] sm:$0xff] }
 0x75c   :  { %1606 = vmatmul.mubr.f32.vlgmr.msra.gmra.mxu1 %v4394_v1  ;;  %1687 = vmatprep.subr.mxu1 %v5959_v15  ;;  %v5969_v15 = vld [vmem:[#allocation48_spill] sm:$0xff] }
 0x75d   :  { %1688 = vmatpush1.msra.mxu1 %v5960_v32  ;;  %1751 = vmatprep.mubr.f32.mxu1 %v2298_v52  ;;  %v5970_v32 = vld [vmem:[#allocation47_spill] sm:$0xff]  ;;  %v5971_v52 = vld [vmem:[#allocation46_spill] sm:$0xff] }
 0x75e   :  { %1689 = vmatprep.subr.mxu1 %v5961_v20  ;;  %v5972_v20 = vld [vmem:[#allocation45_spill] sm:$0xff] }
 0x75f   :  { %1690 = vmatpush1.msra.mxu1 %v5962_v17  ;;  %v5973_v17 = vld [vmem:[#allocation44_spill] sm:$0xff] }
 0x760   :  { %1691 = vmatprep.subr.mxu1 %v5963_v2  ;;  %v5974_v2 = vld [vmem:[#allocation43_spill] sm:$0xff] }
 0x761   :  { %1692 = vmatpush1.msra.mxu1 %v5964_v62  ;;  %v5975_v62 = vld [vmem:[#allocation42_spill] sm:$0xff] }
 0x762   :  { %1693 = vmatprep.subr.mxu1 %v5965_v14  ;;  %v5976_v14 = vld [vmem:[#allocation41_spill] sm:$0xff] }
 0x763   :  { %1694 = vmatpush1.msra.mxu1 %v5966_v31  ;;  %v5977_v31 = vld [vmem:[#allocation40_spill] sm:$0xff] }
 0x764   :  { %1695 = vmatprep.subr.mxu1 %v5967_v22  ;;  %v5978_v22 = vld [vmem:[#allocation39_spill] sm:$0xff] }
 0x765   :  { %1696 = vmatpush1.msra.mxu1 %v5968_v27 }
 0x766   :  { %1697 = vmatprep.subr.mxu1 %v5969_v15 }
 0x767   :  { %1698 = vmatpush1.msra.mxu1 %v5970_v32 }
 0x768   :  { %1699 = vmatprep.subr.mxu1 %v5971_v52 }
 0x769   :  { %1700 = vmatpush1.msra.mxu1 %v5972_v20 }
 0x76a   :  { %1701 = vmatprep.subr.mxu1 %v5973_v17 }
 0x76b   :  { %1702 = vmatpush1.msra.mxu1 %v5974_v2 }
 0x76c   :  { %1703 = vmatprep.subr.mxu1 %v5975_v62 }
 0x76d   :  { %1704 = vmatpush1.msra.mxu1 %v5976_v14 }
 0x76e   :  { %1705 = vmatprep.subr.mxu1 %v5977_v31 }
 0x76f   :  { %1706 = vmatpush1.msra.mxu1 %v5978_v22 }
 0x770   :  { %1707 = vmatprep.subr.mxu1 %v5835_v50 }
 0x771   :  { %1708 = vmatpush1.msra.mxu1 %v5836_v28  ;;  %v5979_v28 = vld [vmem:[#allocation90_spill] sm:$0xff] }
 0x772   :  { %1709 = vmatprep.subr.mxu1 %v5837_v58 }
 0x773   :  { %1710 = vmatpush1.msra.mxu1 %v5838_v49  ;;  %v5980_v49 = vld [vmem:[#allocation88_spill] sm:$0xff] }
 0x774   :  { %1711 = vmatprep.subr.mxu1 %v5839_v18 }
 0x775   :  { %1712 = vmatpush1.msra.mxu1 %v5840_v6  ;;  %v5981_v6 = vld [vmem:[#allocation86_spill] sm:$0xff] }
 0x776   :  { %1713 = vmatprep.subr.mxu1 %v5841_v11 }
 0x777   :  { %1714 = vmatpush1.msra.mxu1 %v5842_v10  ;;  %v5982_v10 = vld [vmem:[#allocation84_spill] sm:$0xff] }
 0x778   :  { %1715 = vmatprep.subr.mxu1 %v5843_v29 }
 0x779   :  { %1716 = vmatpush1.msra.mxu1 %v5844_v26  ;;  %v5983_v26 = vld [vmem:[#allocation82_spill] sm:$0xff] }
 0x77a   :  { %1717 = vmatprep.subr.mxu1 %v5845_v55 }
 0x77b   :  { %1718 = vmatpush1.msra.mxu1 %v5703_v16 }
 0x77c   :  { %1719 = vmatprep.subr.mxu1 %v5979_v28  ;;  %v5984_v28 = vld [vmem:[#allocation79_spill] sm:$0xff] }
 0x77d   :  { %1720 = vmatpush2.msra.mxu1 %v5705_v56  ;;  %v5985_v56 = vld [vmem:[#allocation78_spill] sm:$0xff] }
 0x77e   :  { %1721 = vmatprep.subr.mxu1 %v5980_v49  ;;  %v5986_v49 = vld [vmem:[#allocation77_spill] sm:$0xff] }
 0x77f   :  { %1722 = vmatpush2.msra.mxu1 %v5707_v24  ;;  %v5987_v24 = vld [vmem:[#allocation76_spill] sm:$0xff] }
 0x780   :  { %1723 = vmatprep.subr.mxu1 %v5981_v6  ;;  %v5988_v6 = vld [vmem:[#allocation75_spill] sm:$0xff] }
 0x781   :  { %1724 = vmatpush2.msra.mxu1 %v5709_v7  ;;  %v5989_v7 = vld [vmem:[#allocation74_spill] sm:$0xff] }
 0x782   :  { %1725 = vmatprep.subr.mxu1 %v5982_v10  ;;  %v5990_v10 = vld [vmem:[#allocation73_spill] sm:$0xff] }
 0x783   :  { %1726 = vmatpush2.msra.mxu1 %v5711_v23  ;;  %v5991_v23 = vld [vmem:[#allocation72_spill] sm:$0xff] }
 0x784   :  { %1727 = vmatprep.subr.mxu1 %v5983_v26  ;;  %v5992_v26 = vld [vmem:[#allocation71_spill] sm:$0xff] }
 0x785   :  { %1728 = vmatpush2.msra.mxu1 %v5713_v9  ;;  %v5993_v9 = vld [vmem:[#allocation70_spill] sm:$0xff] }
 0x786   :  { %1729 = vmatprep.subr.mxu1 %v5570_v37 }
 0x787   :  { %1730 = vmatpush2.msra.mxu1 %v5984_v28  ;;  %v5994_v28 = vld [vmem:[#allocation68_spill] sm:$0xff] }
 0x788   :  { %1731 = vmatprep.subr.mxu1 %v5985_v56  ;;  %v5995_v56 = vld [vmem:[#allocation67_spill] sm:$0xff] }
 0x789   :  { %1732 = vmatpush2.msra.mxu1 %v5986_v49  ;;  %v5996_v49 = vld [vmem:[#allocation66_spill] sm:$0xff] }
 0x78a   :  { %1733 = vmatprep.subr.mxu1 %v5987_v24  ;;  %v5997_v24 = vld [vmem:[#allocation65_spill] sm:$0xff] }
 0x78b   :  { %1734 = vmatpush2.msra.mxu1 %v5988_v6  ;;  %v5998_v6 = vld [vmem:[#allocation64_spill] sm:$0xff] }
 0x78c   :  { %1735 = vmatprep.subr.mxu1 %v5989_v7  ;;  %v5999_v7 = vld [vmem:[#allocation63_spill] sm:$0xff] }
 0x78d   :  { %1736 = vmatpush2.msra.mxu1 %v5990_v10  ;;  %v6000_v10 = vld [vmem:[#allocation62_spill] sm:$0xff] }
 0x78e   :  { %1737 = vmatprep.subr.mxu1 %v5991_v23  ;;  %v6001_v23 = vld [vmem:[#allocation61_spill] sm:$0xff] }
 0x78f   :  { %1738 = vmatpush2.msra.mxu1 %v5992_v26  ;;  %v6002_v26 = vld [vmem:[#allocation60_spill] sm:$0xff] }
 0x790   :  { %1739 = vmatprep.subr.mxu1 %v5993_v9  ;;  %v6003_v9 = vld [vmem:[#allocation59_spill] sm:$0xff] }
 0x791   :  { %1740 = vmatpush2.msra.mxu1 %v5437_v53 }
 0x792   :  { %1741 = vmatprep.subr.mxu1 %v5994_v28  ;;  %v2385_v28 = vld [vmem:[#allocation3 + $0xf8] sm:$0xff] }
 0x793   :  { %1742 = vmatpush2.msra.mxu1 %v5995_v56  ;;  %v2386_v56 = vld [vmem:[#allocation3 + $0xf0] sm:$0xff] }
 0x794   :  { %1743 = vmatprep.subr.mxu1 %v5996_v49  ;;  %v2387_v49 = vld [vmem:[#allocation3 + $0xe8] sm:$0xff] }
 0x795   :  { %1744 = vmatpush2.msra.mxu1 %v5997_v24  ;;  %v2388_v24 = vld [vmem:[#allocation3 + $0xe0] sm:$0xff] }
 0x796   :  { %1745 = vmatprep.subr.mxu1 %v5998_v6  ;;  %v2389_v6 = vld [vmem:[#allocation3 + $0xd8] sm:$0xff] }
 0x797   :  { %1746 = vmatpush2.msra.mxu1 %v5999_v7  ;;  %v2390_v7 = vld [vmem:[#allocation3 + $0xd0] sm:$0xff] }
 0x798   :  { %1747 = vmatprep.subr.mxu1 %v6000_v10  ;;  %v2391_v10 = vld [vmem:[#allocation3 + $0xc8] sm:$0xff] }
 0x799   :  { %1748 = vmatpush2.msra.mxu1 %v6001_v23  ;;  %v2392_v23 = vld [vmem:[#allocation3 + $0xc0] sm:$0xff] }
 0x79a   :  { %1749 = vmatprep.subr.mxu1 %v6002_v26  ;;  %v2393_v26 = vld [vmem:[#allocation3 + $0xb8] sm:$0xff] }
 0x79b   :  { %1750 = vmatpush2.msra.mxu1 %v6003_v9  ;;  %v2394_v9 = vld [vmem:[#allocation3 + $0xb0] sm:$0xff] }
 0x79c   :  { %1752 = vmatmul.mubr.f32.vlgmr.msra.gmra.mxu1 %v4394_v1  ;;  %1837 = vmatprep.subr.mxu1 %v2385_v28  ;;  %v2395_v1 = vld [vmem:[#allocation3 + $0xa8] sm:$0xff]  ;;  %v2396_v28 = vld [vmem:[#allocation3 + $0xa0] sm:$0xff] }
 0x79d   :  { %1838 = vmatpush1.msra.mxu1 %v2386_v56  ;;  %v2397_v56 = vld [vmem:[#allocation3 + $0x98] sm:$0xff] }
 0x79e   :  { %1839 = vmatprep.subr.mxu1 %v2387_v49  ;;  %v2398_v49 = vld [vmem:[#allocation3 + $0x90] sm:$0xff] }
 0x79f   :  { %1840 = vmatpush1.msra.mxu1 %v2388_v24  ;;  %v2399_v24 = vld [vmem:[#allocation3 + $0x88] sm:$0xff] }
 0x7a0   :  { %1841 = vmatprep.subr.mxu1 %v2389_v6  ;;  %v2400_v6 = vld [vmem:[#allocation3 + $0x80] sm:$0xff] }
 0x7a1   :  { %1842 = vmatpush1.msra.mxu1 %v2390_v7  ;;  %v2401_v7 = vld [vmem:[#allocation3 + $0x78] sm:$0xff] }
 0x7a2   :  { %1843 = vmatprep.subr.mxu1 %v2391_v10  ;;  %v2402_v10 = vld [vmem:[#allocation3 + $0x70] sm:$0xff] }
 0x7a3   :  { %1844 = vmatpush1.msra.mxu1 %v2392_v23  ;;  %v2403_v23 = vld [vmem:[#allocation3 + $0x68] sm:$0xff] }
 0x7a4   :  { %1845 = vmatprep.subr.mxu1 %v2393_v26  ;;  %v2404_v26 = vld [vmem:[#allocation3 + $0x60] sm:$0xff] }
 0x7a5   :  { %1846 = vmatpush1.msra.mxu1 %v2394_v9  ;;  %v2405_v9 = vld [vmem:[#allocation3 + $0x58] sm:$0xff] }
 0x7a6   :  { %1847 = vmatprep.subr.mxu1 %v2395_v1  ;;  %v2406_v1 = vld [vmem:[#allocation3 + $0x50] sm:$0xff] }
 0x7a7   :  { %1848 = vmatpush1.msra.mxu1 %v2396_v28  ;;  %v2407_v28 = vld [vmem:[#allocation3 + $0x48] sm:$0xff] }
 0x7a8   :  { %1849 = vmatprep.subr.mxu1 %v2397_v56  ;;  %v2408_v56 = vld [vmem:[#allocation3 + $0x40] sm:$0xff] }
 0x7a9   :  { %1850 = vmatpush1.msra.mxu1 %v2398_v49  ;;  %v2409_v49 = vld [vmem:[#allocation3 + $0x38] sm:$0xff] }
 0x7aa   :  { %1851 = vmatprep.subr.mxu1 %v2399_v24  ;;  %v2410_v24 = vld [vmem:[#allocation3 + $0x30] sm:$0xff] }
 0x7ab   :  { %1852 = vmatpush1.msra.mxu1 %v2400_v6  ;;  %v2411_v6 = vld [vmem:[#allocation3 + $0x28] sm:$0xff] }
 0x7ac   :  { %1853 = vmatprep.subr.mxu1 %v2401_v7  ;;  %v2412_v7 = vld [vmem:[#allocation3 + $0x20] sm:$0xff] }
 0x7ad   :  { %1854 = vmatpush1.msra.mxu1 %v2402_v10  ;;  %v2413_v10 = vld [vmem:[#allocation3 + $0x18] sm:$0xff] }
 0x7ae   :  { %1855 = vmatprep.subr.mxu1 %v2403_v23  ;;  %v2414_v23 = vld [vmem:[#allocation3 + $0x10] sm:$0xff] }
 0x7af   :  { %1856 = vmatpush1.msra.mxu1 %v2404_v26  ;;  %v2415_v26 = vld [vmem:[#allocation3 + $0x8] sm:$0xff] }
 0x7b0   :  { %1857 = vmatprep.subr.mxu1 %v2405_v9  ;;  %v2416_v9 = vld [vmem:[#allocation3] sm:$0xff] }
 0x7b1   :  { %1858 = vmatpush1.msra.mxu1 %v2406_v1  ;;  %v2417_v1 = vld [vmem:[#allocation3 + $0x1f8] sm:$0xff] }
 0x7b2   :  { %1859 = vmatprep.subr.mxu1 %v2407_v28  ;;  %v2418_v28 = vld [vmem:[#allocation3 + $0x1f0] sm:$0xff] }
 0x7b3   :  { %1860 = vmatpush1.msra.mxu1 %v2408_v56  ;;  %v2419_v56 = vld [vmem:[#allocation3 + $0x1e8] sm:$0xff] }
 0x7b4   :  { %1861 = vmatprep.subr.mxu1 %v2409_v49  ;;  %v2420_v49 = vld [vmem:[#allocation3 + $0x1e0] sm:$0xff] }
 0x7b5   :  { %1862 = vmatpush1.msra.mxu1 %v2410_v24  ;;  %v2421_v24 = vld [vmem:[#allocation3 + $0x1d8] sm:$0xff] }
 0x7b6   :  { %1863 = vmatprep.subr.mxu1 %v2411_v6  ;;  %v2422_v6 = vld [vmem:[#allocation3 + $0x1d0] sm:$0xff] }
 0x7b7   :  { %1864 = vmatpush1.msra.mxu1 %v2412_v7  ;;  %v2423_v7 = vld [vmem:[#allocation3 + $0x1c8] sm:$0xff] }
 0x7b8   :  { %1865 = vmatprep.subr.mxu1 %v2413_v10  ;;  %v2424_v10 = vld [vmem:[#allocation3 + $0x1c0] sm:$0xff] }
 0x7b9   :  { %1866 = vmatpush1.msra.mxu1 %v2414_v23  ;;  %v2425_v23 = vld [vmem:[#allocation3 + $0x1b8] sm:$0xff] }
 0x7ba   :  { %1867 = vmatprep.subr.mxu1 %v2415_v26  ;;  %v2426_v26 = vld [vmem:[#allocation3 + $0x1b0] sm:$0xff] }
 0x7bb   :  { %1868 = vmatpush1.msra.mxu1 %v2416_v9  ;;  %v2427_v9 = vld [vmem:[#allocation3 + $0x1a8] sm:$0xff] }
 0x7bc   :  { %1869 = vmatprep.subr.mxu1 %v2417_v1  ;;  %v2428_v1 = vld [vmem:[#allocation3 + $0x1a0] sm:$0xff] }
 0x7bd   :  { %1870 = vmatpush2.msra.mxu1 %v2418_v28  ;;  %v2429_v28 = vld [vmem:[#allocation3 + $0x198] sm:$0xff] }
 0x7be   :  { %1871 = vmatprep.subr.mxu1 %v2419_v56  ;;  %v2430_v56 = vld [vmem:[#allocation3 + $0x190] sm:$0xff] }
 0x7bf   :  { %1872 = vmatpush2.msra.mxu1 %v2420_v49  ;;  %v2431_v49 = vld [vmem:[#allocation3 + $0x188] sm:$0xff] }
 0x7c0   :  { %1873 = vmatprep.subr.mxu1 %v2421_v24  ;;  %v2432_v24 = vld [vmem:[#allocation3 + $0x180] sm:$0xff] }
 0x7c1   :  { %1874 = vmatpush2.msra.mxu1 %v2422_v6  ;;  %v2433_v6 = vld [vmem:[#allocation3 + $0x178] sm:$0xff] }
 0x7c2   :  { %1875 = vmatprep.subr.mxu1 %v2423_v7  ;;  %v2434_v7 = vld [vmem:[#allocation3 + $0x170] sm:$0xff] }
 0x7c3   :  { %1876 = vmatpush2.msra.mxu1 %v2424_v10  ;;  %v2435_v10 = vld [vmem:[#allocation3 + $0x168] sm:$0xff] }
 0x7c4   :  { %1877 = vmatprep.subr.mxu1 %v2425_v23  ;;  %v6004_v23 = vld [vmem:[#allocation119_spill] sm:$0xff] }
 0x7c5   :  { %1878 = vmatpush2.msra.mxu1 %v2426_v26  ;;  %v6005_v26 = vld [vmem:[#allocation120_spill] sm:$0xff] }
 0x7c6   :  { %1879 = vmatprep.subr.mxu1 %v2427_v9  ;;  %v6006_v9 = vld [vmem:[#allocation121_spill] sm:$0xff] }
 0x7c7   :  { %1880 = vmatpush2.msra.mxu1 %v2428_v1  ;;  %v6007_v1 = vld [vmem:[#allocation191_spill] sm:$0xff] }
 0x7c8   :  { %1881 = vmatprep.subr.mxu1 %v2429_v28  ;;  %v6008_v28 = vld [vmem:[#allocation192_spill] sm:$0xff] }
 0x7c9   :  { %1882 = vmatpush2.msra.mxu1 %v2430_v56 }
 0x7ca   :  { %1883 = vmatprep.subr.mxu1 %v2431_v49 }
 0x7cb   :  { %1884 = vmatpush2.msra.mxu1 %v2432_v24 }
 0x7cc   :  { %1885 = vmatprep.subr.mxu1 %v2433_v6 }
 0x7cd   :  { %1886 = vmatpush2.msra.mxu1 %v2434_v7  ;;  %v6012_v7 = vld [vmem:[#allocation129_spill] sm:$0xff] }
 0x7ce   :  { %1887 = vmatprep.subr.mxu1 %v2435_v10  ;;  %v6013_v10 = vld [vmem:[#allocation130_spill] sm:$0xff] }
 0x7cf   :  { %1888 = vmatpush2.msra.mxu1 %v5906_v8 }
 0x7d0   :  { %1889 = vmatprep.subr.mxu1 %v5907_v5 }
 0x7d1   :  { %1890 = vmatpush2.msra.mxu1 %v5908_v19 }
 0x7d2   :  { %1891 = vmatprep.subr.mxu1 %v5909_v61 }
 0x7d3   :  { %1892 = vmatpush2.msra.mxu1 %v5910_v21 }
 0x7d4   :  { %1893 = vmatprep.subr.mxu1 %v5911_v12 }
 0x7d5   :  { %1894 = vmatpush2.msra.mxu1 %v6004_v23  ;;  %v6014_v23 = vld [vmem:[#allocation131_spill] sm:$0xff] }
 0x7d6   :  { %1895 = vmatprep.subr.mxu1 %v6005_v26  ;;  %v6015_v26 = vld [vmem:[#allocation132_spill] sm:$0xff] }
 0x7d7   :  { %1896 = vmatpush2.msra.mxu1 %v6006_v9  ;;  %v6016_v9 = vld [vmem:[#allocation133_spill] sm:$0xff] }
 0x7d8   :  { %1897 = vmatprep.subr.mxu1 %v6007_v1  ;;  %v6017_v1 = vld [vmem:[#allocation134_spill] sm:$0xff] }
 0x7d9   :  { %1898 = vmatpush2.msra.mxu1 %v6008_v28  ;;  %v6018_v28 = vld [vmem:[#allocation135_spill] sm:$0xff] }
 0x7da   :  { %1899 = vmatprep.subr.mxu1 %v5917_v30  ;;  %v6011_v30 = vld [vmem:[#allocation128_spill] sm:$0xff] }
 0x7db   :  { %1900 = vmatpush2.msra.mxu1 %v4124_v25  ;;  %v6009_v25 = vld [vmem:[#allocation126_spill] sm:$0xff] }
 0x7dc   :  { %1983 = vmatprep.subr.mxu1 %v5461_v13  ;;  %v1461_v8 = vpop.f32.mrf.mxu1  ;;  %v6010_v13 = vld [vmem:[#allocation127_spill] sm:$0xff] }
 0x7de   :  { %v1463_v5 = vpop.f32.mrf.mxu1 }
 0x81c   :  { %v1607_v19 = vpop.f32.mrf.mxu1 }
 0x81d   :  { %v1608_v61 = vadd.f32 %v1607_v19, %v1461_v8  ;;  %v6019_v8 = vld [vmem:[#allocation136_spill] sm:$0xff]  ;;  %v6021_v19 = vld [vmem:[#allocation138_spill] sm:$0xff] }
 0x81e   :  { %v1609_v21 = vpop.f32.mrf.mxu1 }
 0x81f   :  { %v1610_v12 = vadd.f32 %v1609_v21, %v1463_v5  ;;  %v1612_v56 = vadd.f32 %v1608_v61, %v5462_v34  ;;  %v6020_v5 = vld [vmem:[#allocation137_spill] sm:$0xff]  ;;  %v6022_v61 = vld [vmem:[#allocation139_spill] sm:$0xff]  ;;  %v6023_v21 = vld [vmem:[#allocation140_spill] sm:$0xff] }
 0x821   :  { %v1613_v49 = vadd.f32 %v1610_v12, %v5463_v57  ;;  %v6024_v12 = vld [vmem:[#allocation141_spill] sm:$0xff] }
 0x823   :  { %2301 = vtanh.f32 %v1613_v49  ;;  %v6026_v49 = vld [vmem:[#allocation143_spill] sm:$0xff] }
 0x824   :  { %2303 = vtanh.f32 %v1612_v56  ;;  %v6025_v56 = vld [vmem:[#allocation142_spill] sm:$0xff] }
 0x830   :  { %v2302_v24 = vpop.eup %2301 }
 0x831   :  { %v2304_v6 = vpop.eup %2303  ;;  %1680 = vmatprep.mubr.f32.mxu0 %v2302_v24  ;;  %v6027_v24 = vld [vmem:[#allocation144_spill] sm:$0xff] }
 0x832   :  { %1681 = vmatmul.mubr.f32.vlgmr.msra.gmra.mxu0 %v2304_v6  ;;  %v6028_v6 = vld [vmem:[#allocation145_spill] sm:$0xff] }
 0x833   :  { %1763 = vmatpush1.msra.mxu0 %v5464_v63 }
 0x834   :  { %1764 = vmatprep.subr.mxu0 %v5465_v33 }
 0x835   :  { %1765 = vmatpush1.msra.mxu0 %v5466_v36 }
 0x836   :  { %1766 = vmatprep.subr.mxu0 %v5467_v40 }
 0x837   :  { %1767 = vmatpush1.msra.mxu0 %v5468_v35 }
 0x838   :  { %1768 = vmatprep.subr.mxu0 %v5469_v51 }
 0x839   :  { %1769 = vmatpush1.msra.mxu0 %v5470_v42 }
 0x83a   :  { %1770 = vmatprep.subr.mxu0 %v5471_v39 }
 0x83b   :  { %1771 = vmatpush1.msra.mxu0 %v5472_v46 }
 0x83c   :  { %1772 = vmatprep.subr.mxu0 %v5473_v59 }
 0x83d   :  { %1773 = vmatpush1.msra.mxu0 %v5474_v43 }
 0x83e   :  { %1774 = vmatprep.subr.mxu0 %v5475_v41 }
 0x83f   :  { %1775 = vmatpush1.msra.mxu0 %v5476_v60 }
 0x840   :  { %1776 = vmatprep.subr.mxu0 %v5477_v45 }
 0x841   :  { %1777 = vmatpush1.msra.mxu0 %v5478_v38 }
 0x842   :  { %1778 = vmatprep.subr.mxu0 %v5479_v48 }
 0x843   :  { %1779 = vmatpush1.msra.mxu0 %v5480_v54 }
 0x844   :  { %1780 = vmatprep.subr.mxu0 %v5481_v47 }
 0x845   :  { %1781 = vmatpush1.msra.mxu0 %v5482_v44 }
 0x846   :  { %1782 = vmatprep.subr.mxu0 %v5483_v0 }
 0x847   :  { %1783 = vmatpush1.msra.mxu0 %v6009_v25 }
 0x848   :  { %1784 = vmatprep.subr.mxu0 %v6010_v13 }
 0x849   :  { %1785 = vmatpush1.msra.mxu0 %v6011_v30 }
 0x84a   :  { %1786 = vmatprep.subr.mxu0 %v6012_v7 }
 0x84b   :  { %1787 = vmatpush1.msra.mxu0 %v6013_v10 }
 0x84c   :  { %1788 = vmatprep.subr.mxu0 %v6014_v23 }
 0x84d   :  { %1789 = vmatpush1.msra.mxu0 %v6015_v26 }
 0x84e   :  { %1790 = vmatprep.subr.mxu0 %v6016_v9 }
 0x84f   :  { %1791 = vmatpush1.msra.mxu0 %v6017_v1  ;;  %v6033_v1 = vld [vmem:[#allocation104_spill] sm:$0xff] }
 0x850   :  { %1792 = vmatprep.subr.mxu0 %v6018_v28  ;;  %v6029_v28 = vld [vmem:[#allocation146_spill] sm:$0xff] }
 0x851   :  { %1793 = vmatpush1.msra.mxu0 %v6019_v8  ;;  %v6030_v8 = vld [vmem:[#allocation147_spill] sm:$0xff] }
 0x852   :  { %1794 = vmatprep.subr.mxu0 %v6020_v5 }
 0x853   :  { %1795 = vmatpush2.msra.mxu0 %v6021_v19  ;;  %v6031_v19 = vld [vmem:[#allocation148_spill] sm:$0xff] }
 0x854   :  { %1796 = vmatprep.subr.mxu0 %v6022_v61  ;;  %v6032_v61 = vld [vmem:[#allocation149_spill] sm:$0xff] }
 0x855   :  { %1797 = vmatpush2.msra.mxu0 %v6023_v21 }
 0x856   :  { %1798 = vmatprep.subr.mxu0 %v6024_v12 }
 0x857   :  { %1799 = vmatpush2.msra.mxu0 %v6025_v56  ;;  %v6034_v56 = vld [vmem:[#allocation103_spill] sm:$0xff] }
 0x858   :  { %1800 = vmatprep.subr.mxu0 %v6026_v49 }
 0x859   :  { %1801 = vmatpush2.msra.mxu0 %v6027_v24  ;;  %v6040_v24 = vld [vmem:[#allocation157_spill] sm:$0xff] }
 0x85a   :  { %1802 = vmatprep.subr.mxu0 %v6028_v6  ;;  %v6035_v6 = vld [vmem:[#allocation152_spill] sm:$0xff] }
 0x85b   :  { %1803 = vmatpush2.msra.mxu0 %v6029_v28  ;;  %v6036_v28 = vld [vmem:[#allocation153_spill] sm:$0xff] }
 0x85c   :  { %1804 = vmatprep.subr.mxu0 %v6030_v8  ;;  %v1753_v5 = vpop.f32.mrf.mxu1  ;;  %v6037_v8 = vld [vmem:[#allocation154_spill] sm:$0xff] }
 0x85d   :  { %1805 = vmatpush2.msra.mxu0 %v6031_v19  ;;  %v1758_v49 = vadd.f32 %v1753_v5, %v6034_v56  ;;  %v6038_v19 = vld [vmem:[#allocation155_spill] sm:$0xff]  ;;  %v6043_v5 = vld [vmem:[#allocation160_spill] sm:$0xff]  ;;  %v6045_v56 = vld [vmem:[#allocation162_spill] sm:$0xff] }
 0x85e   :  { %1806 = vmatprep.subr.mxu0 %v6032_v61  ;;  %v1755_v21 = vpop.f32.mrf.mxu1  ;;  %v6039_v61 = vld [vmem:[#allocation156_spill] sm:$0xff] }
 0x85f   :  { %v1759_v12 = vadd.f32 %v1755_v21, %v6033_v1  ;;  %1807 = vmatpush2.msra.mxu0 %v5509_v4  ;;  %v6041_v1 = vld [vmem:[#allocation158_spill] sm:$0xff]  ;;  %v6042_v21 = vld [vmem:[#allocation159_spill] sm:$0xff] }
 0x860   :  { %1808 = vmatprep.subr.mxu0 %v5511_v3 }
 0x861   :  { %2305 = vtanh.f32 %v1759_v12  ;;  %1809 = vmatpush2.msra.mxu0 %v6035_v6  ;;  %v6044_v12 = vld [vmem:[#allocation161_spill] sm:$0xff] }
 0x862   :  { %1810 = vmatprep.subr.mxu0 %v6036_v28  ;;  %2307 = vtanh.f32 %v1758_v49  ;;  %v6046_v28 = vld [vmem:[#allocation163_spill] sm:$0xff] }
 0x863   :  { %1811 = vmatpush2.msra.mxu0 %v6037_v8  ;;  %v6047_v8 = vld [vmem:[#allocation164_spill] sm:$0xff] }
 0x864   :  { %1812 = vmatprep.subr.mxu0 %v6038_v19  ;;  %v6048_v19 = vld [vmem:[#allocation165_spill] sm:$0xff] }
 0x865   :  { %1813 = vmatpush2.msra.mxu0 %v6039_v61  ;;  %v6049_v61 = vld [vmem:[#allocation166_spill] sm:$0xff] }
 0x866   :  { %1814 = vmatprep.subr.mxu0 %v6040_v24  ;;  %v6050_v24 = vld [vmem:[#allocation167_spill] sm:$0xff] }
 0x867   :  { %1815 = vmatpush2.msra.mxu0 %v6041_v1 }
 0x868   :  { %1816 = vmatprep.subr.mxu0 %v6042_v21  ;;  %v6051_v21 = vld [vmem:[#allocation168_spill] sm:$0xff] }
 0x869   :  { %1817 = vmatpush2.msra.mxu0 %v6043_v5  ;;  %v6059_v5 = vld [vmem:[#allocation51_spill] sm:$0xff] }
 0x86a   :  { %1818 = vmatprep.subr.mxu0 %v6044_v12  ;;  %v6052_v12 = vld [vmem:[#allocation58_spill] sm:$0xff] }
 0x86b   :  { %1819 = vmatpush2.msra.mxu0 %v6045_v56  ;;  %v6053_v56 = vld [vmem:[#allocation57_spill] sm:$0xff] }
 0x86c   :  { %1820 = vmatprep.subr.mxu0 %v6046_v28  ;;  %v6055_v28 = vld [vmem:[#allocation55_spill] sm:$0xff] }
 0x86d   :  { %1821 = vmatpush2.msra.mxu0 %v6047_v8  ;;  %v6054_v8 = vld [vmem:[#allocation56_spill] sm:$0xff] }
 0x86e   :  { %v2306_v49 = vpop.eup %2305  ;;  %1822 = vmatprep.subr.mxu0 %v6048_v19  ;;  %v6056_v19 = vld [vmem:[#allocation54_spill] sm:$0xff] }
 0x86f   :  { %1823 = vmatpush2.msra.mxu0 %v6049_v61  ;;  %1826 = vmatprep.mubr.f32.mxu0 %v2306_v49  ;;  %v4543_v1 = vpop.eup %2307  ;;  %v6057_v61 = vld [vmem:[#allocation53_spill] sm:$0xff] }
 0x870   :  { %1824 = vmatprep.subr.mxu0 %v6050_v24  ;;  %v6058_v24 = vld [vmem:[#allocation52_spill] sm:$0xff] }
 0x871   :  { %1825 = vmatpush2.msra.mxu0 %v6051_v21  ;;  %v6060_v21 = vld [vmem:[#allocation50_spill] sm:$0xff] }
 0x872   :  { %1827 = vmatmul.mubr.f32.vlgmr.msra.gmra.mxu0 %v4543_v1  ;;  %1908 = vmatprep.subr.mxu0 %v6052_v12  ;;  %v6087_v12 = vld [vmem:[#allocation67_spill] sm:$0xff] }
 0x873   :  { %1909 = vmatpush1.msra.mxu0 %v6053_v56  ;;  %1972 = vmatprep.mubr.f32.mxu0 %v2306_v49  ;;  %v6088_v56 = vld [vmem:[#allocation66_spill] sm:$0xff]  ;;  %v6089_v49 = vld [vmem:[#allocation65_spill] sm:$0xff] }
 0x874   :  { %1910 = vmatprep.subr.mxu0 %v6054_v8  ;;  %v6080_v8 = vld [vmem:[#allocation75_spill] sm:$0xff] }
 0x875   :  { %1911 = vmatpush1.msra.mxu0 %v6055_v28  ;;  %v6079_v28 = vld [vmem:[#allocation76_spill] sm:$0xff] }
 0x876   :  { %1912 = vmatprep.subr.mxu0 %v6056_v19  ;;  %v6081_v19 = vld [vmem:[#allocation74_spill] sm:$0xff] }
 0x877   :  { %1913 = vmatpush1.msra.mxu0 %v6057_v61  ;;  %v6082_v61 = vld [vmem:[#allocation73_spill] sm:$0xff] }
 0x878   :  { %1914 = vmatprep.subr.mxu0 %v6058_v24  ;;  %v6083_v24 = vld [vmem:[#allocation72_spill] sm:$0xff] }
 0x879   :  { %1915 = vmatpush1.msra.mxu0 %v6059_v5  ;;  %v6085_v5 = vld [vmem:[#allocation70_spill] sm:$0xff] }
 0x87a   :  { %1916 = vmatprep.subr.mxu0 %v6060_v21  ;;  %v6084_v21 = vld [vmem:[#allocation71_spill] sm:$0xff] }
 0x87b   :  { %1917 = vmatpush1.msra.mxu0 %v5968_v27  ;;  %v6061_v27 = vld [vmem:[#allocation37_spill] sm:$0xff] }
 0x87c   :  { %1918 = vmatprep.subr.mxu0 %v5969_v15  ;;  %v6062_v15 = vld [vmem:[#allocation35_spill] sm:$0xff] }
 0x87d   :  { %1919 = vmatpush1.msra.mxu0 %v5970_v32  ;;  %v6077_v32 = vld [vmem:[#allocation78_spill] sm:$0xff] }
 0x87e   :  { %1920 = vmatprep.subr.mxu0 %v5971_v52  ;;  %v6078_v52 = vld [vmem:[#allocation77_spill] sm:$0xff] }
 0x87f   :  { %1921 = vmatpush1.msra.mxu0 %v5972_v20  ;;  %v6070_v20 = vld [vmem:[#allocation86_spill] sm:$0xff] }
 0x880   :  { %1922 = vmatprep.subr.mxu0 %v5973_v17  ;;  %v6063_v17 = vld [vmem:[#allocation33_spill] sm:$0xff] }
 0x881   :  { %1923 = vmatpush1.msra.mxu0 %v5974_v2  ;;  %v6064_v2 = vld [vmem:[#allocation31_spill] sm:$0xff] }
 0x882   :  { %1924 = vmatprep.subr.mxu0 %v5975_v62  ;;  %v6065_v62 = vld [vmem:[#allocation29_spill] sm:$0xff] }
 0x883   :  { %1925 = vmatpush1.msra.mxu0 %v5976_v14  ;;  %v6068_v14 = vld [vmem:[#allocation88_spill] sm:$0xff] }
 0x884   :  { %1926 = vmatprep.subr.mxu0 %v5977_v31  ;;  %v6074_v31 = vld [vmem:[#allocation82_spill] sm:$0xff] }
 0x885   :  { %1927 = vmatpush1.msra.mxu0 %v5978_v22  ;;  %v6072_v22 = vld [vmem:[#allocation84_spill] sm:$0xff] }
 0x886   :  { %1928 = vmatprep.subr.mxu0 %v5835_v50  ;;  %v6066_v50 = vld [vmem:[#allocation90_spill] sm:$0xff] }
 0x887   :  { %1929 = vmatpush1.msra.mxu0 %v6061_v27  ;;  %v6090_v27 = vld [vmem:[#allocation64_spill] sm:$0xff] }
 0x888   :  { %1930 = vmatprep.subr.mxu0 %v5837_v58  ;;  %v6067_v58 = vld [vmem:[#allocation89_spill] sm:$0xff] }
 0x889   :  { %1931 = vmatpush1.msra.mxu0 %v6062_v15  ;;  %v6091_v15 = vld [vmem:[#allocation63_spill] sm:$0xff] }
 0x88a   :  { %1932 = vmatprep.subr.mxu0 %v5839_v18  ;;  %v6069_v18 = vld [vmem:[#allocation87_spill] sm:$0xff] }
 0x88b   :  { %1933 = vmatpush1.msra.mxu0 %v6063_v17  ;;  %v6092_v17 = vld [vmem:[#allocation62_spill] sm:$0xff] }
 0x88c   :  { %1934 = vmatprep.subr.mxu0 %v5841_v11  ;;  %v6071_v11 = vld [vmem:[#allocation85_spill] sm:$0xff] }
 0x88d   :  { %1935 = vmatpush1.msra.mxu0 %v6064_v2  ;;  %v6093_v2 = vld [vmem:[#allocation61_spill] sm:$0xff] }
 0x88e   :  { %1936 = vmatprep.subr.mxu0 %v5843_v29  ;;  %v6073_v29 = vld [vmem:[#allocation83_spill] sm:$0xff] }
 0x88f   :  { %1937 = vmatpush1.msra.mxu0 %v6065_v62  ;;  %v6094_v62 = vld [vmem:[#allocation60_spill] sm:$0xff] }
 0x890   :  { %1938 = vmatprep.subr.mxu0 %v5845_v55  ;;  %v6075_v55 = vld [vmem:[#allocation81_spill] sm:$0xff] }
 0x891   :  { %1939 = vmatpush1.msra.mxu0 %v5703_v16  ;;  %v6076_v16 = vld [vmem:[#allocation79_spill] sm:$0xff] }
 0x892   :  { %1940 = vmatprep.subr.mxu0 %v6066_v50  ;;  %v6095_v50 = vld [vmem:[#allocation59_spill] sm:$0xff] }
 0x893   :  { %1941 = vmatpush2.msra.mxu0 %v6067_v58 }
 0x894   :  { %1942 = vmatprep.subr.mxu0 %v6068_v14 }
 0x895   :  { %1943 = vmatpush2.msra.mxu0 %v6069_v18 }
 0x896   :  { %1944 = vmatprep.subr.mxu0 %v6070_v20 }
 0x897   :  { %1945 = vmatpush2.msra.mxu0 %v6071_v11 }
 0x898   :  { %1946 = vmatprep.subr.mxu0 %v6072_v22 }
 0x899   :  { %1947 = vmatpush2.msra.mxu0 %v6073_v29 }
 0x89a   :  { %1948 = vmatprep.subr.mxu0 %v6074_v31 }
 0x89b   :  { %1949 = vmatpush2.msra.mxu0 %v6075_v55 }
 0x89c   :  { %1950 = vmatprep.subr.mxu0 %v5570_v37  ;;  %v6086_v37 = vld [vmem:[#allocation68_spill] sm:$0xff] }
 0x89d   :  { %1951 = vmatpush2.msra.mxu0 %v6076_v16  ;;  %v6124_v16 = vld [vmem:[#allocation163_spill] sm:$0xff] }
 0x89e   :  { %1952 = vmatprep.subr.mxu0 %v6077_v32  ;;  %v6125_v32 = vld [vmem:[#allocation164_spill] sm:$0xff] }
 0x89f   :  { %1953 = vmatpush2.msra.mxu0 %v6078_v52 }
 0x8a0   :  { %1954 = vmatprep.subr.mxu0 %v6079_v28  ;;  %v6126_v28 = vld [vmem:[#allocation165_spill] sm:$0xff] }
 0x8a1   :  { %1955 = vmatpush2.msra.mxu0 %v6080_v8  ;;  %v6127_v8 = vld [vmem:[#allocation166_spill] sm:$0xff] }
 0x8a2   :  { %1956 = vmatprep.subr.mxu0 %v6081_v19  ;;  %v6128_v19 = vld [vmem:[#allocation167_spill] sm:$0xff] }
 0x8a3   :  { %1957 = vmatpush2.msra.mxu0 %v6082_v61 }
 0x8a4   :  { %1958 = vmatprep.subr.mxu0 %v6083_v24  ;;  %v6129_v24 = vld [vmem:[#allocation168_spill] sm:$0xff] }
 0x8a5   :  { %1959 = vmatpush2.msra.mxu0 %v6084_v21 }
 0x8a6   :  { %1960 = vmatprep.subr.mxu0 %v6085_v5 }
 0x8a7   :  { %1961 = vmatpush2.msra.mxu0 %v5437_v53 }
 0x8a8   :  { %1962 = vmatprep.subr.mxu0 %v6086_v37 }
 0x8a9   :  { %1963 = vmatpush2.msra.mxu0 %v6087_v12 }
 0x8aa   :  { %1964 = vmatprep.subr.mxu0 %v6088_v56 }
 0x8ab   :  { %1965 = vmatpush2.msra.mxu0 %v6089_v49 }
 0x8ac   :  { %1966 = vmatprep.subr.mxu0 %v6090_v27 }
 0x8ad   :  { %1967 = vmatpush2.msra.mxu0 %v6091_v15 }
 0x8ae   :  { %1968 = vmatprep.subr.mxu0 %v6092_v17 }
 0x8af   :  { %1969 = vmatpush2.msra.mxu0 %v6093_v2 }
 0x8b0   :  { %1970 = vmatprep.subr.mxu0 %v6094_v62 }
 0x8b1   :  { %1971 = vmatpush2.msra.mxu0 %v6095_v50 }
 0x8b2   :  { %1973 = vmatmul.mubr.f32.vlgmr.msra.gmra.mxu0 %v4543_v1  ;;  %v6121_v1 = vld [vmem:[#allocation160_spill] sm:$0xff] }
 0x8f2   :  { %v1682_v53 = vpop.f32.mrf.mxu0 }
 0x8f4   :  { %v1684_v58 = vpop.f32.mrf.mxu0 }
 0x932   :  { %v1828_v14 = vpop.f32.mrf.mxu0 }
 0x933   :  { %v1829_v18 = vadd.f32 %v1828_v14, %v1682_v53 }
 0x934   :  { %v1830_v20 = vpop.f32.mrf.mxu0 }
 0x935   :  { %v1831_v11 = vadd.f32 %v1830_v20, %v1684_v58  ;;  %v1833_v22 = vadd.f32 %v1829_v18, %v5462_v34 }
 0x937   :  { %v1834_v29 = vadd.f32 %v1831_v11, %v5463_v57 }
 0x939   :  { %2309 = vtanh.f32 %v1834_v29 }
 0x93a   :  { %2311 = vtanh.f32 %v1833_v22 }
 0x946   :  { %v2310_v31 = vpop.eup %2309 }
 0x947   :  { %v2312_v55 = vpop.eup %2311  ;;  %1901 = vmatprep.mubr.f32.mxu1 %v2310_v31 }
 0x948   :  { %1902 = vmatmul.mubr.f32.vlgmr.msra.gmra.mxu1 %v2312_v55 }
 0x949   :  { %1984 = vmatpush1.msra.mxu1 %v5464_v63  ;;  %v6096_v63 = vld [vmem:[#allocation134_spill] sm:$0xff] }
 0x94a   :  { %1985 = vmatprep.subr.mxu1 %v5465_v33  ;;  %v6097_v33 = vld [vmem:[#allocation135_spill] sm:$0xff] }
 0x94b   :  { %1986 = vmatpush1.msra.mxu1 %v5466_v36  ;;  %v6098_v36 = vld [vmem:[#allocation136_spill] sm:$0xff] }
 0x94c   :  { %1987 = vmatprep.subr.mxu1 %v5467_v40  ;;  %v6099_v40 = vld [vmem:[#allocation137_spill] sm:$0xff] }
 0x94d   :  { %1988 = vmatpush1.msra.mxu1 %v5468_v35  ;;  %v6100_v35 = vld [vmem:[#allocation138_spill] sm:$0xff] }
 0x94e   :  { %1989 = vmatprep.subr.mxu1 %v5469_v51  ;;  %v6101_v51 = vld [vmem:[#allocation139_spill] sm:$0xff] }
 0x94f   :  { %1990 = vmatpush1.msra.mxu1 %v5470_v42  ;;  %v6102_v42 = vld [vmem:[#allocation140_spill] sm:$0xff] }
 0x950   :  { %1991 = vmatprep.subr.mxu1 %v5471_v39  ;;  %v6103_v39 = vld [vmem:[#allocation141_spill] sm:$0xff] }
 0x951   :  { %1992 = vmatpush1.msra.mxu1 %v5472_v46  ;;  %v6104_v46 = vld [vmem:[#allocation142_spill] sm:$0xff] }
 0x952   :  { %1993 = vmatprep.subr.mxu1 %v5473_v59  ;;  %v6105_v59 = vld [vmem:[#allocation143_spill] sm:$0xff] }
 0x953   :  { %1994 = vmatpush1.msra.mxu1 %v5474_v43  ;;  %v6106_v43 = vld [vmem:[#allocation144_spill] sm:$0xff] }
 0x954   :  { %1995 = vmatprep.subr.mxu1 %v5475_v41  ;;  %v6107_v41 = vld [vmem:[#allocation145_spill] sm:$0xff] }
 0x955   :  { %1996 = vmatpush1.msra.mxu1 %v5476_v60  ;;  %v6108_v60 = vld [vmem:[#allocation146_spill] sm:$0xff] }
 0x956   :  { %1997 = vmatprep.subr.mxu1 %v5477_v45  ;;  %v6109_v45 = vld [vmem:[#allocation147_spill] sm:$0xff] }
 0x957   :  { %1998 = vmatpush1.msra.mxu1 %v5478_v38 }
 0x958   :  { %1999 = vmatprep.subr.mxu1 %v5479_v48  ;;  %v6110_v48 = vld [vmem:[#allocation148_spill] sm:$0xff] }
 0x959   :  { %2000 = vmatpush1.msra.mxu1 %v5480_v54  ;;  %v6111_v54 = vld [vmem:[#allocation149_spill] sm:$0xff] }
 0x95a   :  { %2001 = vmatprep.subr.mxu1 %v5481_v47 }
 0x95b   :  { %2002 = vmatpush1.msra.mxu1 %v5482_v44  ;;  %v6112_v44 = vld [vmem:[#allocation102_spill] sm:$0xff] }
 0x95c   :  { %2003 = vmatprep.subr.mxu1 %v5483_v0 }
 0x95d   :  { %2004 = vmatpush1.msra.mxu1 %v6009_v25  ;;  %v6113_v25 = vld [vmem:[#allocation101_spill] sm:$0xff] }
 0x95e   :  { %2005 = vmatprep.subr.mxu1 %v6010_v13 }
 0x95f   :  { %2006 = vmatpush1.msra.mxu1 %v6011_v30  ;;  %v6114_v30 = vld [vmem:[#allocation153_spill] sm:$0xff] }
 0x960   :  { %2007 = vmatprep.subr.mxu1 %v6012_v7  ;;  %v6115_v7 = vld [vmem:[#allocation154_spill] sm:$0xff] }
 0x961   :  { %2008 = vmatpush1.msra.mxu1 %v6013_v10  ;;  %v6116_v10 = vld [vmem:[#allocation155_spill] sm:$0xff] }
 0x962   :  { %2009 = vmatprep.subr.mxu1 %v6014_v23  ;;  %v6117_v23 = vld [vmem:[#allocation156_spill] sm:$0xff] }
 0x963   :  { %2010 = vmatpush1.msra.mxu1 %v6015_v26  ;;  %v6118_v26 = vld [vmem:[#allocation157_spill] sm:$0xff] }
 0x964   :  { %2011 = vmatprep.subr.mxu1 %v6016_v9  ;;  %v6119_v9 = vld [vmem:[#allocation158_spill] sm:$0xff] }
 0x965   :  { %2012 = vmatpush1.msra.mxu1 %v6096_v63 }
 0x966   :  { %2013 = vmatprep.subr.mxu1 %v6097_v33 }
 0x967   :  { %2014 = vmatpush1.msra.mxu1 %v6098_v36 }
 0x968   :  { %2015 = vmatprep.subr.mxu1 %v6099_v40 }
 0x969   :  { %2016 = vmatpush2.msra.mxu1 %v6100_v35 }
 0x96a   :  { %2017 = vmatprep.subr.mxu1 %v6101_v51 }
 0x96b   :  { %2018 = vmatpush2.msra.mxu1 %v6102_v42 }
 0x96c   :  { %2019 = vmatprep.subr.mxu1 %v6103_v39 }
 0x96d   :  { %2020 = vmatpush2.msra.mxu1 %v6104_v46 }
 0x96e   :  { %2021 = vmatprep.subr.mxu1 %v6105_v59 }
 0x96f   :  { %2022 = vmatpush2.msra.mxu1 %v6106_v43 }
 0x970   :  { %2023 = vmatprep.subr.mxu1 %v6107_v41 }
 0x971   :  { %2024 = vmatpush2.msra.mxu1 %v6108_v60 }
 0x972   :  { %2025 = vmatprep.subr.mxu1 %v6109_v45  ;;  %v1974_v38 = vpop.f32.mrf.mxu0 }
 0x973   :  { %2026 = vmatpush2.msra.mxu1 %v6110_v48  ;;  %v1979_v13 = vadd.f32 %v1974_v38, %v6113_v25 }
 0x974   :  { %2027 = vmatprep.subr.mxu1 %v6111_v54  ;;  %v1976_v47 = vpop.f32.mrf.mxu0 }
 0x975   :  { %v1980_v0 = vadd.f32 %v1976_v47, %v6112_v44  ;;  %2028 = vmatpush2.msra.mxu1 %v5509_v4  ;;  %v6120_v4 = vld [vmem:[#allocation159_spill] sm:$0xff] }
 0x976   :  { %2029 = vmatprep.subr.mxu1 %v5511_v3  ;;  %v6122_v3 = vld [vmem:[#allocation161_spill] sm:$0xff] }
 0x977   :  { %2313 = vtanh.f32 %v1980_v0  ;;  %2030 = vmatpush2.msra.mxu1 %v6035_v6  ;;  %v6123_v6 = vld [vmem:[#allocation162_spill] sm:$0xff] }
 0x978   :  { %2031 = vmatprep.subr.mxu1 %v6114_v30  ;;  %2315 = vtanh.f32 %v1979_v13 }
 0x979   :  { %2032 = vmatpush2.msra.mxu1 %v6115_v7 }
 0x97a   :  { %2033 = vmatprep.subr.mxu1 %v6116_v10 }
 0x97b   :  { %2034 = vmatpush2.msra.mxu1 %v6117_v23 }
 0x97c   :  { %2035 = vmatprep.subr.mxu1 %v6118_v26 }
 0x97d   :  { %2036 = vmatpush2.msra.mxu1 %v6119_v9 }
 0x97e   :  { %2037 = vmatprep.subr.mxu1 %v6120_v4 }
 0x97f   :  { %2038 = vmatpush2.msra.mxu1 %v6121_v1 }
 0x980   :  { %2039 = vmatprep.subr.mxu1 %v6122_v3 }
 0x981   :  { %2040 = vmatpush2.msra.mxu1 %v6123_v6 }
 0x982   :  { %2041 = vmatprep.subr.mxu1 %v6124_v16 }
 0x983   :  { %2042 = vmatpush2.msra.mxu1 %v6125_v32 }
 0x984   :  { %v2314_v52 = vpop.eup %2313  ;;  %2043 = vmatprep.subr.mxu1 %v6126_v28 }
 0x985   :  { %2044 = vmatpush2.msra.mxu1 %v6127_v8  ;;  %2047 = vmatprep.mubr.f32.mxu1 %v2314_v52  ;;  %v2316_v61 = vpop.eup %2315 }
 0x986   :  { %2045 = vmatprep.subr.mxu1 %v6128_v19 }
 0x987   :  { %2046 = vmatpush2.msra.mxu1 %v6129_v24 }
 0x988   :  { %2048 = vmatmul.mubr.f32.vlgmr.msra.gmra.mxu1 %v2316_v61 }
 0xa08   :  { %v1903_v21 = vpop.f32.mrf.mxu1 }
 0xa0a   :  { %v1905_v5 = vpop.f32.mrf.mxu1 }
 0xa48   :  { %v2049_v37 = vpop.f32.mrf.mxu1 }
 0xa49   :  { %v2050_v12 = vadd.f32 %v2049_v37, %v1903_v21 }
 0xa4a   :  { %v2051_v56 = vpop.f32.mrf.mxu1 }
 0xa4b   :  { %v2054_v49 = vadd.f32 %v2050_v12, %v5462_v34  ;;  %v2052_v27 = vadd.f32 %v2051_v56, %v1905_v5 }
 0xa4d   :  { %2317 = vtanh.f32 %v2054_v49  ;;  %v2055_v15 = vadd.f32 %v2052_v27, %v5463_v57 }
 0xa4f   :  { %2319 = vtanh.f32 %v2055_v15 }
 0xa5a   :  { %v4681_v17 = vpop.eup %2317 }
 0xa5b   :  { %v2058_v2 = vmax.f32 %v4681_v17, 0.0 }
 0xa5c   :  { %v2320_v62 = vpop.eup %2319 }
 0xa5d   :  { %v2059_v50 = vmax.f32 %v2320_v62, 0.0 }
 0xa5e   :  { %2584 = dma.done.wait [#allocation5 + $0x2], 4096 }
 0xa5f   :  { %2585 = vsyncadd [#allocation5 + $0x2], 4294963200  ;;  %2166 = vmatprep.mubr.f32.mxu0 %v2059_v50  ;;  %v2094_v53 = vld [vmem:[#allocation4 + $0xf8] sm:$0xff]  ;;  %v2093_v14 = vld [vmem:[#allocation4 + $0xf0] sm:$0xff]  ;;  %s2596_s29 = smov [#allocation12]  }
 0xa60   :  { %v2078_v58 = vld [vmem:[#allocation4 + $0x78] sm:$0xff]  ;;  %2213 = vmatprep.subr.mxu0 %v2094_v53  ;;  %v2077_v18 = vld [vmem:[#allocation4 + $0x70] sm:$0xff]  ;;  %v2092_v34 = vld [vmem:[#allocation4 + $0xe8] sm:$0xff]  ;;  %s2179_s30 = sshll.u32 %s2596_s29, 4  ;;  %s2180_s30 = int_to_ptr.vmem [resolvable:$true] %s2179_s30 }
 0xa61   :  { %2214 = vmatpush3.msra.mxu0 %v2078_v58  ;;  %v2076_v20 = vld [vmem:[#allocation4 + $0x68] sm:$0xff]  ;;  %v2091_v57 = vld [vmem:[#allocation4 + $0xe0] sm:$0xff]  ;;  %v2090_v22 = vld [vmem:[#allocation4 + $0xd8] sm:$0xff]  ;;  %s2556_s8 = scalar_lea.vmem %s2180_s30, 128  ;;  %p2561_p3 = scmp.lt.s32.totalorder %s2180_s30, %s2180_s30 }
 0xa62   :  { %2215 = vmatprep.subr.mxu0 %v2093_v14  ;;  %v2075_v11 = vld [vmem:[#allocation4 + $0x60] sm:$0xff]  ;;  %v2074_v29 = vld [vmem:[#allocation4 + $0x58] sm:$0xff]  ;;  %v2089_v31 = vld [vmem:[#allocation4 + $0xd0] sm:$0xff]  ;;  %p2557_p2 = scmp.ne.s32.totalorder %s2180_s30, %s2556_s8  ;;  %p2562_p4 = scmp.lt.s32.totalorder %s2556_s8, %s2556_s8 }
 0xa63   :  { %2216 = vmatpush3.msra.mxu0 %v2077_v18  ;;  %v2073_v55 = vld [vmem:[#allocation4 + $0x50] sm:$0xff]  ;;  %v2088_v63 = vld [vmem:[#allocation4 + $0xc8] sm:$0xff]  ;;  %v2087_v36 = vld [vmem:[#allocation4 + $0xc0] sm:$0xff] }
 0xa64   :  { %2217 = vmatprep.subr.mxu0 %v2092_v34  ;;  %v2072_v33 = vld [vmem:[#allocation4 + $0x48] sm:$0xff]  ;;  %v2071_v40 = vld [vmem:[#allocation4 + $0x40] sm:$0xff]  ;;  %v2086_v35 = vld [vmem:[#allocation4 + $0xb8] sm:$0xff]  ;;  %p2563_p5 = por %p2562_p4, %p2561_p3 }
 0xa65   :  { %2218 = vmatpush3.msra.mxu0 %v2076_v20  ;;  %v2070_v51 = vld [vmem:[#allocation4 + $0x38] sm:$0xff]  ;;  %v2085_v42 = vld [vmem:[#allocation4 + $0xb0] sm:$0xff]  ;;  %v2084_v46 = vld [vmem:[#allocation4 + $0xa8] sm:$0xff] }
 0xa66   :  { %2219 = vmatprep.subr.mxu0 %v2091_v57  ;;  %v2069_v39 = vld [vmem:[#allocation4 + $0x30] sm:$0xff]  ;;  %v2068_v59 = vld [vmem:[#allocation4 + $0x28] sm:$0xff]  ;;  %v2083_v43 = vld [vmem:[#allocation4 + $0xa0] sm:$0xff]  ;;  %p2564_p6 = pnand %p2563_p5, %p2557_p2 }
 0xa67   :  { %2220 = vmatpush3.msra.mxu0 %v2075_v11  ;;  %v2067_v41 = vld [vmem:[#allocation4 + $0x20] sm:$0xff]  ;;  %v2082_v60 = vld [vmem:[#allocation4 + $0x98] sm:$0xff]  ;;  %v2081_v38 = vld [vmem:[#allocation4 + $0x90] sm:$0xff] }
 0xa68   :  { %2221 = vmatprep.subr.mxu0 %v2090_v22  ;;  %v2066_v45 = vld [vmem:[#allocation4 + $0x18] sm:$0xff]  ;;  %v2065_v48 = vld [vmem:[#allocation4 + $0x10] sm:$0xff]  ;;  %v2080_v54 = vld [vmem:[#allocation4 + $0x88] sm:$0xff] }
 0xa69   :  { %2222 = vmatpush3.msra.mxu0 %v2074_v29  ;;  %v2064_v47 = vld [vmem:[#allocation4 + $0x8] sm:$0xff]  ;;  %v2079_v44 = vld [vmem:[#allocation4 + $0x80] sm:$0xff] }
 0xa6a   :  { %2223 = vmatprep.subr.mxu0 %v2089_v31  ;;  %v2063_v0 = vld [vmem:[#allocation4] sm:$0xff] }
 0xa6b   :  { %2224 = vmatpush3.msra.mxu0 %v2073_v55  ;;  %v2209_v13 = vld [vmem:[%s4695_s3] ss:$0 sm:$0xff] }
 0xa6c   :  { %2225 = vmatprep.subr.mxu0 %v2088_v63 }
 0xa6d   :  { %2226 = vmatpush3.msra.mxu0 %v2072_v33 }
 0xa6e   :  { %2227 = vmatprep.subr.mxu0 %v2087_v36 }
 0xa6f   :  { %2228 = vmatpush3.msra.mxu0 %v2071_v40 }
 0xa70   :  { %2229 = vmatprep.subr.mxu0 %v2086_v35 }
 0xa71   :  { %2230 = vmatpush3.msra.mxu0 %v2070_v51 }
 0xa72   :  { %2231 = vmatprep.subr.mxu0 %v2085_v42 }
 0xa73   :  { %2232 = vmatpush3.msra.mxu0 %v2069_v39 }
 0xa74   :  { %2233 = vmatprep.subr.mxu0 %v2084_v46 }
 0xa75   :  { %2234 = vmatpush3.msra.mxu0 %v2068_v59 }
 0xa76   :  { %2235 = vmatprep.subr.mxu0 %v2083_v43 }
 0xa77   :  { %2236 = vmatpush3.msra.mxu0 %v2067_v41 }
 0xa78   :  { %2237 = vmatprep.subr.mxu0 %v2082_v60 }
 0xa79   :  { %2238 = vmatpush3.msra.mxu0 %v2066_v45 }
 0xa7a   :  { %2239 = vmatprep.subr.mxu0 %v2081_v38 }
 0xa7b   :  { %2240 = vmatpush3.msra.mxu0 %v2065_v48 }
 0xa7c   :  { %2241 = vmatprep.subr.mxu0 %v2080_v54 }
 0xa7d   :  { %2242 = vmatpush3.msra.mxu0 %v2064_v47 }
 0xa7e   :  { %2243 = vmatprep.subr.mxu0 %v2079_v44 }
 0xa7f   :  { %2244 = vmatpush3.msra.mxu0 %v2063_v0 }
 0xa80   :  { %2167 = vmatmul.mubr.f32.vlgmr.msra.gmra.mxu0 %v2058_v2 }
 0xb40   :  { %v2245_v25 = vpop.f32.mrf.mxu0 }
 0xb42   :  { %v2246_v30 = vpop.f32.mrf.mxu0 }
 0xb43   :  { %v2247_v7 = vadd.f32 %v2246_v30, %v2245_v25 }
 0xb45   :  { %v2169_v10 = vadd.f32 %v2247_v7, %v2209_v13 }
 0xb47   :  { %2172 = vst [vmem:[#allocation12] sm:$0xff] %v2169_v10 }
 0xb48   :  { %2567 = shalt.err (!%p2564_p6)
}
 0xb49   :  { %2182 = dma.vmem_to_hbm [thread:$0]  %s2180_s30, 128, %s4699_s7, [#allocation8]  }
 0xb4a   :  { %2586 = dma.done.wait [#allocation8], 128  }
 0xb4b   :  { %2587 = vsyncadd [#allocation8], 4294967168 }
 0xb4c   :  { %2186 = vsyncpa [#allocation7], 1 }
 0xb4d   :  { %2187 = vsyncpa [#allocation10], 1 }
 0xb4e   :  { %2188 = vsyncpa [#allocation8], 1 }
 0xb4f   :  { %2189 = vsyncmov [#allocation5] }
 0xb52   :  { %s2190_s3 = vpop.sfrf %2189 }
 0xb53   :  { %p2210_p7 = scmp.ne.s32.totalorder %s2190_s3, 0 }
 0xb55   :  { %2194 = shalt.err (%p2210_p7)  }
 0xb56   :  { %2196 = vsyncmov [#allocation5 + $0x1] }
 0xb59   :  { %s2197_s11 = vpop.sfrf %2196 }
 0xb5a   :  { %p2211_p8 = scmp.ne.s32.totalorder %s2197_s11, 0 }
 0xb5c   :  { %2201 = shalt.err (%p2211_p8)  }
 0xb5d   :  { %2203 = vsyncmov [#allocation5 + $0x2] }
 0xb60   :  { %s2204_s12 = vpop.sfrf %2203 }
 0xb61   :  { %p2212_p9 = scmp.ne.s32.totalorder %s2204_s12, 0 }
 0xb63   :  { %2208 = shalt.err (%p2212_p9)  }

</bundles_post_ra>
